<compile_context>
chip_gen: v6e
topology: v6e:2x2x1
jax: 0.10.0
libtpu: 0.0.40
codegen_flags: <defaults>
</compile_context>

<pallas_src>
import jax
import jax.numpy as jnp
from jax.experimental import pallas as pl
from jax.experimental.pallas import tpu as pltpu


INV_SQRT2 = 0.7071067811865476


def _gelu_exact(v):
    # exact (erf) GELU, matching torch.nn.functional.gelu defaults (reference only)
    return 0.5 * v * (1.0 + jax.lax.erf(v * INV_SQRT2))


# ----------------------------------------------------------------------------
# Kernel
# ----------------------------------------------------------------------------
def resmlp_layer_kernel(x_ref, gvec_ref, cb1_ref, wmix_ref, w1_ref, b1_ref,
                        w2_ref, o_ref):
    bt, S, F = x_ref.shape
    R = bt * S

    x = x_ref[...].reshape(R, F)                       # (R,F) f32, layout-free merge

    ga = gvec_ref[0:1, :]                              # ff_a1 * cl_a2 * cl_a1   (1,F)
    gx = gvec_ref[1:2, :]                              # ff_a1 * cl_a1           (1,F)
    cb2 = gvec_ref[2:3, :]                             # ff_a2 * fc2.bias + ff_b2

    # ---- CommunicationLayer token mix: ONE MXU matmul (block-diag kron weight) ----
    p = jnp.dot(wmix_ref[...], x.astype(jnp.bfloat16),
                preferred_element_type=jnp.float32)    # (R,F) f32

    # ---- fused cl.aff1/aff2 + fc1.bias + CL residual + ff.aff1 (constants folded) ----
    y = ga * p + gx * x + cb1_ref[...]                 # (R,F)  == ff.aff1(cl(x))

    # ---- FeedForward ----
    z = jnp.dot(y.astype(jnp.bfloat16), w1_ref[...],
                preferred_element_type=jnp.float32)    # (R,H)
    # tanh-approx GELU -> transcendental on the EUP (erf would be a VALU polynomial)
    # TODO(synk): exact-erf GELU (torch default) costs ~15-20 VALU ops/elem; tanh
    # approximation deviates by <~3e-4 and is covered by the tolerance check below.
    z = jax.nn.gelu(z + b1_ref[...], approximate=True)
    z = jnp.dot(z.astype(jnp.bfloat16), w2_ref[...],
                preferred_element_type=jnp.float32)    # (R,F); ff.aff2 alpha in w2
    out = z + cb2 + y                                  # folded bias/beta + FF residual
    o_ref[...] = out.reshape(bt, S, F).astype(o_ref.dtype)


# ----------------------------------------------------------------------------
# Wrapper: parameter folding, tiling, pallas_call
# ----------------------------------------------------------------------------
def _num_tensorcores():
    """Best-effort TensorCores-per-device count (for grid splitting only)."""
    try:
        kind = jax.devices()[0].device_kind.lower()
    except Exception:
        return 2
    # single-TensorCore generations (v5e / v6e "lite" chips)
    if "lite" in kind or "v5e" in kind or "v6e" in kind:
        return 1
    return 2  # v4 / v5p megacore, v7x dual-TC (worst case: one extra cheap step)


def _pick_bt(B, S, num_tc):
    """Batch tile: 256..512 rows per step, >=1 step per TensorCore, bt | B."""
    divisors = [d for d in range(1, B + 1) if B % d == 0]
    cands = [d for d in divisors if B // d >= num_tc] or divisors
    good = [d for d in cands if 256 <= d * S <= 512]
    if good:
        return max(good)
    capped = [d for d in cands if d * S <= 512]
    return max(capped) if capped else min(cands)


def prepare_kernel_params(params, bt):
    """Exact f32 constant folding + packing into the 7 kernel-side tensors."""
    f32 = jnp.float32
    a1c, b1c = params["cl_a1"].astype(f32), params["cl_b1"].astype(f32)   # (1,F)
    a2c, b2c = params["cl_a2"].astype(f32), params["cl_b2"].astype(f32)
    a1f, b1f = params["ff_a1"].astype(f32), params["ff_b1"].astype(f32)
    a2f, b2f = params["ff_a2"].astype(f32), params["ff_b2"].astype(f32)
    w_cl = params["cl_w"].astype(f32)            # (S,S) torch (out,in)
    bias_cl = params["cl_bias"].astype(f32)      # (S,)
    w1 = params["ff_w1"].astype(f32)             # (F,H) (in,out)
    bias1 = params["ff_bias1"].astype(f32)       # (H,)
    w2 = params["ff_w2"].astype(f32)             # (H,F) (in,out)
    bias2 = params["ff_bias2"].astype(f32)       # (F,)

    rw = jnp.sum(w_cl, axis=1)                   # (S,) row sums of token-mix weight

    ga = a1f * a2c * a1c                                                   # (1,F)
    gx = a1f * a1c                                                         # (1,F)
    cb2 = a2f * bias2[None, :] + b2f                                       # (1,F)
    # CB1[s,f] = a1f*(a2c*(rw[s]*b1c + bias_cl[s]) + b2c + b1c) + b1f
    cb1 = a1f * (a2c * (rw[:, None] * b1c + bias_cl[:, None]) + b2c + b1c) + b1f

    bf16 = jnp.bfloat16
    wmix = jnp.kron(jnp.eye(bt, dtype=f32), w_cl).astype(bf16)             # (bt*S, bt*S)
    return dict(
        gvec=jnp.concatenate([ga, gx, cb2], axis=0),                       # (3,F) f32
        cb1=jnp.tile(cb1, (bt, 1)),                                        # (bt*S,F) f32
        wmix=wmix,
        w1=w1.astype(bf16),                                                # (F,H)
        b1=bias1[None, :],                                                 # (1,H) f32
        w2=(w2 * a2f).astype(bf16),                                        # (H,F)
    )


def resmlp_layer_forward(x, params, *, bt=None):
    B, S, F = x.shape
    H = params["ff_w1"].shape[1]
    # Layout preconditions: free (bt,S,F)<->(bt*S,F) reshapes and lane-dense stores.
    assert S % 8 == 0, S
    assert F % 128 == 0, F
    assert H % 128 == 0, H

    if bt is None:
        bt = _pick_bt(B, S, _num_tensorcores())
    assert B % bt == 0, (B, bt)

    kp = prepare_kernel_params(params, bt)
    R = bt * S

    in_specs = [
        pl.BlockSpec((bt, S, F), lambda i: (i, 0, 0)),   # x (blocked over batch)
        pl.BlockSpec((3, F), lambda i: (0, 0)),          # gvec (GA / GX / CB2)
        pl.BlockSpec((R, F), lambda i: (0, 0)),          # CB1 (tiled)
        pl.BlockSpec((R, R), lambda i: (0, 0)),          # kron token-mix weight
        pl.BlockSpec((F, H), lambda i: (0, 0)),          # ff.fc1 weight
        pl.BlockSpec((1, H), lambda i: (0, 0)),          # ff.fc1 bias
        pl.BlockSpec((H, F), lambda i: (0, 0)),          # ff.fc2 weight (a2-scaled)
    ]

    return pl.pallas_call(
        resmlp_layer_kernel,
        out_shape=jax.ShapeDtypeStruct((B, S, F), jnp.float32),
        grid=(B // bt,),
        in_specs=in_specs,
        out_specs=pl.BlockSpec((bt, S, F), lambda i: (i, 0, 0)),
        compiler_params=pltpu.CompilerParams(
            dimension_semantics=("parallel",),           # megacore / dual-TC split
            vmem_limit_bytes=32 * 1024 * 1024,           # safe on v5e/v6e/v7x
        ),
    )(x, kp["gvec"], kp["cb1"], kp["wmix"], kp["w1"], kp["b1"], kp["w2"])


# ----------------------------------------------------------------------------
# Pure-JAX f32 reference mirroring the PyTorch ResMLPLayer.forward
# ----------------------------------------------------------------------------
def reference_forward(x, p):
    # CommunicationLayer
    y = p["cl_a1"] * x + p["cl_b1"]
    res = y
    mixed = jnp.einsum("st,btf->bsf", p["cl_w"], y) + p["cl_bias"][None, :, None]
    h = p["cl_a2"] * mixed + p["cl_b2"] + res
    # FeedForward
    y = p["ff_a1"] * h + p["ff_b1"]
    res = y
    z = _gelu_exact(y @ p["ff_w1"] + p["ff_bias1"])
    z = z @ p["ff_w2"] + p["ff_bias2"]
    return p["ff_a2"] * z + p["ff_b2"] + res


def init_params(key, num_features, num_patches, expansion_factor):
    """Deterministic synthetic init (PyTorch-style Linear init; affines perturbed
    from alpha=1/beta=0 so the affine paths are exercised by the check)."""
    F, S = num_features, num_patches
    H = num_features * expansion_factor
    keys = iter(jax.random.split(key, 16))

    def linear(fan_in, shape_w, shape_b):
        bound = float(fan_in) ** -0.5
        w = jax.random.uniform(next(keys), shape_w, jnp.float32, -bound, bound)
        b = jax.random.uniform(next(keys), shape_b, jnp.float32, -bound, bound)
        return w, b

    def affine(n):
        a = 1.0 + 0.1 * jax.random.normal(next(keys), (1, n), jnp.float32)
        b = 0.1 * jax.random.normal(next(keys), (1, n), jnp.float32)
        return a, b

    cl_a1, cl_b1 = affine(F)
    cl_a2, cl_b2 = affine(F)
    ff_a1, ff_b1 = affine(F)
    ff_a2, ff_b2 = affine(F)
    cl_w, cl_bias = linear(S, (S, S), (S,))        # torch (out,in) orientation
    ff_w1, ff_bias1 = linear(F, (F, H), (H,))      # stored (in,out): x @ w1 + b1
    ff_w2, ff_bias2 = linear(H, (H, F), (F,))      # stored (in,out)

    return dict(cl_a1=cl_a1, cl_b1=cl_b1, cl_w=cl_w, cl_bias=cl_bias,
                cl_a2=cl_a2, cl_b2=cl_b2,
                ff_a1=ff_a1, ff_b1=ff_b1, ff_w1=ff_w1, ff_bias1=ff_bias1,
                ff_w2=ff_w2, ff_bias2=ff_bias2, ff_a2=ff_a2, ff_b2=ff_b2)


if __name__ == "__main__":
    # ResMLPLayer(num_features=128, num_patches=16, expansion_factor=4)
    # on a (batch=32, num_patches=16, num_features=128) activation.
    B, S, F, EF = 32, 16, 128, 4

    kx, kp = jax.random.split(jax.random.PRNGKey(0))
    x = jax.random.normal(kx, (B, S, F), jnp.float32)
    params = init_params(kp, F, S, EF)

    y = resmlp_layer_forward(x, params)
    jax.block_until_ready(y)

    y_ref = reference_forward(x, params)
    assert y.shape == y_ref.shape == (B, S, F), (y.shape, y_ref.shape)
    max_err = float(jnp.max(jnp.abs(y - y_ref)))
    # Tolerance relaxed vs. the all-f32 / exact-erf reference because MXU
    # operands are bf16 (f32 accumulation) and GELU uses the tanh approximation.
    assert jnp.allclose(y, y_ref, rtol=2e-2, atol=3e-2), max_err

    print("KERNEL_OK")
</pallas_src>

<mosaic_0001>
module attributes {stable_mosaic.version = 11 : i64} {
  func.func @resmlp_layer_kernel(%arg0: i32, %arg1: memref<16x16x128xf32, #tpu.memory_space<vmem>>, %arg2: memref<3x128xf32, #tpu.memory_space<vmem>>, %arg3: memref<256x128xf32, #tpu.memory_space<vmem>>, %arg4: memref<256x256xbf16, #tpu.memory_space<vmem>>, %arg5: memref<128x512xbf16, #tpu.memory_space<vmem>>, %arg6: memref<1x512xf32, #tpu.memory_space<vmem>>, %arg7: memref<512x128xbf16, #tpu.memory_space<vmem>>, %arg8: memref<16x16x128xf32, #tpu.memory_space<vmem>>) attributes {dimension_semantics = [#tpu.dimension_semantics<parallel>], iteration_bounds = array<i64: 2>, scalar_prefetch = 0 : i64, scratch_operands = 0 : i64, tpu.core_type = #tpu.core_type<tc>, window_params = [{transform_indices = @transform_0, window_bounds = array<i64: 16, 16, 128>}, {pipeline_mode = #tpu.pipeline_mode<synchronous>, transform_indices = @transform_1, window_bounds = array<i64: 3, 128>}, {pipeline_mode = #tpu.pipeline_mode<synchronous>, transform_indices = @transform_2, window_bounds = array<i64: 256, 128>}, {pipeline_mode = #tpu.pipeline_mode<synchronous>, transform_indices = @transform_3, window_bounds = array<i64: 256, 256>}, {pipeline_mode = #tpu.pipeline_mode<synchronous>, transform_indices = @transform_4, window_bounds = array<i64: 128, 512>}, {pipeline_mode = #tpu.pipeline_mode<synchronous>, transform_indices = @transform_5, window_bounds = array<i64: 1, 512>}, {pipeline_mode = #tpu.pipeline_mode<synchronous>, transform_indices = @transform_6, window_bounds = array<i64: 512, 128>}, {transform_indices = @transform_7, window_bounds = array<i64: 16, 16, 128>}]} {
    %c0 = arith.constant 0 : index
    %c0_0 = arith.constant 0 : index
    %c0_1 = arith.constant 0 : index
    %0 = vector.load %arg1[%c0, %c0_0, %c0_1] : memref<16x16x128xf32, #tpu.memory_space<vmem>>, vector<16x16x128xf32>
    %1 = vector.shape_cast %0 : vector<16x16x128xf32> to vector<256x128xf32>
    %c0_2 = arith.constant 0 : index
    %c0_3 = arith.constant 0 : index
    %2 = vector.load %arg2[%c0_2, %c0_3] : memref<3x128xf32, #tpu.memory_space<vmem>>, vector<1x128xf32>
    %c1 = arith.constant 1 : index
    %c0_4 = arith.constant 0 : index
    %3 = vector.load %arg2[%c1, %c0_4] : memref<3x128xf32, #tpu.memory_space<vmem>>, vector<1x128xf32>
    %c2 = arith.constant 2 : index
    %c0_5 = arith.constant 0 : index
    %4 = vector.load %arg2[%c2, %c0_5] : memref<3x128xf32, #tpu.memory_space<vmem>>, vector<1x128xf32>
    %c0_6 = arith.constant 0 : index
    %c0_7 = arith.constant 0 : index
    %5 = vector.load %arg4[%c0_6, %c0_7] : memref<256x256xbf16, #tpu.memory_space<vmem>>, vector<256x256xbf16>
    %6 = arith.truncf %1 : vector<256x128xf32> to vector<256x128xbf16>
    %cst = arith.constant dense<0.000000e+00> : vector<256x128xf32>
    %7 = tpu.matmul %5, %6, %cst {dimension_numbers = #tpu.dot_dimension_numbers<[1], [0], [0], [1], [0, 0, 1, 1], [], []>} : vector<256x256xbf16>, vector<256x128xbf16>, vector<256x128xf32> -> vector<256x128xf32>
    %8 = vector.broadcast %2 : vector<1x128xf32> to vector<256x128xf32>
    %9 = arith.mulf %8, %7 : vector<256x128xf32>
    %10 = vector.broadcast %3 : vector<1x128xf32> to vector<256x128xf32>
    %11 = arith.mulf %10, %1 : vector<256x128xf32>
    %12 = arith.addf %9, %11 : vector<256x128xf32>
    %c0_8 = arith.constant 0 : index
    %c0_9 = arith.constant 0 : index
    %13 = vector.load %arg3[%c0_8, %c0_9] : memref<256x128xf32, #tpu.memory_space<vmem>>, vector<256x128xf32>
    %14 = arith.addf %12, %13 : vector<256x128xf32>
    %15 = arith.truncf %14 : vector<256x128xf32> to vector<256x128xbf16>
    %c0_10 = arith.constant 0 : index
    %c0_11 = arith.constant 0 : index
    %16 = vector.load %arg5[%c0_10, %c0_11] : memref<128x512xbf16, #tpu.memory_space<vmem>>, vector<128x512xbf16>
    %cst_12 = arith.constant dense<0.000000e+00> : vector<256x512xf32>
    %17 = tpu.matmul %15, %16, %cst_12 {dimension_numbers = #tpu.dot_dimension_numbers<[1], [0], [0], [1], [0, 0, 1, 1], [], []>} : vector<256x128xbf16>, vector<128x512xbf16>, vector<256x512xf32> -> vector<256x512xf32>
    %c0_13 = arith.constant 0 : index
    %c0_14 = arith.constant 0 : index
    %18 = vector.load %arg6[%c0_13, %c0_14] : memref<1x512xf32, #tpu.memory_space<vmem>>, vector<1x512xf32>
    %19 = vector.broadcast %18 : vector<1x512xf32> to vector<256x512xf32>
    %20 = arith.addf %17, %19 : vector<256x512xf32>
    %21 = arith.mulf %20, %20 : vector<256x512xf32>
    %22 = arith.mulf %20, %21 : vector<256x512xf32>
    %cst_15 = arith.constant 4.471500e-02 : f32
    %23 = vector.broadcast %cst_15 : f32 to vector<256x512xf32>
    %24 = arith.mulf %23, %22 : vector<256x512xf32>
    %25 = arith.addf %20, %24 : vector<256x512xf32>
    %cst_16 = arith.constant 0.797884583 : f32
    %26 = vector.broadcast %cst_16 : f32 to vector<256x512xf32>
    %27 = arith.mulf %26, %25 : vector<256x512xf32>
    %28 = math.tanh %27 : vector<256x512xf32>
    %cst_17 = arith.constant 1.000000e+00 : f32
    %29 = vector.broadcast %cst_17 : f32 to vector<256x512xf32>
    %30 = arith.addf %29, %28 : vector<256x512xf32>
    %cst_18 = arith.constant 5.000000e-01 : f32
    %31 = vector.broadcast %cst_18 : f32 to vector<256x512xf32>
    %32 = arith.mulf %31, %30 : vector<256x512xf32>
    %33 = arith.mulf %20, %32 : vector<256x512xf32>
    %34 = arith.truncf %33 : vector<256x512xf32> to vector<256x512xbf16>
    %c0_19 = arith.constant 0 : index
    %c0_20 = arith.constant 0 : index
    %35 = vector.load %arg7[%c0_19, %c0_20] : memref<512x128xbf16, #tpu.memory_space<vmem>>, vector<512x128xbf16>
    %cst_21 = arith.constant dense<0.000000e+00> : vector<256x128xf32>
    %36 = tpu.matmul %34, %35, %cst_21 {dimension_numbers = #tpu.dot_dimension_numbers<[1], [0], [0], [1], [0, 0, 1, 1], [], []>} : vector<256x512xbf16>, vector<512x128xbf16>, vector<256x128xf32> -> vector<256x128xf32>
    %37 = vector.broadcast %4 : vector<1x128xf32> to vector<256x128xf32>
    %38 = arith.addf %36, %37 : vector<256x128xf32>
    %39 = arith.addf %38, %14 : vector<256x128xf32>
    %40 = vector.shape_cast %39 : vector<256x128xf32> to vector<16x16x128xf32>
    %c0_22 = arith.constant 0 : index
    %c0_23 = arith.constant 0 : index
    %c0_24 = arith.constant 0 : index
    %41 = vector.load %arg8[%c0_22, %c0_23, %c0_24] : memref<16x16x128xf32, #tpu.memory_space<vmem>>, vector<16x16x128xf32>
    tpu.vector_store %arg8[%c0_22, %c0_23, %c0_24], %40 {strides = array<i32>} : memref<16x16x128xf32, #tpu.memory_space<vmem>>, vector<16x16x128xf32>,
    return
  }
  func.func @transform_0(%arg0: i32) -> (i32, i32, i32) {
    %c0_i32 = arith.constant 0 : i32
    %c0_i32_0 = arith.constant 0 : i32
    %c0_i32_1 = arith.constant 0 : i32
    return %arg0, %c0_i32, %c0_i32_0 : i32, i32, i32
  }
  func.func @transform_1(%arg0: i32) -> (i32, i32) {
    %c0_i32 = arith.constant 0 : i32
    %c0_i32_0 = arith.constant 0 : i32
    %c0_i32_1 = arith.constant 0 : i32
    return %c0_i32, %c0_i32_0 : i32, i32
  }
  func.func @transform_2(%arg0: i32) -> (i32, i32) {
    %c0_i32 = arith.constant 0 : i32
    %c0_i32_0 = arith.constant 0 : i32
    %c0_i32_1 = arith.constant 0 : i32
    return %c0_i32, %c0_i32_0 : i32, i32
  }
  func.func @transform_3(%arg0: i32) -> (i32, i32) {
    %c0_i32 = arith.constant 0 : i32
    %c0_i32_0 = arith.constant 0 : i32
    %c0_i32_1 = arith.constant 0 : i32
    return %c0_i32, %c0_i32_0 : i32, i32
  }
  func.func @transform_4(%arg0: i32) -> (i32, i32) {
    %c0_i32 = arith.constant 0 : i32
    %c0_i32_0 = arith.constant 0 : i32
    %c0_i32_1 = arith.constant 0 : i32
    return %c0_i32, %c0_i32_0 : i32, i32
  }
  func.func @transform_5(%arg0: i32) -> (i32, i32) {
    %c0_i32 = arith.constant 0 : i32
    %c0_i32_0 = arith.constant 0 : i32
    %c0_i32_1 = arith.constant 0 : i32
    return %c0_i32, %c0_i32_0 : i32, i32
  }
  func.func @transform_6(%arg0: i32) -> (i32, i32) {
    %c0_i32 = arith.constant 0 : i32
    %c0_i32_0 = arith.constant 0 : i32
    %c0_i32_1 = arith.constant 0 : i32
    return %c0_i32, %c0_i32_0 : i32, i32
  }
  func.func @transform_7(%arg0: i32) -> (i32, i32, i32) {
    %c0_i32 = arith.constant 0 : i32
    %c0_i32_0 = arith.constant 0 : i32
    %c0_i32_1 = arith.constant 0 : i32
    return %arg0, %c0_i32, %c0_i32_0 : i32, i32, i32
  }
}

</mosaic_0001>

<bundles_post_ra>
// kernel: tpu_custom_call.1
= control target key start
LH: loop header
LB: loop body
LE: loop exit
PB: predicated region body
PF: predicated region fallthrough
CT: control target
= control target key end

     0   :  { %s7056_s0 = inlined_call_operand.hbm [shape: f32[32,16,128], index: 0, kind: input, shape index: {}]   ;;  %s7057_s1 = inlined_call_operand.hbm [shape: f32[3,128], index: 1, kind: input, shape index: {}]   ;;  %s7058_s2 = inlined_call_operand.hbm [shape: f32[256,128], index: 2, kind: input, shape index: {}]   ;;  %s7059_s3 = inlined_call_operand.hbm [shape: bf16[256,256], index: 3, kind: input, shape index: {}]   ;;  %s7060_s4 = inlined_call_operand.hbm [shape: bf16[128,512], index: 4, kind: input, shape index: {}]   ;;  %s7061_s5 = inlined_call_operand.vmem [shape: f32[1,512], index: 5, kind: input, shape index: {}]   ;;  %s7062_s6 = inlined_call_operand.hbm [shape: bf16[512,128], index: 6, kind: input, shape index: {}]   ;;  %s7063_s7 = inlined_call_operand.hbm [shape: f32[32,16,128], index: 7, kind: output, shape index: {}]  }
   0x1   :  { %7163 = sst [smem:[#allocation89_spill]] %s7057_s1 }
   0x2   :  { %12 = vsyncpa [#allocation3], 0 }
   0x3   :  { %14 = vsyncpa [#allocation3 + $0x1], 0 }
   0x4   :  { %15 = vsyncpa [#allocation6], 0 }
   0x5   :  { %16 = vsyncpa [#allocation9], 0 }
   0x6   :  { %17 = vsyncpa [#allocation12], 0 }
   0x7   :  { %18 = vsyncpa [#allocation4], 0 }
   0x8   :  { %20 = vsyncpa [#allocation4 + $0x1], 0  ;;  %s4828_s24 = smov 0   ;;  %s4830_s25 = smov 0  }
   0x9   :  { %s4832_s26 = smov 0   ;;  %s4834_s27 = smov 0  }
   0xa LB: > { %s4772_s28 = smov [#allocation5]   ;;  %s4849_s30 = sadd.s32 4294967295, %s4770_s27   ;;  %s4770_s27 = sphi %s4834_s27, %s7424_s27   ;;  %s4766_s26 = sphi %s4832_s26, %s7423_s26   ;;  %s4762_s25 = sphi %s4830_s25, %s7422_s25   ;;  %s4758_s24 = sphi %s4828_s24, %s7421_s24  }
   0xb   : > { %s222_s29 = sshll.u32 %s4772_s28, 4  ;;  %p3559_p0 = scmp.ge.s32.totalorder %s4770_s27, 1  ;;  %s223_s29 = int_to_ptr.vmem [resolvable:$true] %s222_s29 }
   0xc   : > { %p7065_p1 = scmp.eq.s32.totalorder %s4849_s30, 0  ;;  %p209_p2 = scmp.lt.s32.totalorder %s4770_s27, 3 }
   0xd   : > { %s4773_s9 = smov [#allocation8]   ;;  %s4774_s12 = smov [#allocation7]  }
   0xe   : > { %p4854_p3 = pnand %p3559_p0, %p209_p2  ;;  %s245_s10 = sshll.u32 %s4773_s9, 4  ;;  %s4867_s10 = int_to_ptr.vmem [resolvable:$true] %s245_s10 }
   0xf   : > { %s232_s13 = sshll.u32 %s4774_s12, 4  ;;  %s4547_s15 = scalar_lea.vmem %s223_s29, 64  ;;  %s4869_s13 = int_to_ptr.vmem [resolvable:$true] %s232_s13 }
  0x10   : > { %s7164_s8 = scalar_select %p4854_p3, 1, 0 }
  0x11   : > { %p4063_p5 = pneg %p4854_p3  ;;  %p4548_p8 = scmp.ne.s32.totalorder %s223_s29, %s4547_s15 }
  0x12   : > { %p4555_p11 = scmp.lt.s32.totalorder %s223_s29, %s223_s29  ;;  %p4556_p12 = scmp.lt.s32.totalorder %s4547_s15, %s4547_s15 }
  0x13   : > { %p4863_p6 = pnand %p4063_p5, %p7065_p1 }
  0x14   : > { %p4557_p13 = por %p4556_p12, %p4555_p11 }
  0x15   : > { %p4873_p7 = pneg %p4863_p6 }
  0x17   : > { %p4550_p9 = pnand %p4548_p8, %p4873_p7 }
  0x19   : > { %p4551_p10 = pneg %p4550_p9 }
  0x1b   : > { %p4558_p0 = pnand %p4557_p13, %p4551_p10 }
  0x1d   : > { %4561 = shalt.err (!%p4558_p0)
}
  0x1e   : > { %s7167_s1 = sld [smem:[#allocation89_spill]]  ;;  %s4573_s18 = scalar_lea.vmem %s4867_s10, 4096 }
  0x1f   : > { %p4574_p2 = scmp.ne.s32.totalorder %s4867_s10, %s4573_s18  ;;  %p4581_p9 = scmp.lt.s32.totalorder %s4867_s10, %s4867_s10 }
  0x20   : > { %p4582_p11 = scmp.lt.s32.totalorder %s4573_s18, %s4573_s18 }
  0x21   : > { %p4576_p5 = pnand %p4574_p2, %p4873_p7 }
  0x22   : > { %p4583_p10 = por %p4582_p11, %p4581_p9 }
  0x23   : > { %p4577_p8 = pneg %p4576_p5 }
  0x24   : > { %4066 = dma.hbm_to_vmem [thread:$0]  (!%p4863_p6), %s7167_s1, 64, %s223_s29, [#allocation6]  }
  0x25   : > { %p4584_p12 = pnand %p4583_p10, %p4577_p8 }
  0x27   : > { %4587 = shalt.err (!%p4584_p12)
}
  0x28   : > { %s7064_s19 = smov 128   ;;  %s7066_s20 = smov 8  }
  0x29   : > { %4072 = dma.hbm_to_vmem [thread:$0]  (!%p4863_p6), %s7059_s3, 4096, %s4867_s10, [#allocation9], %s7064_s19, %s7064_s19, %s7066_s20  }
  0x2a   : > { %s4599_s23 = scalar_lea.vmem %s4869_s13, 4096  ;;  %p4607_p5 = scmp.lt.s32.totalorder %s4869_s13, %s4869_s13 }
  0x2b   : > { %p4600_p13 = scmp.ne.s32.totalorder %s4869_s13, %s4599_s23  ;;  %p4608_p8 = scmp.lt.s32.totalorder %s4599_s23, %s4599_s23 }
  0x2d   : > { %p4602_p0 = pnand %p4600_p13, %p4873_p7  ;;  %p4609_p9 = por %p4608_p8, %p4607_p5 }
  0x2f   : > { %p4603_p2 = pneg %p4602_p0 }
  0x31   : > { %p4610_p11 = pnand %p4609_p9, %p4603_p2 }
  0x33   : > { %4613 = shalt.err (!%p4610_p11)
}
  0x34   : > { %4069 = dma.hbm_to_vmem [thread:$0]  (!%p4863_p6), %s7058_s2, 4096, %s4869_s13, [#allocation6], %s7064_s19, %s7064_s19, %s7066_s20  }
  0x35   : > { %s4777_s9 = smov [#allocation10]  }
  0x36   : > { %s258_s10 = sshll.u32 %s4777_s9, 4  ;;  %s259_s10 = int_to_ptr.vmem [resolvable:$true] %s258_s10 }
  0x37   : > { %s4625_s12 = scalar_lea.vmem %s259_s10, 4096  ;;  %p4633_p0 = scmp.lt.s32.totalorder %s259_s10, %s259_s10 }
  0x38   : > { %p4626_p10 = scmp.ne.s32.totalorder %s259_s10, %s4625_s12  ;;  %p4634_p2 = scmp.lt.s32.totalorder %s4625_s12, %s4625_s12 }
  0x3a   : > { %p4628_p12 = pnand %p4626_p10, %p4873_p7  ;;  %p4635_p5 = por %p4634_p2, %p4633_p0 }
  0x3c   : > { %p4629_p13 = pneg %p4628_p12 }
  0x3e   : > { %p4636_p8 = pnand %p4635_p5, %p4629_p13 }
  0x40   : > { %4639 = shalt.err (!%p4636_p8)
}
  0x41   : > { %s4778_s15 = smov 256   ;;  %s4779_s16 = smov 16  }
  0x42   : > { %4075 = dma.hbm_to_vmem [thread:$0]  (!%p4863_p6), %s7060_s4, 4096, %s259_s10, [#allocation9], %s4778_s15, %s4778_s15, %s4779_s16  }
  0x43   : > { %s4780_s18 = smov [#allocation11]  }
  0x44   : > { %s274_s21 = sshll.u32 %s4780_s18, 4  ;;  %s275_s21 = int_to_ptr.vmem [resolvable:$true] %s274_s21 }
  0x45   : > { %s4651_s22 = scalar_lea.vmem %s275_s21, 4096  ;;  %p4659_p12 = scmp.lt.s32.totalorder %s275_s21, %s275_s21 }
  0x46   : > { %p4652_p9 = scmp.ne.s32.totalorder %s275_s21, %s4651_s22  ;;  %p4660_p13 = scmp.lt.s32.totalorder %s4651_s22, %s4651_s22 }
  0x48   : > { %p4654_p11 = pnand %p4652_p9, %p4873_p7  ;;  %p4661_p0 = por %p4660_p13, %p4659_p12 }
  0x4a   : > { %p4655_p10 = pneg %p4654_p11 }
  0x4c   : > { %p4662_p2 = pnand %p4661_p0, %p4655_p10 }
  0x4e   : > { %4665 = shalt.err (!%p4662_p2)
}
  0x4f   : > { %s4781_s23 = smov 64   ;;  %s4782_s14 = smov 4  }
  0x50   : > { %4078 = dma.hbm_to_vmem [thread:$0]  (!%p4863_p6), %s7062_s6, 4096, %s275_s21, [#allocation12], %s4781_s23, %s4781_s23, %s4782_s14  }
  0x51   : > { %s3558_s9 = sadd.s32 4294967294, %s4770_s27   ;;  %s4930_s10 = sadd.s32 1, %s4770_s27  }
  0x52   : > { %s33_s12 = sadd.s32 1, %s4766_s26  ;;  %s30_s15 = ssub.s32 %s4770_s27, %s4930_s10 }
  0x53   : > { %p40_p7 = scmp.ne.s32.totalorder %s4766_s26, %s4762_s25  ;;  %p31_p5 = scmp.eq.s32.totalorder %s30_s15, 0 }
  0x54   : > { %p41_p8 = scmp.eq.s32.totalorder %s4770_s27, 0  ;;  %p46_p9 = scmp.ne.s32.totalorder %s4762_s25, %s4758_s24 }
  0x55   : > { %p196_p11 = scmp.eq.s32.totalorder %s4849_s30, 1  ;;  %p202_p13 = scmp.eq.s32.totalorder %s3558_s9, 1 }
  0x56   : > { %s4942_s16 = scalar_select %p31_p5, %s4766_s26, %s33_s12  }
  0x57   : > { %p42_p10 = por %p41_p8, %p40_p7  ;;  %p4946_p12 = por %p7065_p1, %p46_p9 }
  0x58   : > { %p4950_p6 = por %p196_p11, %p40_p7  ;;  %p4092_p0 = scmp.lt.s32.totalorder %s4770_s27, 2 }
  0x59   : > { %s7168_s11 = scalar_select %p4946_p12, 1, 0 }
  0x5a   : > { %s7169_s17 = scalar_select %p4950_p6, 1, 0 }
  0x5b   : > { %s288_s13 = sand.u32 1, %s4766_s26   ;;  %p4956_p2 = por %p202_p13, %p46_p9 }
  0x5c   : > { %s3566_s21 = sshll.u32 %s288_s13, 8  ;;  %s3684_s22 = sshll.u32 %s4770_s27, 12 }
  0x5d   : > { %s7170_s18 = scalar_select %p4956_p2, 1, 0 }
  0x5e   : > { %s4964_s28 = scalar_lea.hbm %s7056_s0, %s3684_s22  ;;  %s292_s29 = scalar_lea.vmem [#allocation2], %s3566_s21 }
  0x5f   : > { %s300_s12 = sshll.u32 %s292_s29, 4  ;;  %p4966_p7 = pnand %p4092_p0, %p42_p10  ;;  %s4970_s12 = int_to_ptr.vmem [resolvable:$true] %s300_s12 }
  0x60   : > { %s4972_s15 = scalar_lea.sflag [#allocation3], %s288_s13  ;;  %s4666_s19 = scalar_lea.hbm %s4964_s28, 4096 }
  0x61   : > { %p4667_p5 = scmp.ne.s32.totalorder %s4964_s28, %s4666_s19  ;;  %p4668_p8 = pneg %p4966_p7 }
  0x62   : > { %s4671_s21 = scalar_lea.hbm %s7056_s0, 8192  ;;  %p4672_p10 = scmp.lt.s32.totalorder %s4964_s28, %s7056_s0 }
  0x63   : > { %p4669_p9 = pnand %p4668_p8, %p4667_p5  ;;  %p4673_p13 = scmp.lt.s32.totalorder %s4671_s21, %s4666_s19 }
  0x65   : > { %p4670_p11 = pneg %p4669_p9  ;;  %p4674_p0 = por %p4673_p13, %p4672_p10 }
  0x67   : > { %p4675_p4 = pnand %p4674_p0, %p4670_p11 }
  0x69   : > { %4678 = shalt.err (!%p4675_p4)
}
  0x6a   : > { %s4679_s13 = scalar_lea.vmem %s4970_s12, 4096  ;;  %s4783_s20 = smov [#allocation2]  }
  0x6b   : > { %p4680_p1 = scmp.ne.s32.totalorder %s4970_s12, %s4679_s13  ;;  %s4684_s1 = sshll.u32 %s4783_s20, 4  ;;  %s4685_s1 = int_to_ptr.vmem [resolvable:$false] %s4684_s1 }
  0x6c   : > { %s4686_s22 = scalar_lea.vmem %s4685_s1, 8192  ;;  %p4687_p9 = scmp.lt.s32.totalorder %s4970_s12, %s4685_s1 }
  0x6d   : > { %p4682_p2 = pnand %p4680_p1, %p4668_p8  ;;  %p4688_p6 = scmp.lt.s32.totalorder %s4686_s22, %s4679_s13 }
  0x6f   : > { %p4683_p5 = pneg %p4682_p2  ;;  %p4689_p12 = por %p4688_p6, %p4687_p9 }
  0x71   : > { %p4690_p3 = pnand %p4689_p12, %p4683_p5 }
  0x73   : > { %4693 = shalt.err (!%p4690_p3)
}
  0x74   : > { %s7172_s19 = smov 8   ;;  %s7173_s23 = smov 128  }
  0x75   : > { %4082 = dma.hbm_to_vmem [thread:$0]  (!%p4966_p7), %s4964_s28, 4096, %s4970_s12, %s4972_s15, %s7173_s23, %s7173_s23, %s7172_s19  }
  0x76   : > { %p7174_p1 = scmp.ne.s32.totalorder %s7164_s8, 0 }
  0x78   : > { %312 = sbr.rel (%p7174_p1) target bundleno = 1149 (0x47d), region = 48 }
  0x7d   : > { %s4999_s20 = sand.u32 1, %s4762_s25   ;;  %p7175_p3 = scmp.ne.s32.totalorder %s7168_s11, 0 }
  0x7e   : > { %s3571_s1 = sshll.u32 %s4999_s20, 8  ;;  %s315_s21 = scalar_lea.sflag [#allocation3], %s4999_s20 }
  0x7f   : > { %s5005_s9 = scalar_lea.vmem [#allocation2], %s3571_s1 }
  0x80   : > { %4737 = dma.done.wait (%p7175_p3), %s315_s21, 4096  }
  0x81   : > { %4739 = vsyncadd (%p7175_p3), %s315_s21, 4294963200  ;;  %p7176_p4 = scmp.eq.s32.totalorder %s4849_s30, 0 }
  0x83   : > { %4741 = dma.done.wait (%p7176_p4), [#allocation6], 4160   ;;  %p7177_p12 = pmov %p7176_p4 }
  0x84   : > { %p7178_p6 = pmov %p7176_p4 }
  0x85   : > { %4743 = vsyncadd (%p7177_p12), [#allocation6], 4294963136 }
  0x86   : > { %4745 = dma.done.wait (%p7178_p6), [#allocation9], 8192   ;;  %p7179_p2 = pmov %p7176_p4 }
  0x88   : > { %4747 = vsyncadd (%p7179_p2), [#allocation9], 4294959104  ;;  %p7180_p7 = pmov %p7179_p2 }
  0x89   : > { %p7181_p8 = pmov %p7179_p2 }
  0x8a   : > { %4749 = dma.done.wait (%p7180_p7), [#allocation12], 4096  }
  0x8b   : > { %4751 = vsyncadd (%p7181_p8), [#allocation12], 4294963200  ;;  %v402_v0 = vld [vmem:[%s5005_s9 + $0xf0] sm:$0xff]  ;;  %v403_v1 = vld [vmem:[%s5005_s9 + $0xf8] sm:$0xff]  ;;  %s6904_s28 = scalar_lea.vmem [#allocation13], %s3571_s1  ;;  %s3686_s12 = sshll.u32 %s4849_s30, 12 }
  0x8c   : > { %v5025_v2 = vld [vmem:[#allocation5 + $0x1] ss:$0 sm:$0xff]  ;;  %v454_v3 = vpack.c.bf16 %v403_v1, %v402_v0  ;;  %v386_v6 = vld [vmem:[%s5005_s9 + $0x70] sm:$0xff]  ;;  %v387_v7 = vld [vmem:[%s5005_s9 + $0x78] sm:$0xff]  ;;  %s3437_s15 = sshll.u32 %s6904_s28, 4  ;;  %s7009_s13 = scalar_lea.hbm %s7063_s7, %s3686_s12  ;;  %s7011_s15 = int_to_ptr.vmem [resolvable:$true] %s3437_s15 }
  0x8d   : > { %v5028_v4 = vmul.f32 %v5025_v2, %v402_v0  ;;  %v5031_v5 = vmul.f32 %v5025_v2, %v403_v1  ;;  %v400_v8 = vld [vmem:[%s5005_s9 + $0xe0] sm:$0xff]  ;;  %v446_v9 = vpack.c.bf16 %v387_v7, %v386_v6  ;;  %v401_v10 = vld [vmem:[%s5005_s9 + $0xe8] sm:$0xff]  ;;  %v398_v16 = vld [vmem:[%s5005_s9 + $0xd0] sm:$0xff]  ;;  %s3423_s22 = scalar_lea.sflag [#allocation4], %s4999_s20  ;;  %s4694_s19 = scalar_lea.vmem %s7011_s15, 4096 }
  0x8e   : > { %v5038_v11 = vmul.f32 %v5025_v2, %v400_v8  ;;  %v384_v12 = vld [vmem:[%s5005_s9 + $0x60] sm:$0xff]  ;;  %v385_v13 = vld [vmem:[%s5005_s9 + $0x68] sm:$0xff]  ;;  %3687 = vmatprep.subr.bf16.mxu0 %v454_v3  ;;  %v453_v14 = vpack.c.bf16 %v401_v10, %v400_v8  ;;  %v5043_v15 = vmul.f32 %v5025_v2, %v401_v10  ;;  %v399_v17 = vld [vmem:[%s5005_s9 + $0xd8] sm:$0xff]  ;;  %v5048_v19 = vmul.f32 %v5025_v2, %v398_v16  ;;  %p4695_p11 = scmp.ne.s32.totalorder %s7011_s15, %s4694_s19  ;;  %p7418_p10 = scmp.ne.s32.totalorder %s7169_s17, 0 }
  0x8f   : > { %3688 = vmatpush3.bf16.msra.mxu0 %v446_v9  ;;  %v445_v18 = vpack.c.bf16 %v385_v13, %v384_v12  ;;  %v5051_v20 = vmul.f32 %v5025_v2, %v399_v17  ;;  %v382_v21 = vld [vmem:[%s5005_s9 + $0x50] sm:$0xff]  ;;  %v452_v22 = vpack.c.bf16 %v399_v17, %v398_v16  ;;  %v383_v23 = vld [vmem:[%s5005_s9 + $0x58] sm:$0xff]  ;;  %v396_v24 = vld [vmem:[%s5005_s9 + $0xc0] sm:$0xff]  ;;  %4023 = vmatprep.subr.bf16.mxu1 %v454_v3  ;;  %s4785_s30 = smov [#allocation13]  }
  0x90   : > { %3689 = vmatprep.subr.bf16.mxu0 %v453_v14  ;;  %v397_v25 = vld [vmem:[%s5005_s9 + $0xc8] sm:$0xff]  ;;  %v5058_v26 = vmul.f32 %v5025_v2, %v396_v24  ;;  %v394_v28 = vld [vmem:[%s5005_s9 + $0xb0] sm:$0xff]  ;;  %v395_v29 = vld [vmem:[%s5005_s9 + $0xb8] sm:$0xff]  ;;  %4031 = vmatpush3.bf16.msra.mxu1 %v446_v9  ;;  %v444_v32 = vpack.c.bf16 %v383_v23, %v382_v21  ;;  %p4696_p13 = pnand %p4695_p11, %p7418_p10  ;;  %s4698_s23 = sshll.u32 %s4785_s30, 4  ;;  %s4699_s23 = int_to_ptr.vmem [resolvable:$false] %s4698_s23 }
  0x91   : > { %v5061_v27 = vmul.f32 %v5025_v2, %v397_v25  ;;  %v5066_v30 = vmul.f32 %v5025_v2, %v394_v28  ;;  %v5069_v31 = vmul.f32 %v5025_v2, %v395_v29  ;;  %v5072_v33 = vld [vmem:[%s5005_s9 + $0x40] sm:$0xff]  ;;  %v393_v35 = vld [vmem:[%s5005_s9 + $0xa8] sm:$0xff]  ;;  %v451_v36 = vpack.c.bf16 %v397_v25, %v396_v24  ;;  %v390_v40 = vld [vmem:[%s5005_s9 + $0x90] sm:$0xff]  ;;  %4024 = vmatprep.subr.bf16.mxu1 %v453_v14  ;;  %s4700_s1 = scalar_lea.vmem %s4699_s23, 8192  ;;  %p4701_p5 = scmp.lt.s32.totalorder %s7011_s15, %s4699_s23 }
  0x92   : > { %v392_v34 = vld [vmem:[%s5005_s9 + $0xa0] sm:$0xff]  ;;  %v5077_v37 = vld [vmem:[%s5005_s9 + $0x48] sm:$0xff]  ;;  %v5083_v39 = vmul.f32 %v5025_v2, %v393_v35  ;;  %v391_v41 = vld [vmem:[%s5005_s9 + $0x98] sm:$0xff]  ;;  %v5088_v42 = vmul.f32 %v5025_v2, %v390_v40  ;;  %v450_v50 = vpack.c.bf16 %v395_v29, %v394_v28  ;;  %p4697_p0 = pneg %p4696_p13  ;;  %p4702_p9 = scmp.lt.s32.totalorder %s4700_s1, %s4694_s19 }
  0x93   : > { %3690 = vmatpush3.bf16.msra.mxu0 %v445_v18  ;;  %v5080_v38 = vmul.f32 %v5025_v2, %v392_v34  ;;  %v5091_v43 = vmul.f32 %v5025_v2, %v391_v41  ;;  %v388_v44 = vld [vmem:[%s5005_s9 + $0x80] sm:$0xff]  ;;  %v389_v45 = vld [vmem:[%s5005_s9 + $0x88] sm:$0xff]  ;;  %v443_v46 = vpack.c.bf16 %v5077_v37, %v5072_v33  ;;  %v5104_v51 = vld [vmem:[%s5005_s9 + $0x30] sm:$0xff]  ;;  %v449_v54 = vpack.c.bf16 %v393_v35, %v392_v34 }
  0x94   : > { %3691 = vmatprep.subr.bf16.mxu0 %v452_v22  ;;  %4032 = vmatpush3.bf16.msra.mxu1 %v445_v18  ;;  %v5098_v47 = vmul.f32 %v5025_v2, %v388_v44  ;;  %v5101_v48 = vmul.f32 %v5025_v2, %v389_v45  ;;  %v4147_v49 = vld [vmem:[#allocation8 + $0x4] ss:$8 sps:$4 sm:$0xff]   ;;  %v5107_v52 = vld [vmem:[%s5005_s9 + $0x38] sm:$0xff]  ;;  %v5112_v55 = vld [vmem:[%s5005_s9 + $0x20] sm:$0xff]  ;;  %v448_v58 = vpack.c.bf16 %v391_v41, %v390_v40  ;;  %p4703_p1 = por %p4702_p9, %p4701_p5 }
  0x95   : > { %4025 = vmatprep.subr.bf16.mxu1 %v452_v22  ;;  %647 = vmatprep.mubr.bf16.mxu0 %v4147_v49  ;;  %v442_v53 = vpack.c.bf16 %v5107_v52, %v5104_v51  ;;  %v5115_v56 = vld [vmem:[%s5005_s9 + $0x28] sm:$0xff]  ;;  %v5120_v59 = vld [vmem:[%s5005_s9 + $0x10] sm:$0xff]  ;;  %v5123_v60 = vld [vmem:[%s5005_s9 + $0x18] sm:$0xff]  ;;  %v447_v63 = vpack.c.bf16 %v389_v45, %v388_v44 }
  0x96   : > { %v441_v57 = vpack.c.bf16 %v5115_v56, %v5112_v55  ;;  %v4171_v61 = vld [vmem:[#allocation8 + $0x84] ss:$8 sps:$4 sm:$0xff]   ;;  %v440_v62 = vpack.c.bf16 %v5123_v60, %v5120_v59  ;;  %v5128_v0 = vld [vmem:[%s5005_s9] sm:$0xff]  ;;  %v4196_v12 = vld [vmem:[#allocation10 + $0xe8] ss:$16 sps:$4 sm:$0xff]   ;;  %p4704_p3 = pnand %p4703_p1, %p4697_p0 }
  0x97   : > { %3692 = vmatpush3.bf16.msra.mxu0 %v444_v32  ;;  %v5131_v1 = vld [vmem:[%s5005_s9 + $0x8] sm:$0xff]  ;;  %711 = vmatprep.mubr.bf16.mxu1 %v4171_v61  ;;  %v4148_v7 = vld [vmem:[#allocation8 + $0x14] ss:$8 sps:$4 sm:$0xff]   ;;  %v4193_v14 = vld [vmem:[#allocation10 + $0xe0] ss:$16 sps:$4 sm:$0xff]  }
  0x98   : > { %3693 = vmatprep.subr.bf16.mxu0 %v451_v36  ;;  %4033 = vmatpush3.bf16.msra.mxu1 %v444_v32  ;;  %v439_v3 = vpack.c.bf16 %v5131_v1, %v5128_v0  ;;  %v4145_v6 = vld [vmem:[#allocation8] ss:$8 sps:$4 sm:$0xff]   ;;  %v4172_v9 = vld [vmem:[#allocation8 + $0x94] ss:$8 sps:$4 sm:$0xff]   ;;  %v4150_v17 = vld [vmem:[#allocation8 + $0x10] ss:$8 sps:$4 sm:$0xff]  }
  0x99   : > { %4026 = vmatprep.subr.bf16.mxu1 %v451_v36  ;;  %v4169_v8 = vld [vmem:[#allocation8 + $0x80] ss:$8 sps:$4 sm:$0xff]   ;;  %v4195_v10 = vld [vmem:[#allocation10 + $0xe4] ss:$16 sps:$4 sm:$0xff]   ;;  %v4198_v13 = vld [vmem:[#allocation10 + $0xec] ss:$16 sps:$4 sm:$0xff]  }
  0x9a   : > { %v4201_v16 = vld [vmem:[#allocation10 + $0xc4] ss:$16 sps:$4 sm:$0xff]   ;;  %v4204_v18 = vld [vmem:[#allocation10 + $0xcc] ss:$16 sps:$4 sm:$0xff]   ;;  %v4202_v22 = vld [vmem:[#allocation10 + $0xc8] ss:$16 sps:$4 sm:$0xff]  }
  0x9b   : > { %3694 = vmatpush3.bf16.msra.mxu0 %v443_v46  ;;  %v4151_v21 = vld [vmem:[#allocation8 + $0x24] ss:$8 sps:$4 sm:$0xff]   ;;  %v4199_v23 = vld [vmem:[#allocation10 + $0xc0] ss:$16 sps:$4 sm:$0xff]   ;;  %v4208_v34 = vld [vmem:[#allocation10 + $0xa8] ss:$16 sps:$4 sm:$0xff]  }
  0x9c   : > { %3695 = vmatprep.subr.bf16.mxu0 %v450_v50  ;;  %4034 = vmatpush3.bf16.msra.mxu1 %v443_v46  ;;  %v4174_v24 = vld [vmem:[#allocation8 + $0x90] ss:$8 sps:$4 sm:$0xff]   ;;  %v4207_v25 = vld [vmem:[#allocation10 + $0xa4] ss:$16 sps:$4 sm:$0xff]   ;;  %v4210_v29 = vld [vmem:[#allocation10 + $0xac] ss:$16 sps:$4 sm:$0xff]  }
  0x9d   : > { %4027 = vmatprep.subr.bf16.mxu1 %v450_v50  ;;  %v4175_v28 = vld [vmem:[#allocation8 + $0xa4] ss:$8 sps:$4 sm:$0xff]   ;;  %v4205_v32 = vld [vmem:[#allocation10 + $0xa0] ss:$16 sps:$4 sm:$0xff]   ;;  %v4154_v41 = vld [vmem:[#allocation8 + $0x34] ss:$8 sps:$4 sm:$0xff]  }
  0x9e   : > { %v4213_v35 = vld [vmem:[#allocation10 + $0x84] ss:$16 sps:$4 sm:$0xff]   ;;  %v4216_v36 = vld [vmem:[#allocation10 + $0x8c] ss:$16 sps:$4 sm:$0xff]   ;;  %v4153_v40 = vld [vmem:[#allocation8 + $0x20] ss:$8 sps:$4 sm:$0xff]  }
  0x9f   : > { %3696 = vmatpush3.bf16.msra.mxu0 %v442_v53  ;;  %v4211_v44 = vld [vmem:[#allocation10 + $0x80] ss:$16 sps:$4 sm:$0xff]   ;;  %v4214_v45 = vld [vmem:[#allocation10 + $0x88] ss:$16 sps:$4 sm:$0xff]   ;;  %v4219_v46 = vld [vmem:[#allocation10 + $0x64] ss:$16 sps:$4 sm:$0xff]  }
  0xa0   : > { %3697 = vmatprep.subr.bf16.mxu0 %v449_v54  ;;  %4035 = vmatpush3.bf16.msra.mxu1 %v442_v53  ;;  %v4177_v49 = vld [vmem:[#allocation8 + $0xa0] ss:$8 sps:$4 sm:$0xff]   ;;  %v4222_v53 = vld [vmem:[#allocation10 + $0x6c] ss:$16 sps:$4 sm:$0xff]  }
  0xa1   : > { %4028 = vmatprep.subr.bf16.mxu1 %v449_v54  ;;  %v4220_v50 = vld [vmem:[#allocation10 + $0x68] ss:$16 sps:$4 sm:$0xff]   ;;  %v4178_v54 = vld [vmem:[#allocation8 + $0xb4] ss:$8 sps:$4 sm:$0xff]  }
  0xa2   : > { %v4228_v61 = vld [vmem:[#allocation10 + $0x4c] ss:$16 sps:$4 sm:$0xff]  }
  0xa3   : > { %3698 = vmatpush3.bf16.msra.mxu0 %v441_v57 }
  0xa4   : > { %3699 = vmatprep.subr.bf16.mxu0 %v448_v58  ;;  %4036 = vmatpush3.bf16.msra.mxu1 %v441_v57  ;;  %v4217_v57 = vld [vmem:[#allocation10 + $0x60] ss:$16 sps:$4 sm:$0xff]  }
  0xa5   : > { %4029 = vmatprep.subr.bf16.mxu1 %v448_v58  ;;  %v4225_v58 = vld [vmem:[#allocation10 + $0x44] ss:$16 sps:$4 sm:$0xff]  }
  0xa7   : > { %3700 = vmatpush3.bf16.msra.mxu0 %v440_v62 }
  0xa8   : > { %3701 = vmatprep.subr.bf16.mxu0 %v447_v63  ;;  %4037 = vmatpush3.bf16.msra.mxu1 %v440_v62  ;;  %v4226_v62 = vld [vmem:[#allocation10 + $0x48] ss:$16 sps:$4 sm:$0xff]  }
  0xa9   : > { %4030 = vmatprep.subr.bf16.mxu1 %v447_v63  ;;  %v4156_v63 = vld [vmem:[#allocation8 + $0x30] ss:$8 sps:$4 sm:$0xff]  }
  0xab   : > { %3702 = vmatpush3.bf16.msra.mxu0 %v439_v3 }
  0xac   : > { %4038 = vmatpush3.bf16.msra.mxu1 %v439_v3  ;;  %1367 = vmatprep.subr.bf16.mxu0 %v4198_v13  ;;  %v4223_v3 = vld [vmem:[#allocation10 + $0x40] ss:$16 sps:$4 sm:$0xff]   ;;  %v4184_v13 = vld [vmem:[#allocation8 + $0xd4] ss:$8 sps:$4 sm:$0xff]  }
  0xad   : > { %1174 = vmatprep.subr.bf16.mxu1 %v4195_v10  ;;  %v4160_v10 = vld [vmem:[#allocation8 + $0x54] ss:$8 sps:$4 sm:$0xff]  }
  0xae   : > { %648 = vmatmul.mubr.bf16.vlgmr.msra.gmra.mxu0 %v4145_v6  ;;  %v4157_v6 = vld [vmem:[#allocation8 + $0x44] ss:$8 sps:$4 sm:$0xff]  }
  0xaf   : > { %655 = vmatprep.mubr.bf16.mxu0 %v4148_v7  ;;  %712 = vmatmul.mubr.bf16.vlgmr.msra.gmra.mxu1 %v4169_v8  ;;  %v4180_v7 = vld [vmem:[#allocation8 + $0xb0] ss:$8 sps:$4 sm:$0xff]   ;;  %v4181_v8 = vld [vmem:[#allocation8 + $0xc4] ss:$8 sps:$4 sm:$0xff]  }
  0xb0   : > { %1368 = vmatpush1.bf16.msra.mxu0 %v4196_v12  ;;  %719 = vmatprep.mubr.bf16.mxu1 %v4172_v9  ;;  %v4159_v9 = vld [vmem:[#allocation8 + $0x40] ss:$8 sps:$4 sm:$0xff]  }
  0xb1   : > { %1175 = vmatpush1.bf16.msra.mxu1 %v4193_v14  ;;  %1369 = vmatprep.subr.bf16.mxu0 %v4204_v18  ;;  %v4183_v12 = vld [vmem:[#allocation8 + $0xc0] ss:$8 sps:$4 sm:$0xff]   ;;  %v4162_v14 = vld [vmem:[#allocation8 + $0x50] ss:$8 sps:$4 sm:$0xff]   ;;  %v4187_v18 = vld [vmem:[#allocation8 + $0xe4] ss:$8 sps:$4 sm:$0xff]  }
  0xb2   : > { %1176 = vmatprep.subr.bf16.mxu1 %v4201_v16  ;;  %v4163_v16 = vld [vmem:[#allocation8 + $0x64] ss:$8 sps:$4 sm:$0xff]  }
  0xb4   : > { %1370 = vmatpush1.bf16.msra.mxu0 %v4202_v22  ;;  %v4166_v22 = vld [vmem:[#allocation8 + $0x74] ss:$8 sps:$4 sm:$0xff]  }
  0xb5   : > { %1177 = vmatpush1.bf16.msra.mxu1 %v4199_v23  ;;  %1371 = vmatprep.subr.bf16.mxu0 %v4210_v29  ;;  %v4189_v23 = vld [vmem:[#allocation8 + $0xe0] ss:$8 sps:$4 sm:$0xff]  }
  0xb6   : > { %656 = vmatmul.mubr.bf16.gmra.mxu0 %v4150_v17  ;;  %1178 = vmatprep.subr.bf16.mxu1 %v4207_v25  ;;  %v4186_v17 = vld [vmem:[#allocation8 + $0xd0] ss:$8 sps:$4 sm:$0xff]  }
  0xb7   : > { %663 = vmatprep.mubr.bf16.mxu0 %v4151_v21  ;;  %720 = vmatmul.mubr.bf16.gmra.mxu1 %v4174_v24  ;;  %v4165_v21 = vld [vmem:[#allocation8 + $0x60] ss:$8 sps:$4 sm:$0xff]   ;;  %v4190_v24 = vld [vmem:[#allocation8 + $0xf4] ss:$8 sps:$4 sm:$0xff]   ;;  %v4168_v25 = vld [vmem:[#allocation8 + $0x70] ss:$8 sps:$4 sm:$0xff]  }
  0xb8   : > { %1372 = vmatpush1.bf16.msra.mxu0 %v4208_v34  ;;  %727 = vmatprep.mubr.bf16.mxu1 %v4175_v28  ;;  %v4192_v28 = vld [vmem:[#allocation8 + $0xf0] ss:$8 sps:$4 sm:$0xff]   ;;  %v4234_v34 = vld [vmem:[#allocation10 + $0x2c] ss:$16 sps:$4 sm:$0xff]  }
  0xb9   : > { %1179 = vmatpush1.bf16.msra.mxu1 %v4205_v32  ;;  %1373 = vmatprep.subr.bf16.mxu0 %v4216_v36  ;;  %v4229_v29 = vld [vmem:[#allocation10 + $0x20] ss:$16 sps:$4 sm:$0xff]   ;;  %v4231_v32 = vld [vmem:[#allocation10 + $0x24] ss:$16 sps:$4 sm:$0xff]  }
  0xba   : > { %1180 = vmatprep.subr.bf16.mxu1 %v4213_v35  ;;  %v4232_v35 = vld [vmem:[#allocation10 + $0x28] ss:$16 sps:$4 sm:$0xff]   ;;  %v4237_v36 = vld [vmem:[#allocation10 + $0x4] ss:$16 sps:$4 sm:$0xff]  }
  0xbc   : > { %1374 = vmatpush1.bf16.msra.mxu0 %v4214_v45  ;;  %v4784_v45 = vmov 0  }
  0xbd   : > { %1181 = vmatpush1.bf16.msra.mxu1 %v4211_v44  ;;  %1375 = vmatprep.subr.bf16.mxu0 %v4222_v53  ;;  %v4238_v44 = vld [vmem:[#allocation10 + $0x8] ss:$16 sps:$4 sm:$0xff]   ;;  %v5137_v53 = vld [vmem:[#allocation5] ss:$0 sm:$0xff] }
  0xbe   : > { %664 = vmatmul.mubr.bf16.gmra.mxu0 %v4153_v40  ;;  %1182 = vmatprep.subr.bf16.mxu1 %v4219_v46  ;;  %v4240_v40 = vld [vmem:[#allocation10 + $0xc] ss:$16 sps:$4 sm:$0xff]  }
  0xbf   : > { %671 = vmatprep.mubr.bf16.mxu0 %v4154_v41  ;;  %728 = vmatmul.mubr.bf16.gmra.mxu1 %v4177_v49  ;;  %v4235_v41 = vld [vmem:[#allocation10] ss:$16 sps:$4 sm:$0xff]   ;;  %v4241_v46 = vld [vmem:[#allocation11 + $0x78] sm:$0xff]  }
  0xc0   : > { %1376 = vmatpush1.bf16.msra.mxu0 %v4220_v50  ;;  %735 = vmatprep.mubr.bf16.mxu1 %v4178_v54  ;;  %v4243_v49 = vld [vmem:[#allocation11 + $0xf8] sm:$0xff]  }
  0xc1   : > { %1183 = vmatpush1.bf16.msra.mxu1 %v4217_v57  ;;  %1377 = vmatprep.subr.bf16.mxu0 %v4228_v61 }
  0xc2   : > { %1184 = vmatprep.subr.bf16.mxu1 %v4225_v58 }
  0xc4   : > { %1378 = vmatpush1.bf16.msra.mxu0 %v4226_v62  ;;  %v816_v62 = vmul.f32 %v5025_v2, %v5128_v0 }
  0xc5   : > { %1185 = vmatpush1.bf16.msra.mxu1 %v4223_v3  ;;  %1379 = vmatprep.subr.bf16.mxu0 %v4234_v34 }
  0xc6   : > { %672 = vmatmul.mubr.bf16.gmra.mxu0 %v4156_v63  ;;  %1186 = vmatprep.subr.bf16.mxu1 %v4231_v32  ;;  %v818_v32 = vmul.f32 %v5025_v2, %v5120_v59 }
  0xc7   : > { %679 = vmatprep.mubr.bf16.mxu0 %v4157_v6  ;;  %736 = vmatmul.mubr.bf16.gmra.mxu1 %v4180_v7 }
  0xc8   : > { %743 = vmatprep.mubr.bf16.mxu1 %v4181_v8  ;;  %1380 = vmatpush1.bf16.msra.mxu0 %v4232_v35  ;;  %v817_v8 = vmul.f32 %v5025_v2, %v5131_v1 }
  0xc9   : > { %1187 = vmatpush1.bf16.msra.mxu1 %v4229_v29  ;;  %1381 = vmatprep.subr.bf16.mxu0 %v4240_v40 }
  0xca   : > { %1188 = vmatprep.subr.bf16.mxu1 %v4237_v36 }
  0xcc   : > { %1382 = vmatpush1.bf16.msra.mxu0 %v4238_v44 }
  0xcd   : > { %1189 = vmatpush1.bf16.msra.mxu1 %v4235_v41  ;;  %3911 = vmatprep.subr.bf16.mxu0 %v4243_v49 }
  0xce   : > { %680 = vmatmul.mubr.bf16.gmra.mxu0 %v4159_v9  ;;  %3799 = vmatprep.subr.bf16.mxu1 %v4241_v46  ;;  %v819_v46 = vmul.f32 %v5025_v2, %v5123_v60  ;;  %v882_v60 = vld [vmem:[#allocation7 + $0x10] sm:$0xff] }
  0xcf   : > { %687 = vmatprep.mubr.bf16.mxu0 %v4160_v10  ;;  %744 = vmatmul.mubr.bf16.gmra.mxu1 %v4183_v12 }
  0xd0   : > { %751 = vmatprep.mubr.bf16.mxu1 %v4184_v13 }
  0xd6   : > { %688 = vmatmul.mubr.bf16.gmra.mxu0 %v4162_v14 }
  0xd7   : > { %695 = vmatprep.mubr.bf16.mxu0 %v4163_v16  ;;  %752 = vmatmul.mubr.bf16.gmra.mxu1 %v4186_v17 }
  0xd8   : > { %759 = vmatprep.mubr.bf16.mxu1 %v4187_v18  ;;  %v880_v18 = vld [vmem:[#allocation7] sm:$0xff] }
  0xde   : > { %696 = vmatmul.mubr.bf16.gmra.mxu0 %v4165_v21  ;;  %v881_v21 = vld [vmem:[#allocation7 + $0x8] sm:$0xff] }
  0xdf   : > { %703 = vmatprep.mubr.bf16.mxu0 %v4166_v22  ;;  %760 = vmatmul.mubr.bf16.gmra.mxu1 %v4189_v23 }
  0xe0   : > { %767 = vmatprep.mubr.bf16.mxu1 %v4190_v24 }
  0xe6   : > { %704 = vmatmul.mubr.bf16.gmra.mxu0 %v4168_v25 }
  0xe7   : > { %768 = vmatmul.mubr.bf16.gmra.mxu1 %v4192_v28  ;;  %1399 = vmatprep.mubr.bf16.mxu0 %v4784_v45 }
  0xe8   : > { %1206 = vmatprep.mubr.bf16.mxu1 %v4784_v45 }
 0x16e   : > { %v3703_v50 = vpop.f32.mrf.mxu0 }
 0x16f   : > { %v3751_v58 = vpop.f32.mrf.mxu1 }
 0x170   : > { %v3704_v54 = vpop.f32.mrf.mxu0 }
 0x171   : > { %v3705_v57 = vadd.f32 %v3704_v54, %v3703_v50  ;;  %v3752_v3 = vpop.f32.mrf.mxu1  ;;  %v4242_v54 = vld [vmem:[#allocation11 + $0x38] sm:$0xff]  }
 0x172   : > { %v3706_v61 = vpop.f32.mrf.mxu0  ;;  %v3753_v7 = vadd.f32 %v3752_v3, %v3751_v58 }
 0x173   : > { %v780_v63 = vmul.f32 %v3705_v57, %v5137_v53  ;;  %v3754_v10 = vpop.f32.mrf.mxu1  ;;  %v4244_v57 = vld [vmem:[#allocation11 + $0xb8] sm:$0xff]  }
 0x174   : > { %v3707_v6 = vpop.f32.mrf.mxu0  ;;  %v796_v13 = vmul.f32 %v3753_v7, %v5137_v53 }
 0x175   : > { %v3708_v9 = vadd.f32 %v3707_v6, %v3706_v61  ;;  %v848_v14 = vadd.f32 %v816_v62, %v780_v63  ;;  %v3755_v17 = vpop.f32.mrf.mxu1  ;;  %v4245_v62 = vld [vmem:[#allocation11 + $0x70] sm:$0xff]  }
 0x176   : > { %v3709_v12 = vpop.f32.mrf.mxu0  ;;  %v5147_v22 = vadd.f32 %v5098_v47, %v796_v13  ;;  %v3756_v23 = vadd.f32 %v3755_v17, %v3754_v10  ;;  %v4247_v63 = vld [vmem:[#allocation11 + $0xf0] sm:$0xff]  }
 0x177   : > { %v781_v16 = vmul.f32 %v3708_v9, %v5137_v53  ;;  %v3757_v28 = vpop.f32.mrf.mxu1  ;;  %v5152_v34 = vadd.f32 %v880_v18, %v848_v14  ;;  %v4248_v17 = vld [vmem:[#allocation11 + $0xb0] sm:$0xff]  }
 0x178   : > { %v3710_v0 = vpop.f32.mrf.mxu0  ;;  %v797_v29 = vmul.f32 %v3756_v23, %v5137_v53  ;;  %v4251_v23 = vld [vmem:[#allocation11 + $0xe8] sm:$0xff]  }
 0x179   : > { %v849_v24 = vadd.f32 %v817_v8, %v781_v16  ;;  %v3711_v25 = vadd.f32 %v3710_v0, %v3709_v12  ;;  %7182 = vst [vmem:[#allocation19_spill] sm:$0xff] %v5152_v34  ;;  %v3758_v40 = vpop.f32.mrf.mxu1  ;;  %v883_v8 = vld [vmem:[#allocation7 + $0x18] sm:$0xff]  ;;  %v4246_v16 = vld [vmem:[#allocation11 + $0x30] sm:$0xff]   ;;  %v4249_v0 = vld [vmem:[#allocation11 + $0x68] sm:$0xff]  }
 0x17a   : > { %v3712_v1 = vpop.f32.mrf.mxu0  ;;  %v5158_v47 = vadd.f32 %v5101_v48, %v797_v29  ;;  %v3759_v44 = vadd.f32 %v3758_v40, %v3757_v28  ;;  %v821_v40 = vmul.f32 %v5025_v2, %v5115_v56 }
 0x17b   : > { %v5154_v35 = vadd.f32 %v881_v21, %v849_v24  ;;  %v782_v36 = vmul.f32 %v3711_v25, %v5137_v53  ;;  %v3760_v59 = vpop.f32.mrf.mxu1  ;;  %v820_v24 = vmul.f32 %v5025_v2, %v5112_v55 }
 0x17c   : > { %v3713_v41 = vpop.f32.mrf.mxu0  ;;  %v798_v61 = vmul.f32 %v3759_v44, %v5137_v53 }
 0x17d   : > { %7183 = vst [vmem:[#allocation20_spill] sm:$0xff] %v5154_v35  ;;  %v944_v49 = vpack.c.bf16 %v5154_v35, %v5152_v34  ;;  %v3714_v50 = vadd.f32 %v3713_v41, %v3712_v1  ;;  %v850_v3 = vadd.f32 %v818_v32, %v782_v36  ;;  %v3761_v6 = vpop.f32.mrf.mxu1 }
 0x17e   : > { %v3715_v58 = vpop.f32.mrf.mxu0  ;;  %v5169_v9 = vadd.f32 %v5088_v42, %v798_v61  ;;  %v3762_v10 = vadd.f32 %v3761_v6, %v3760_v59 }
 0x17f   : > { %v783_v48 = vmul.f32 %v3714_v50, %v5137_v53  ;;  %1207 = vmatmul.mubr.bf16.vlgmr.msra.gmra.mxu1 %v944_v49  ;;  %1400 = vmatmul.mubr.bf16.vlgmr.msra.gmra.mxu0 %v944_v49  ;;  %v3763_v14 = vpop.f32.mrf.mxu1  ;;  %v5175_v25 = vadd.f32 %v882_v60, %v850_v3  ;;  %v4252_v49 = vld [vmem:[#allocation11 + $0xa8] sm:$0xff]  }
 0x180   : > { %v3716_v7 = vpop.f32.mrf.mxu0  ;;  %1216 = vmatprep.mubr.bf16.mxu1 %v4784_v45  ;;  %1409 = vmatprep.mubr.bf16.mxu0 %v4784_v45  ;;  %v799_v21 = vmul.f32 %v3762_v10, %v5137_v53  ;;  %v4256_v10 = vld [vmem:[#allocation11 + $0xa0] sm:$0xff]  }
 0x181   : > { %v851_v12 = vadd.f32 %v819_v46, %v783_v48  ;;  %v3717_v13 = vadd.f32 %v3716_v7, %v3715_v58  ;;  %3800 = vmatpush3.bf16.msra.mxu1 %v4242_v54  ;;  %3912 = vmatpush3.bf16.msra.mxu0 %v4244_v57  ;;  %7184 = vst [vmem:[#allocation21_spill] sm:$0xff] %v5175_v25  ;;  %v3764_v1 = vpop.f32.mrf.mxu1  ;;  %v4250_v46 = vld [vmem:[#allocation11 + $0x28] sm:$0xff]   ;;  %v4255_v54 = vld [vmem:[#allocation11 + $0xe0] sm:$0xff]  }
 0x182   : > { %v3718_v18 = vpop.f32.mrf.mxu0  ;;  %3801 = vmatprep.subr.bf16.mxu1 %v4245_v62  ;;  %3913 = vmatprep.subr.bf16.mxu0 %v4247_v63  ;;  %v5180_v32 = vadd.f32 %v5091_v43, %v799_v21  ;;  %v3765_v36 = vadd.f32 %v3764_v1, %v3763_v14  ;;  %v4253_v43 = vld [vmem:[#allocation11 + $0x60] sm:$0xff]   ;;  %v885_v63 = vld [vmem:[#allocation7 + $0x28] sm:$0xff]  ;;  %v4257_v14 = vld [vmem:[#allocation11 + $0x58] sm:$0xff]   ;;  %v823_v1 = vmul.f32 %v5025_v2, %v5107_v52 }
 0x183   : > { %v784_v42 = vmul.f32 %v3717_v13, %v5137_v53  ;;  %v5177_v28 = vadd.f32 %v883_v8, %v851_v12  ;;  %v3766_v55 = vpop.f32.mrf.mxu1  ;;  %v884_v62 = vld [vmem:[#allocation7 + $0x20] sm:$0xff] }
 0x184   : > { %v3719_v29 = vpop.f32.mrf.mxu0  ;;  %v800_v59 = vmul.f32 %v3765_v36, %v5137_v53  ;;  %v4254_v8 = vld [vmem:[#allocation11 + $0x20] sm:$0xff]  }
 0x185   : > { %7185 = vst [vmem:[#allocation22_spill] sm:$0xff] %v5177_v28  ;;  %v3720_v41 = vadd.f32 %v3719_v29, %v3718_v18  ;;  %v945_v44 = vpack.c.bf16 %v5177_v28, %v5175_v25  ;;  %3802 = vmatpush3.bf16.msra.mxu1 %v4246_v16  ;;  %3914 = vmatpush3.bf16.msra.mxu0 %v4248_v17  ;;  %v3767_v56 = vpop.f32.mrf.mxu1  ;;  %v4259_v16 = vld [vmem:[#allocation11 + $0xd8] sm:$0xff]  }
 0x186   : > { %v3721_v50 = vpop.f32.mrf.mxu0  ;;  %3803 = vmatprep.subr.bf16.mxu1 %v4249_v0  ;;  %3915 = vmatprep.subr.bf16.mxu0 %v4251_v23  ;;  %v852_v57 = vadd.f32 %v820_v24, %v784_v42  ;;  %v5191_v3 = vadd.f32 %v5080_v38, %v800_v59  ;;  %v3768_v48 = vadd.f32 %v3767_v56, %v3766_v55  ;;  %v886_v59 = vld [vmem:[#allocation7 + $0x30] sm:$0xff] }
 0x187   : > { %v785_v58 = vmul.f32 %v3720_v41, %v5137_v53  ;;  %1217 = vmatmul.mubr.bf16.gmra.mxu1 %v945_v44  ;;  %1410 = vmatmul.mubr.bf16.gmra.mxu0 %v945_v44  ;;  %v3769_v60 = vpop.f32.mrf.mxu1  ;;  %v822_v17 = vmul.f32 %v5025_v2, %v5104_v51  ;;  %v4260_v41 = vld [vmem:[#allocation11 + $0x98] sm:$0xff]  }
 0x188   : > { %v3722_v61 = vpop.f32.mrf.mxu0  ;;  %1226 = vmatprep.mubr.bf16.mxu1 %v4784_v45  ;;  %1419 = vmatprep.mubr.bf16.mxu0 %v4784_v45  ;;  %v801_v13 = vmul.f32 %v3768_v48, %v5137_v53  ;;  %v5197_v18 = vadd.f32 %v884_v62, %v852_v57  ;;  %v4262_v62 = vld [vmem:[#allocation11 + $0x10] sm:$0xff]  }
 0x189   : > { %v853_v6 = vadd.f32 %v821_v40, %v785_v58  ;;  %v3723_v7 = vadd.f32 %v3722_v61, %v3721_v50  ;;  %3804 = vmatpush3.bf16.msra.mxu1 %v4250_v46  ;;  %3916 = vmatpush3.bf16.msra.mxu0 %v4252_v49  ;;  %v3770_v0 = vpop.f32.mrf.mxu1  ;;  %v4258_v40 = vld [vmem:[#allocation11 + $0x18] sm:$0xff]   ;;  %v4263_v46 = vld [vmem:[#allocation11 + $0xd0] sm:$0xff]  }
 0x18a   : > { %v3724_v12 = vpop.f32.mrf.mxu0  ;;  %3805 = vmatprep.subr.bf16.mxu1 %v4253_v43  ;;  %3917 = vmatprep.subr.bf16.mxu0 %v4255_v54  ;;  %7186 = vst [vmem:[#allocation23_spill] sm:$0xff] %v5197_v18  ;;  %v5202_v24 = vadd.f32 %v5083_v39, %v801_v13  ;;  %v3771_v42 = vadd.f32 %v3770_v0, %v3769_v60  ;;  %v4261_v39 = vld [vmem:[#allocation11 + $0x50] sm:$0xff]   ;;  %v887_v43 = vld [vmem:[#allocation7 + $0x38] sm:$0xff] }
 0x18b   : > { %v786_v38 = vmul.f32 %v3723_v7, %v5137_v53  ;;  %v5199_v21 = vadd.f32 %v885_v63, %v853_v6  ;;  %v3772_v51 = vpop.f32.mrf.mxu1  ;;  %v4264_v63 = vld [vmem:[#allocation11 + $0x90] sm:$0xff]   ;;  %v5216_v7 = vld [vmem:[#allocation5 + $0x1] ss:$0 sm:$0xff] }
 0x18c   : > { %v3725_v23 = vpop.f32.mrf.mxu0  ;;  %v802_v55 = vmul.f32 %v3771_v42, %v5137_v53  ;;  %v824_v60 = vmul.f32 %v5216_v7, %v5072_v33 }
 0x18d   : > { %7187 = vst [vmem:[#allocation24_spill] sm:$0xff] %v5199_v21  ;;  %v3726_v29 = vadd.f32 %v3725_v23, %v3724_v12  ;;  %v946_v36 = vpack.c.bf16 %v5199_v21, %v5197_v18  ;;  %3806 = vmatpush3.bf16.msra.mxu1 %v4254_v8  ;;  %3918 = vmatpush3.bf16.msra.mxu0 %v4256_v10  ;;  %v3773_v2 = vpop.f32.mrf.mxu1 }
 0x18e   : > { %v3727_v44 = vpop.f32.mrf.mxu0  ;;  %3807 = vmatprep.subr.bf16.mxu1 %v4257_v14  ;;  %3919 = vmatprep.subr.bf16.mxu0 %v4259_v16  ;;  %v854_v49 = vadd.f32 %v822_v17, %v786_v38  ;;  %v5213_v54 = vadd.f32 %v5066_v30, %v802_v55  ;;  %v3774_v57 = vadd.f32 %v3773_v2, %v3772_v51  ;;  %v889_v51 = vld [vmem:[#allocation7 + $0x48] sm:$0xff] }
 0x18f   : > { %v787_v50 = vmul.f32 %v3726_v29, %v5137_v53  ;;  %1227 = vmatmul.mubr.bf16.gmra.mxu1 %v946_v36  ;;  %1420 = vmatmul.mubr.bf16.gmra.mxu0 %v946_v36  ;;  %v3775_v61 = vpop.f32.mrf.mxu1  ;;  %v825_v17 = vmul.f32 %v5216_v7, %v5077_v37  ;;  %v888_v37 = vld [vmem:[#allocation7 + $0x40] sm:$0xff] }
 0x190   : > { %v3728_v52 = vpop.f32.mrf.mxu0  ;;  %1236 = vmatprep.mubr.bf16.mxu1 %v4784_v45  ;;  %1429 = vmatprep.mubr.bf16.mxu0 %v4784_v45  ;;  %v803_v6 = vmul.f32 %v3774_v57, %v5137_v53  ;;  %v5221_v8 = vadd.f32 %v886_v59, %v854_v49 }
 0x191   : > { %v855_v58 = vadd.f32 %v823_v1, %v787_v50  ;;  %v3729_v56 = vadd.f32 %v3728_v52, %v3727_v44  ;;  %3808 = vmatpush3.bf16.msra.mxu1 %v4258_v40  ;;  %3920 = vmatpush3.bf16.msra.mxu0 %v4260_v41  ;;  %v3776_v12 = vpop.f32.mrf.mxu1  ;;  %v4530_v50 = vld [vmem:[%s5005_s9 + $0x50] sm:$0xff] }
 0x192   : > { %v3730_v48 = vpop.f32.mrf.mxu0  ;;  %3809 = vmatprep.subr.bf16.mxu1 %v4261_v39  ;;  %3921 = vmatprep.subr.bf16.mxu0 %v4263_v46  ;;  %7188 = vst [vmem:[#allocation25_spill] sm:$0xff] %v5221_v8  ;;  %v5226_v14 = vadd.f32 %v5069_v31, %v803_v6  ;;  %v3777_v16 = vadd.f32 %v3776_v12, %v3775_v61  ;;  %v4531_v61 = vld [vmem:[%s5005_s9 + $0x58] sm:$0xff] }
 0x193   : > { %v788_v30 = vmul.f32 %v3729_v56, %v5137_v53  ;;  %v5223_v10 = vadd.f32 %v887_v43, %v855_v58  ;;  %v3778_v33 = vpop.f32.mrf.mxu1  ;;  %v826_v2 = vmul.f32 %v4530_v50, %v5216_v7 }
 0x194   : > { %v3731_v13 = vpop.f32.mrf.mxu0  ;;  %v804_v42 = vmul.f32 %v3777_v16, %v5137_v53 }
 0x195   : > { %7189 = vst [vmem:[#allocation26_spill] sm:$0xff] %v5223_v10  ;;  %v3732_v38 = vadd.f32 %v3731_v13, %v3730_v48  ;;  %v947_v0 = vpack.c.bf16 %v5223_v10, %v5221_v8  ;;  %3810 = vmatpush3.bf16.msra.mxu1 %v4262_v62  ;;  %3922 = vmatpush3.bf16.msra.mxu0 %v4264_v63  ;;  %v3779_v31 = vpop.f32.mrf.mxu1 }
 0x196   : > { %v3733_v23 = vpop.f32.mrf.mxu0  ;;  %v856_v1 = vadd.f32 %v824_v60, %v788_v30  ;;  %v5237_v40 = vadd.f32 %v5058_v26, %v804_v42  ;;  %v3780_v41 = vadd.f32 %v3779_v31, %v3778_v33  ;;  %v827_v62 = vmul.f32 %v4531_v61, %v5216_v7 }
 0x197   : > { %v789_v29 = vmul.f32 %v3732_v38, %v5137_v53  ;;  %1237 = vmatmul.mubr.bf16.gmra.mxu1 %v947_v0  ;;  %1430 = vmatmul.mubr.bf16.gmra.mxu0 %v947_v0  ;;  %v3781_v39 = vpop.f32.mrf.mxu1  ;;  %v891_v38 = vld [vmem:[#allocation7 + $0x58] sm:$0xff] }
 0x198   : > { %v3734_v36 = vpop.f32.mrf.mxu0  ;;  %1246 = vmatprep.mubr.bf16.mxu1 %v4784_v45  ;;  %1439 = vmatprep.mubr.bf16.mxu0 %v4784_v45  ;;  %v805_v49 = vmul.f32 %v3780_v41, %v5137_v53  ;;  %v5243_v59 = vadd.f32 %v888_v37, %v856_v1 }
 0x199   : > { %v857_v44 = vadd.f32 %v825_v17, %v789_v29  ;;  %v3735_v55 = vadd.f32 %v3734_v36, %v3733_v23  ;;  %v3782_v57 = vpop.f32.mrf.mxu1  ;;  %v890_v17 = vld [vmem:[#allocation7 + $0x50] sm:$0xff]  ;;  %v4532_v36 = vld [vmem:[%s5005_s9 + $0x60] sm:$0xff] }
 0x19a   : > { %v3736_v46 = vpop.f32.mrf.mxu0  ;;  %7190 = vst [vmem:[#allocation27_spill] sm:$0xff] %v5243_v59  ;;  %v5248_v58 = vadd.f32 %v5061_v27, %v805_v49  ;;  %v3783_v56 = vadd.f32 %v3782_v57, %v3781_v39  ;;  %v828_v37 = vmul.f32 %v4532_v36, %v5216_v7  ;;  %v4533_v49 = vld [vmem:[%s5005_s9 + $0x68] sm:$0xff] }
 0x19b   : > { %v790_v52 = vmul.f32 %v3735_v55, %v5137_v53  ;;  %v5245_v43 = vadd.f32 %v889_v51, %v857_v44  ;;  %v3784_v6 = vpop.f32.mrf.mxu1  ;;  %v829_v50 = vmul.f32 %v4533_v49, %v5216_v7 }
 0x19c   : > { %v3737_v26 = vpop.f32.mrf.mxu0  ;;  %v806_v30 = vmul.f32 %v3783_v56, %v5137_v53 }
 0x19d   : > { %7191 = vst [vmem:[#allocation28_spill] sm:$0xff] %v5245_v43  ;;  %v3738_v63 = vadd.f32 %v3737_v26, %v3736_v46  ;;  %v948_v48 = vpack.c.bf16 %v5245_v43, %v5243_v59  ;;  %v858_v12 = vadd.f32 %v826_v2, %v790_v52  ;;  %v3785_v27 = vpop.f32.mrf.mxu1 }
 0x19e   : > { %v3739_v60 = vpop.f32.mrf.mxu0  ;;  %v5259_v0 = vadd.f32 %v5048_v19, %v806_v30  ;;  %v3786_v33 = vadd.f32 %v3785_v27, %v3784_v6  ;;  %v893_v6 = vld [vmem:[#allocation7 + $0x68] sm:$0xff] }
 0x19f   : > { %v791_v13 = vmul.f32 %v3738_v63, %v5137_v53  ;;  %1247 = vmatmul.mubr.bf16.gmra.mxu1 %v948_v48  ;;  %1440 = vmatmul.mubr.bf16.gmra.mxu0 %v948_v48  ;;  %v3787_v1 = vpop.f32.mrf.mxu1  ;;  %v5265_v41 = vadd.f32 %v890_v17, %v858_v12  ;;  %v892_v48 = vld [vmem:[#allocation7 + $0x60] sm:$0xff] }
 0x1a0   : > { %v3740_v16 = vpop.f32.mrf.mxu0  ;;  %1256 = vmatprep.mubr.bf16.mxu1 %v4784_v45  ;;  %1449 = vmatprep.mubr.bf16.mxu0 %v4784_v45  ;;  %v807_v31 = vmul.f32 %v3786_v33, %v5137_v53 }
 0x1a1   : > { %v859_v23 = vadd.f32 %v827_v62, %v791_v13  ;;  %v3741_v42 = vadd.f32 %v3740_v16, %v3739_v60  ;;  %7192 = vst [vmem:[#allocation29_spill] sm:$0xff] %v5265_v41  ;;  %v3788_v55 = vpop.f32.mrf.mxu1 }
 0x1a2   : > { %v3742_v29 = vpop.f32.mrf.mxu0  ;;  %v5270_v39 = vadd.f32 %v5051_v20, %v807_v31  ;;  %v3789_v46 = vadd.f32 %v3788_v55, %v3787_v1 }
 0x1a3   : > { %v792_v51 = vmul.f32 %v3741_v42, %v5137_v53  ;;  %v5267_v44 = vadd.f32 %v891_v38, %v859_v23  ;;  %v3790_v57 = vpop.f32.mrf.mxu1  ;;  %v4534_v38 = vld [vmem:[%s5005_s9 + $0x70] sm:$0xff] }
 0x1a4   : > { %v3743_v19 = vpop.f32.mrf.mxu0  ;;  %v808_v56 = vmul.f32 %v3789_v46, %v5137_v53  ;;  %v830_v33 = vmul.f32 %v4534_v38, %v5216_v7 }
 0x1a5   : > { %7193 = vst [vmem:[#allocation30_spill] sm:$0xff] %v5267_v44  ;;  %v3744_v2 = vadd.f32 %v3743_v19, %v3742_v29  ;;  %v949_v52 = vpack.c.bf16 %v5267_v44, %v5265_v41  ;;  %v860_v61 = vadd.f32 %v828_v37, %v792_v51  ;;  %v3791_v20 = vpop.f32.mrf.mxu1  ;;  %v4535_v37 = vld [vmem:[%s5005_s9 + $0x78] sm:$0xff] }
 0x1a6   : > { %v3745_v26 = vpop.f32.mrf.mxu0  ;;  %v5281_v60 = vadd.f32 %v5038_v11, %v808_v56  ;;  %v3792_v30 = vadd.f32 %v3791_v20, %v3790_v57  ;;  %v831_v51 = vmul.f32 %v4535_v37, %v5216_v7  ;;  %v895_v57 = vld [vmem:[#allocation7 + $0x78] sm:$0xff] }
 0x1a7   : > { %v793_v62 = vmul.f32 %v3744_v2, %v5137_v53  ;;  %1257 = vmatmul.mubr.bf16.gmra.mxu1 %v949_v52  ;;  %1450 = vmatmul.mubr.bf16.gmra.mxu0 %v949_v52  ;;  %v3793_v27 = vpop.f32.mrf.mxu1  ;;  %v5287_v42 = vadd.f32 %v892_v48, %v860_v61 }
 0x1a8   : > { %v3746_v63 = vpop.f32.mrf.mxu0  ;;  %1266 = vmatprep.mubr.bf16.mxu1 %v4784_v45  ;;  %1459 = vmatprep.mubr.bf16.mxu0 %v4784_v45  ;;  %v809_v17 = vmul.f32 %v3792_v30, %v5137_v53  ;;  %v897_v30 = vld [vmem:[#allocation7 + $0x88] sm:$0xff] }
 0x1a9   : > { %v861_v12 = vadd.f32 %v829_v50, %v793_v62  ;;  %v3747_v13 = vadd.f32 %v3746_v63, %v3745_v26  ;;  %7194 = vst [vmem:[#allocation31_spill] sm:$0xff] %v5287_v42  ;;  %v3794_v29 = vpop.f32.mrf.mxu1 }
 0x1aa   : > { %v3748_v16 = vpop.f32.mrf.mxu0  ;;  %v5292_v31 = vadd.f32 %v5043_v15, %v809_v17  ;;  %v3795_v36 = vadd.f32 %v3794_v29, %v3793_v27  ;;  %v894_v15 = vld [vmem:[#allocation7 + $0x70] sm:$0xff]  ;;  %v901_v17 = vld [vmem:[#allocation7 + $0xa8] sm:$0xff] }
 0x1ab   : > { %v794_v23 = vmul.f32 %v3747_v13, %v5137_v53  ;;  %v5289_v1 = vadd.f32 %v893_v6, %v861_v12  ;;  %v3796_v46 = vpop.f32.mrf.mxu1  ;;  %v896_v6 = vld [vmem:[#allocation7 + $0x80] sm:$0xff]  ;;  %v898_v12 = vld [vmem:[#allocation7 + $0x90] sm:$0xff]  ;;  %v899_v13 = vld [vmem:[#allocation7 + $0x98] sm:$0xff] }
 0x1ac   : > { %v3749_v11 = vpop.f32.mrf.mxu0  ;;  %v810_v49 = vmul.f32 %v3795_v36, %v5137_v53  ;;  %v5328_v27 = vadd.f32 %v898_v12, %v5169_v9  ;;  %v5341_v9 = vadd.f32 %v901_v17, %v5202_v24  ;;  %v905_v36 = vld [vmem:[#allocation7 + $0xc8] sm:$0xff] }
 0x1ad   : > { %7195 = vst [vmem:[#allocation32_spill] sm:$0xff] %v5289_v1  ;;  %v3750_v55 = vadd.f32 %v3749_v11, %v3748_v16  ;;  %v950_v19 = vpack.c.bf16 %v5289_v1, %v5287_v42  ;;  %v862_v50 = vadd.f32 %v830_v33, %v794_v23  ;;  %v3797_v52 = vpop.f32.mrf.mxu1  ;;  %v900_v16 = vld [vmem:[#allocation7 + $0xa0] sm:$0xff]  ;;  %v902_v33 = vld [vmem:[#allocation7 + $0xb0] sm:$0xff]  ;;  %v903_v23 = vld [vmem:[#allocation7 + $0xb8] sm:$0xff] }
 0x1ae   : > { %v5303_v7 = vadd.f32 %v5028_v4, %v810_v49  ;;  %v3798_v26 = vadd.f32 %v3797_v52, %v3796_v46  ;;  %v5318_v4 = vadd.f32 %v896_v6, %v5147_v22  ;;  %7200 = vst [vmem:[#allocation37_spill] sm:$0xff] %v5328_v27  ;;  %v5331_v22 = vadd.f32 %v899_v13, %v5180_v32  ;;  %v904_v11 = vld [vmem:[#allocation7 + $0xc0] sm:$0xff]  ;;  %v909_v49 = vld [vmem:[#allocation7 + $0xe8] sm:$0xff] }
 0x1af   : > { %v795_v2 = vmul.f32 %v3750_v55, %v5137_v53  ;;  %1267 = vmatmul.mubr.bf16.gmra.mxu1 %v950_v19  ;;  %1460 = vmatmul.mubr.bf16.gmra.mxu0 %v950_v19  ;;  %v5306_v62 = vadd.f32 %v894_v15, %v862_v50  ;;  %v5338_v38 = vadd.f32 %v900_v16, %v5191_v3  ;;  %v907_v55 = vld [vmem:[#allocation7 + $0xd8] sm:$0xff]  ;;  %v908_v46 = vld [vmem:[#allocation7 + $0xe0] sm:$0xff]  ;;  %v4265_v50 = vld [vmem:[#allocation11 + $0x48] sm:$0xff]  }
 0x1b0   : > { %1276 = vmatprep.mubr.bf16.mxu1 %v4784_v45  ;;  %1469 = vmatprep.mubr.bf16.mxu0 %v4784_v45  ;;  %v811_v61 = vmul.f32 %v3798_v26, %v5137_v53  ;;  %7198 = vst [vmem:[#allocation35_spill] sm:$0xff] %v5318_v4  ;;  %v5321_v53 = vadd.f32 %v897_v30, %v5158_v47  ;;  %7201 = vst [vmem:[#allocation38_spill] sm:$0xff] %v5331_v22  ;;  %v4267_v52 = vld [vmem:[#allocation11 + $0xc8] sm:$0xff]   ;;  %v910_v26 = vld [vmem:[#allocation7 + $0xf0] sm:$0xff] }
 0x1b1   : > { %v863_v56 = vadd.f32 %v831_v51, %v795_v2  ;;  %7196 = vst [vmem:[#allocation33_spill] sm:$0xff] %v5306_v62  ;;  %v953_v47 = vpack.c.bf16 %v5331_v22, %v5328_v27  ;;  %7202 = vst [vmem:[#allocation39_spill] sm:$0xff] %v5338_v38  ;;  %v954_v32 = vpack.c.bf16 %v5341_v9, %v5338_v38  ;;  %v906_v51 = vld [vmem:[#allocation7 + $0xd0] sm:$0xff]  ;;  %v4266_v2 = vld [vmem:[#allocation11 + $0x8] sm:$0xff]   ;;  %3811 = vmatprep.subr.bf16.mxu1 %v4265_v50 }
 0x1b2   : > { %v5311_v63 = vadd.f32 %v5031_v5, %v811_v61  ;;  %7199 = vst [vmem:[#allocation36_spill] sm:$0xff] %v5321_v53  ;;  %v952_v5 = vpack.c.bf16 %v5321_v53, %v5318_v4  ;;  %7203 = vst [vmem:[#allocation40_spill] sm:$0xff] %v5341_v9  ;;  %v5348_v29 = vadd.f32 %v902_v33, %v5213_v54  ;;  %v4268_v15 = vld [vmem:[#allocation11 + $0x88] sm:$0xff]   ;;  %3923 = vmatprep.subr.bf16.mxu0 %v4267_v52  ;;  %v4271_v6 = vld [vmem:[#allocation11 + $0xc0] sm:$0xff]  }
 0x1b3   : > { %v5308_v20 = vadd.f32 %v895_v57, %v863_v56  ;;  %v5351_v3 = vadd.f32 %v903_v23, %v5226_v14  ;;  %v5358_v37 = vadd.f32 %v904_v11, %v5237_v40  ;;  %v5361_v54 = vadd.f32 %v905_v36, %v5248_v58  ;;  %3812 = vmatpush3.bf16.msra.mxu1 %v4266_v2  ;;  %v911_v56 = vld [vmem:[#allocation7 + $0xf8] sm:$0xff]  ;;  %v4270_v30 = vld [vmem:[#allocation11] sm:$0xff]  }
 0x1b4   : > { %7204 = vst [vmem:[#allocation41_spill] sm:$0xff] %v5348_v29  ;;  %v5368_v19 = vadd.f32 %v906_v51, %v5259_v0  ;;  %v5371_v40 = vadd.f32 %v907_v55, %v5270_v39  ;;  %v5378_v0 = vadd.f32 %v908_v46, %v5281_v60  ;;  %v5381_v39 = vadd.f32 %v909_v49, %v5292_v31 }
 0x1b5   : > { %7197 = vst [vmem:[#allocation34_spill] sm:$0xff] %v5308_v20  ;;  %v951_v48 = vpack.c.bf16 %v5308_v20, %v5306_v62  ;;  %7205 = vst [vmem:[#allocation42_spill] sm:$0xff] %v5351_v3  ;;  %v955_v24 = vpack.c.bf16 %v5351_v3, %v5348_v29  ;;  %v956_v14 = vpack.c.bf16 %v5361_v54, %v5358_v37  ;;  %3924 = vmatpush3.bf16.msra.mxu0 %v4268_v15 }
 0x1b6   : > { %7206 = vst [vmem:[#allocation43_spill] sm:$0xff] %v5358_v37  ;;  %7207 = vst [vmem:[#allocation44_spill] sm:$0xff] %v5361_v54  ;;  %v957_v58 = vpack.c.bf16 %v5371_v40, %v5368_v19  ;;  %v958_v57 = vpack.c.bf16 %v5381_v39, %v5378_v0  ;;  %v5388_v60 = vadd.f32 %v910_v26, %v5303_v7  ;;  %3925 = vmatprep.subr.bf16.mxu0 %v4271_v6 }
 0x1b7   : > { %1277 = vmatmul.mubr.bf16.gmra.mxu1 %v951_v48  ;;  %1470 = vmatmul.mubr.bf16.gmra.mxu0 %v951_v48  ;;  %7208 = vst [vmem:[#allocation45_spill] sm:$0xff] %v5368_v19  ;;  %7209 = vst [vmem:[#allocation46_spill] sm:$0xff] %v5371_v40  ;;  %v5391_v31 = vadd.f32 %v911_v56, %v5311_v63  ;;  %v4269_v48 = vld [vmem:[#allocation11 + $0x40] sm:$0xff]   ;;  %v992_v63 = vld [vmem:[%s7061_s5] sm:$0xf] }
 0x1b8   : > { %1286 = vmatprep.mubr.bf16.mxu1 %v4784_v45  ;;  %1479 = vmatprep.mubr.bf16.mxu0 %v4784_v45  ;;  %7210 = vst [vmem:[#allocation47_spill] sm:$0xff] %v5378_v0  ;;  %7211 = vst [vmem:[#allocation48_spill] sm:$0xff] %v5381_v39 }
 0x1b9   : > { %7212 = vst [vmem:[#allocation49_spill] sm:$0xff] %v5388_v60  ;;  %7213 = vst [vmem:[#allocation50_spill] sm:$0xff] %v5391_v31  ;;  %v959_v61 = vpack.c.bf16 %v5391_v31, %v5388_v60  ;;  %3813 = vmatprep.subr.bf16.mxu1 %v4269_v48 }
 0x1ba   : > { %3814 = vmatpush3.bf16.msra.mxu1 %v4270_v30 }
 0x1bf   : > { %1287 = vmatmul.mubr.bf16.gmra.mxu1 %v952_v5  ;;  %1480 = vmatmul.mubr.bf16.gmra.mxu0 %v952_v5  ;;  %v4272_v5 = vld [vmem:[#allocation11 + $0x80] sm:$0xff]  }
 0x1c0   : > { %1296 = vmatprep.mubr.bf16.mxu1 %v4784_v45  ;;  %1489 = vmatprep.mubr.bf16.mxu0 %v4784_v45 }
 0x1c1   : > { %3926 = vmatpush3.bf16.msra.mxu0 %v4272_v5 }
 0x1c7   : > { %1297 = vmatmul.mubr.bf16.gmra.mxu1 %v953_v47  ;;  %1490 = vmatmul.mubr.bf16.gmra.mxu0 %v953_v47 }
 0x1c8   : > { %1306 = vmatprep.mubr.bf16.mxu1 %v4784_v45  ;;  %1499 = vmatprep.mubr.bf16.mxu0 %v4784_v45 }
 0x1cf   : > { %1307 = vmatmul.mubr.bf16.gmra.mxu1 %v954_v32  ;;  %1500 = vmatmul.mubr.bf16.gmra.mxu0 %v954_v32 }
 0x1d0   : > { %1316 = vmatprep.mubr.bf16.mxu1 %v4784_v45  ;;  %1509 = vmatprep.mubr.bf16.mxu0 %v4784_v45 }
 0x1d7   : > { %1317 = vmatmul.mubr.bf16.gmra.mxu1 %v955_v24  ;;  %1510 = vmatmul.mubr.bf16.gmra.mxu0 %v955_v24 }
 0x1d8   : > { %1326 = vmatprep.mubr.bf16.mxu1 %v4784_v45  ;;  %1519 = vmatprep.mubr.bf16.mxu0 %v4784_v45 }
 0x1df   : > { %1327 = vmatmul.mubr.bf16.gmra.mxu1 %v956_v14  ;;  %1520 = vmatmul.mubr.bf16.gmra.mxu0 %v956_v14 }
 0x1e0   : > { %1336 = vmatprep.mubr.bf16.mxu1 %v4784_v45  ;;  %1529 = vmatprep.mubr.bf16.mxu0 %v4784_v45 }
 0x1e7   : > { %1337 = vmatmul.mubr.bf16.gmra.mxu1 %v957_v58  ;;  %1530 = vmatmul.mubr.bf16.gmra.mxu0 %v957_v58 }
 0x1e8   : > { %1346 = vmatprep.mubr.bf16.mxu1 %v4784_v45  ;;  %1539 = vmatprep.mubr.bf16.mxu0 %v4784_v45 }
 0x1ef   : > { %1347 = vmatmul.mubr.bf16.gmra.mxu1 %v958_v57  ;;  %1540 = vmatmul.mubr.bf16.gmra.mxu0 %v958_v57 }
 0x1f0   : > { %1356 = vmatprep.mubr.bf16.mxu1 %v4784_v45  ;;  %1549 = vmatprep.mubr.bf16.mxu0 %v4784_v45  ;;  %v994_v45 = vlaneseq }
 0x1f2   : > { %v995_v12 = vshrl.u32 %v994_v45, 7 }
 0x1f4   : > { %v996_v7 = vsub.s32 0, %v995_v12  ;;  %v1004_v13 = vsub.s32 2, %v995_v12  ;;  %v1000_v47 = vsub.s32 1, %v995_v12  ;;  %v1008_v16 = vsub.s32 3, %v995_v12 }
 0x1f6   : > { %v5398_v17 = vrot.slane %v992_v63, %v996_v7  ;;  %v5400_v32 = vrot.slane %v992_v63, %v1004_v13  ;;  %v5402_v33 = vrot.slane %v992_v63, %v1000_v47  ;;  %v5404_v23 = vrot.slane %v992_v63, %v1008_v16 }
 0x1f7   : > { %1357 = vmatmul.mubr.bf16.gmra.mxu1 %v959_v61  ;;  %1550 = vmatmul.mubr.bf16.gmra.mxu0 %v959_v61 }
 0x23f   : > { %v1208_v24 = vpop.f32.mrf.mxu1  ;;  %v1401_v11 = vpop.f32.mrf.mxu0 }
 0x240   : > { %v5407_v36 = vadd.f32 %v1208_v24, %v5398_v17  ;;  %v5410_v14 = vadd.f32 %v1401_v11, %v5400_v32 }
 0x241   : > { %v1210_v51 = vpop.f32.mrf.mxu1  ;;  %v1403_v55 = vpop.f32.mrf.mxu0 }
 0x242   : > { %v1560_v58 = vmul.f32 %v5407_v36, %v5407_v36  ;;  %v1562_v46 = vmul.f32 %v5410_v14, %v5410_v14  ;;  %v5417_v49 = vadd.f32 %v1210_v51, %v5402_v33  ;;  %v5420_v50 = vadd.f32 %v1403_v55, %v5404_v23 }
 0x243   : > { %v1212_v2 = vpop.f32.mrf.mxu1  ;;  %v1405_v52 = vpop.f32.mrf.mxu0 }
 0x244   : > { %v1688_v15 = vmul.f32 %v1560_v58, %v5407_v36  ;;  %v1690_v57 = vmul.f32 %v1562_v46, %v5410_v14  ;;  %v1561_v26 = vmul.f32 %v5417_v49, %v5417_v49  ;;  %v1563_v56 = vmul.f32 %v5420_v50, %v5420_v50 }
 0x245   : > { %v5429_v61 = vadd.f32 %v1212_v2, %v5398_v17  ;;  %v5432_v48 = vadd.f32 %v1405_v52, %v5400_v32  ;;  %v1214_v6 = vpop.f32.mrf.mxu1  ;;  %v1407_v30 = vpop.f32.mrf.mxu0 }
 0x246   : > { %v1816_v5 = vmul.f32 0.044715, %v1688_v15  ;;  %v1818_v45 = vmul.f32 0.044715, %v1690_v57  ;;  %v1689_v12 = vmul.f32 %v1561_v26, %v5417_v49  ;;  %v5440_v63 = vadd.f32 %v1214_v6, %v5402_v33 }
 0x247   : > { %v1564_v7 = vmul.f32 %v5429_v61, %v5429_v61  ;;  %v1566_v13 = vmul.f32 %v5432_v48, %v5432_v48  ;;  %v5443_v47 = vadd.f32 %v1407_v30, %v5404_v23  ;;  %v1218_v16 = vpop.f32.mrf.mxu1  ;;  %v1411_v24 = vpop.f32.mrf.mxu0  ;;  %v1691_v58 = vmul.f32 %v1563_v56, %v5420_v50 }
 0x248   : > { %v1944_v11 = vadd.f32 %v1816_v5, %v5407_v36  ;;  %v1946_v51 = vadd.f32 %v1818_v45, %v5410_v14  ;;  %v1817_v55 = vmul.f32 0.044715, %v1689_v12  ;;  %v1565_v2 = vmul.f32 %v5440_v63, %v5440_v63 }
 0x249   : > { %v1692_v46 = vmul.f32 %v1564_v7, %v5429_v61  ;;  %v1220_v52 = vpop.f32.mrf.mxu1  ;;  %v1413_v15 = vpop.f32.mrf.mxu0  ;;  %v1694_v6 = vmul.f32 %v1566_v13, %v5432_v48  ;;  %v1567_v30 = vmul.f32 %v5443_v47, %v5443_v47  ;;  %v5456_v56 = vadd.f32 %v1218_v16, %v5398_v17 }
 0x24a   : > { %v2072_v57 = vmul.f32 0.7978846, %v1944_v11  ;;  %v2074_v26 = vmul.f32 0.7978846, %v1946_v51  ;;  %v1693_v45 = vmul.f32 %v1565_v2, %v5440_v63  ;;  %v1945_v7 = vadd.f32 %v1817_v55, %v5417_v49 }
 0x24b   : > { %v1820_v5 = vmul.f32 0.044715, %v1692_v46  ;;  %v1222_v12 = vpop.f32.mrf.mxu1  ;;  %v1819_v31 = vmul.f32 0.044715, %v1691_v58  ;;  %v1415_v51 = vpop.f32.mrf.mxu0  ;;  %v1822_v60 = vmul.f32 0.044715, %v1694_v6  ;;  %v1695_v13 = vmul.f32 %v1567_v30, %v5443_v47 }
 0x24c   : > { %4273 = vtanh.f32 %v2072_v57  ;;  %v1568_v46 = vmul.f32 %v5456_v56, %v5456_v56  ;;  %v5464_v2 = vadd.f32 %v1411_v24, %v5400_v32  ;;  %v1821_v57 = vmul.f32 0.044715, %v1693_v45 }
 0x24d   : > { %4275 = vtanh.f32 %v2074_v26  ;;  %v1948_v11 = vadd.f32 %v1820_v5, %v5429_v61  ;;  %v1224_v39 = vpop.f32.mrf.mxu1  ;;  %v5470_v58 = vadd.f32 %v1220_v52, %v5402_v33  ;;  %v1947_v6 = vadd.f32 %v1819_v31, %v5420_v50  ;;  %v1417_v24 = vpop.f32.mrf.mxu0 }
 0x24e   : > { %v1696_v26 = vmul.f32 %v1568_v46, %v5456_v56  ;;  %v1570_v55 = vmul.f32 %v5464_v2, %v5464_v2  ;;  %v5474_v30 = vadd.f32 %v1413_v15, %v5404_v23  ;;  %v5477_v5 = vadd.f32 %v1222_v12, %v5398_v17 }
 0x24f   : > { %v2076_v16 = vmul.f32 0.7978846, %v1948_v11  ;;  %v2073_v45 = vmul.f32 0.7978846, %v1945_v7  ;;  %v1950_v11 = vadd.f32 %v1822_v60, %v5432_v48  ;;  %v1823_v0 = vmul.f32 0.044715, %v1695_v13  ;;  %v1228_v19 = vpop.f32.mrf.mxu1  ;;  %v1421_v37 = vpop.f32.mrf.mxu0 }
 0x250   : > { %v1698_v46 = vmul.f32 %v1570_v55, %v5464_v2  ;;  %v1824_v40 = vmul.f32 0.044715, %v1696_v26  ;;  %v1569_v52 = vmul.f32 %v5470_v58, %v5470_v58  ;;  %v1571_v31 = vmul.f32 %v5474_v30, %v5474_v30 }
 0x251   : > { %v1572_v15 = vmul.f32 %v5477_v5, %v5477_v5  ;;  %4277 = vtanh.f32 %v2076_v16  ;;  %v1949_v12 = vadd.f32 %v1821_v57, %v5440_v63  ;;  %v5489_v60 = vadd.f32 %v1415_v51, %v5400_v32 }
 0x252   : > { %v1826_v7 = vmul.f32 0.044715, %v1698_v46  ;;  %v1697_v13 = vmul.f32 %v1569_v52, %v5470_v58  ;;  %v1699_v26 = vmul.f32 %v1571_v31, %v5474_v30  ;;  %v5495_v54 = vadd.f32 %v1224_v39, %v5402_v33 }
 0x253   : > { %v1700_v55 = vmul.f32 %v1572_v15, %v5477_v5  ;;  %v2075_v3 = vmul.f32 0.7978846, %v1947_v6  ;;  %v1951_v29 = vadd.f32 %v1823_v0, %v5443_v47  ;;  %v1574_v57 = vmul.f32 %v5489_v60, %v5489_v60  ;;  %v1230_v15 = vpop.f32.mrf.mxu1 }
 0x254   : > { %v5501_v16 = vadd.f32 %v1417_v24, %v5404_v23  ;;  %v1952_v51 = vadd.f32 %v1824_v40, %v5456_v56  ;;  %v1825_v46 = vmul.f32 0.044715, %v1697_v13  ;;  %v1827_v52 = vmul.f32 0.044715, %v1699_v26  ;;  %v1423_v13 = vpop.f32.mrf.mxu0 }
 0x255   : > { %v1573_v31 = vmul.f32 %v5495_v54, %v5495_v54  ;;  %v2078_v39 = vmul.f32 0.7978846, %v1950_v11  ;;  %v1954_v9 = vadd.f32 %v1826_v7, %v5464_v2  ;;  %v1828_v6 = vmul.f32 0.044715, %v1700_v55 }
 0x256   : > { %v1702_v0 = vmul.f32 %v1574_v57, %v5489_v60  ;;  %4279 = vtanh.f32 %v2073_v45  ;;  %v2077_v22 = vmul.f32 0.7978846, %v1949_v12  ;;  %v1953_v24 = vadd.f32 %v1825_v46, %v5470_v58  ;;  %v1232_v45 = vpop.f32.mrf.mxu1 }
 0x257   : > { %v1575_v40 = vmul.f32 %v5501_v16, %v5501_v16  ;;  %4281 = vtanh.f32 %v2075_v3  ;;  %v2079_v53 = vmul.f32 0.7978846, %v1951_v29  ;;  %v1955_v11 = vadd.f32 %v1827_v52, %v5474_v30  ;;  %v1425_v3 = vpop.f32.mrf.mxu0 }
 0x258   : > { %v2080_v4 = vmul.f32 0.7978846, %v1952_v51  ;;  %v1830_v7 = vmul.f32 0.044715, %v1702_v0  ;;  %v1701_v55 = vmul.f32 %v1573_v31, %v5495_v54  ;;  %v5514_v57 = vadd.f32 %v1228_v19, %v5398_v17  ;;  %v1234_v0 = vpop.f32.mrf.mxu1 }
 0x259   : > { %v4274_v38 = vpop.eup %4273  ;;  %4283 = vtanh.f32 %v2078_v39  ;;  %v2082_v46 = vmul.f32 0.7978846, %v1954_v9  ;;  %v1956_v20 = vadd.f32 %v1828_v6, %v5477_v5  ;;  %v2081_v62 = vmul.f32 0.7978846, %v1953_v24 }
 0x25a   : > { %v4276_v26 = vpop.eup %4275  ;;  %v2328_v27 = vadd.f32 1.0, %v4274_v38  ;;  %7214 = vst [vmem:[#allocation51_spill] sm:$0xff] %v5514_v57  ;;  %4285 = vtanh.f32 %v2077_v22  ;;  %v1703_v38 = vmul.f32 %v1575_v40, %v5501_v16  ;;  %v1576_v29 = vmul.f32 %v5514_v57, %v5514_v57 }
 0x25b   : > { %v2330_v12 = vadd.f32 1.0, %v4276_v26  ;;  %4287 = vtanh.f32 %v2079_v53  ;;  %v2083_v52 = vmul.f32 0.7978846, %v1955_v11  ;;  %v1958_v19 = vadd.f32 %v1830_v7, %v5489_v60  ;;  %v1427_v53 = vpop.f32.mrf.mxu0 }
 0x25c   : > { %v2456_v51 = vmul.f32 0.5, %v2328_v27  ;;  %4289 = vtanh.f32 %v2080_v4  ;;  %v1829_v31 = vmul.f32 0.044715, %v1701_v55  ;;  %v2084_v9 = vmul.f32 0.7978846, %v1956_v20 }
 0x25d   : > { %v2458_v39 = vmul.f32 0.5, %v2330_v12  ;;  %4291 = vtanh.f32 %v2082_v46  ;;  %v1704_v22 = vmul.f32 %v1576_v29, %v5514_v57  ;;  %v1831_v24 = vmul.f32 0.044715, %v1703_v38 }
 0x25e   : > { %v4278_v6 = vpop.eup %4277  ;;  %4293 = vtanh.f32 %v2081_v62  ;;  %v5523_v40 = vadd.f32 %v1421_v37, %v5400_v32  ;;  %v5526_v27 = vadd.f32 %v1230_v15, %v5402_v33  ;;  %v5529_v4 = vmul.f32 %v2456_v51, %v5407_v36  ;;  %v1238_v15 = vpop.f32.mrf.mxu1 }
 0x25f   : > { %4295 = vtanh.f32 %v2083_v52  ;;  %v1832_v26 = vmul.f32 0.044715, %v1704_v22  ;;  %v5532_v11 = vadd.f32 %v1423_v13, %v5404_v23  ;;  %v2086_v20 = vmul.f32 0.7978846, %v1958_v19  ;;  %v1431_v51 = vpop.f32.mrf.mxu0 }
 0x260   : > { %7215 = vst [vmem:[#allocation52_spill] sm:$0xff] %v5523_v40  ;;  %7216 = vst [vmem:[#allocation53_spill] sm:$0xff] %v5526_v27  ;;  %v1957_v7 = vadd.f32 %v1829_v31, %v5495_v54  ;;  %v1578_v62 = vmul.f32 %v5523_v40, %v5523_v40  ;;  %v1577_v37 = vmul.f32 %v5526_v27, %v5526_v27  ;;  %v2332_v36 = vadd.f32 1.0, %v4278_v6 }
 0x261   : > { %7217 = vst [vmem:[#allocation54_spill] sm:$0xff] %v5532_v11  ;;  %v5540_v55 = vmul.f32 %v2458_v39, %v5410_v14  ;;  %v1579_v12 = vmul.f32 %v5532_v11, %v5532_v11  ;;  %v5545_v13 = vadd.f32 %v1232_v45, %v5398_v17  ;;  %4297 = vtanh.f32 %v2084_v9 }
 0x262   : > { %v1706_v46 = vmul.f32 %v1578_v62, %v5523_v40  ;;  %v1705_v38 = vmul.f32 %v1577_v37, %v5526_v27  ;;  %v5550_v29 = vadd.f32 %v1425_v3, %v5400_v32  ;;  %v1959_v14 = vadd.f32 %v1831_v24, %v5501_v16  ;;  %v1240_v62 = vpop.f32.mrf.mxu1 }
 0x263   : > { %7218 = vst [vmem:[#allocation55_spill] sm:$0xff] %v5545_v13  ;;  %v5552_v52 = vpop.eup %4279  ;;  %v1960_v19 = vadd.f32 %v1832_v26, %v5514_v57  ;;  %v1707_v31 = vmul.f32 %v1579_v12, %v5532_v11  ;;  %v1580_v45 = vmul.f32 %v5545_v13, %v5545_v13  ;;  %v5564_v6 = vadd.f32 %v1234_v0, %v5402_v33  ;;  %v1433_v0 = vpop.f32.mrf.mxu0 }
 0x264   : > { %7219 = vst [vmem:[#allocation56_spill] sm:$0xff] %v5550_v29  ;;  %v5559_v39 = vpop.eup %4281  ;;  %v1834_v9 = vmul.f32 0.044715, %v1706_v46  ;;  %v1833_v22 = vmul.f32 0.044715, %v1705_v38  ;;  %v1582_v3 = vmul.f32 %v5550_v29, %v5550_v29  ;;  %v5568_v12 = vadd.f32 %v1427_v53, %v5404_v23  ;;  %v1242_v59 = vpop.f32.mrf.mxu1 }
 0x265   : > { %7220 = vst [vmem:[#allocation57_spill] sm:$0xff] %v5564_v6  ;;  %v2085_v37 = vmul.f32 0.7978846, %v1957_v7  ;;  %v1835_v24 = vmul.f32 0.044715, %v1707_v31  ;;  %v1708_v26 = vmul.f32 %v1580_v45, %v5545_v13  ;;  %v1581_v44 = vmul.f32 %v5564_v6, %v5564_v6 }
 0x266   : > { %7221 = vst [vmem:[#allocation58_spill] sm:$0xff] %v5568_v12  ;;  %v4284_v1 = vpop.eup %4283  ;;  %v1962_v42 = vadd.f32 %v1834_v9, %v5523_v40  ;;  %v1961_v46 = vadd.f32 %v1833_v22, %v5526_v27  ;;  %v1710_v38 = vmul.f32 %v1582_v3, %v5550_v29  ;;  %v2087_v7 = vmul.f32 0.7978846, %v1959_v14 }
 0x267   : > { %v5575_v41 = vpop.eup %4285  ;;  %v1836_v31 = vmul.f32 0.044715, %v1708_v26  ;;  %v1583_v45 = vmul.f32 %v5568_v12, %v5568_v12  ;;  %v5580_v53 = vadd.f32 %v1238_v15, %v5398_v17  ;;  %4299 = vtanh.f32 %v2086_v20 }
 0x268   : > { %v5582_v43 = vpop.eup %4287  ;;  %v2088_v9 = vmul.f32 0.7978846, %v1960_v19  ;;  %v1963_v22 = vadd.f32 %v1835_v24, %v5532_v11  ;;  %v1709_v3 = vmul.f32 %v1581_v44, %v5564_v6  ;;  %v2090_v8 = vmul.f32 0.7978846, %v1962_v42  ;;  %v1435_v24 = vpop.f32.mrf.mxu0 }
 0x269   : > { %7222 = vst [vmem:[#allocation59_spill] sm:$0xff] %v5580_v53  ;;  %v5586_v10 = vpop.eup %4289  ;;  %v1838_v14 = vmul.f32 0.044715, %v1710_v38  ;;  %v1711_v26 = vmul.f32 %v1583_v45, %v5568_v12  ;;  %v1584_v21 = vmul.f32 %v5580_v53, %v5580_v53  ;;  %v2334_v18 = vadd.f32 1.0, %v4284_v1 }
 0x26a   : > { %v5591_v15 = vpop.eup %4291  ;;  %4301 = vtanh.f32 %v2085_v37  ;;  %v2089_v20 = vmul.f32 0.7978846, %v1961_v46  ;;  %v5594_v19 = vadd.f32 %v1431_v51, %v5400_v32  ;;  %v1964_v42 = vadd.f32 %v1836_v31, %v5545_v13  ;;  %v1244_v51 = vpop.f32.mrf.mxu1 }
 0x26b   : > { %v5596_v44 = vpop.eup %4293  ;;  %4303 = vtanh.f32 %v2087_v7  ;;  %v1837_v38 = vmul.f32 0.044715, %v1709_v3  ;;  %v1712_v45 = vmul.f32 %v1584_v21, %v5580_v53  ;;  %v5602_v25 = vmul.f32 0.5, %v2332_v36 }
 0x26c   : > { %7223 = vst [vmem:[#allocation60_spill] sm:$0xff] %v5594_v19  ;;  %v5600_v28 = vpop.eup %4295  ;;  %4305 = vtanh.f32 %v2088_v9  ;;  %v2091_v1 = vmul.f32 0.7978846, %v1963_v22  ;;  %v1586_v37 = vmul.f32 %v5594_v19, %v5594_v19  ;;  %v1966_v46 = vadd.f32 %v1838_v14, %v5550_v29  ;;  %v1437_v9 = vpop.f32.mrf.mxu0 }
 0x26d   : > { %4307 = vtanh.f32 %v2090_v8  ;;  %v1839_v35 = vmul.f32 0.044715, %v1711_v26  ;;  %v5608_v7 = vadd.f32 %v1240_v62, %v5402_v33  ;;  %v1840_v31 = vmul.f32 0.044715, %v1712_v45 }
 0x26e   : > { %4309 = vtanh.f32 %v2089_v20  ;;  %v1714_v21 = vmul.f32 %v1586_v37, %v5594_v19  ;;  %v5612_v36 = vadd.f32 %v1433_v0, %v5404_v23  ;;  %v5614_v22 = vpop.eup %4297  ;;  %v2092_v3 = vmul.f32 0.7978846, %v1964_v42  ;;  %v1248_v20 = vpop.f32.mrf.mxu1 }
 0x26f   : > { %7224 = vst [vmem:[#allocation61_spill] sm:$0xff] %v5608_v7  ;;  %v1965_v34 = vadd.f32 %v1837_v38, %v5564_v6  ;;  %v1585_v8 = vmul.f32 %v5608_v7, %v5608_v7  ;;  %v5620_v14 = vadd.f32 %v1242_v59, %v5398_v17  ;;  %4311 = vtanh.f32 %v2091_v1 }
 0x270   : > { %7225 = vst [vmem:[#allocation62_spill] sm:$0xff] %v5612_v36  ;;  %v1842_v62 = vmul.f32 0.044715, %v1714_v21  ;;  %v1587_v26 = vmul.f32 %v5612_v36, %v5612_v36  ;;  %v5625_v0 = vadd.f32 %v1435_v24, %v5400_v32  ;;  %v2094_v45 = vmul.f32 0.7978846, %v1966_v46  ;;  %v1441_v24 = vpop.f32.mrf.mxu0 }
 0x271   : > { %7226 = vst [vmem:[#allocation63_spill] sm:$0xff] %v5620_v14  ;;  %v1967_v42 = vadd.f32 %v1839_v35, %v5568_v12  ;;  %v1713_v38 = vmul.f32 %v1585_v8, %v5608_v7  ;;  %v1588_v37 = vmul.f32 %v5620_v14, %v5620_v14  ;;  %v1968_v59 = vadd.f32 %v1840_v31, %v5580_v53  ;;  %v1250_v53 = vpop.f32.mrf.mxu1 }
 0x272   : > { %7227 = vst [vmem:[#allocation64_spill] sm:$0xff] %v5625_v0  ;;  %v1715_v1 = vmul.f32 %v1587_v26, %v5612_v36  ;;  %v1590_v21 = vmul.f32 %v5625_v0, %v5625_v0  ;;  %v5636_v29 = vadd.f32 %v1244_v51, %v5402_v33  ;;  %v2093_v40 = vmul.f32 0.7978846, %v1965_v34 }
 0x273   : > { %v1841_v46 = vmul.f32 0.044715, %v1713_v38  ;;  %v1716_v35 = vmul.f32 %v1588_v37, %v5620_v14  ;;  %v5640_v8 = vadd.f32 %v1437_v9, %v5404_v23  ;;  %4313 = vtanh.f32 %v2092_v3  ;;  %v1443_v37 = vpop.f32.mrf.mxu0 }
 0x274   : > { %7228 = vst [vmem:[#allocation65_spill] sm:$0xff] %v5636_v29  ;;  %v1970_v13 = vadd.f32 %v1842_v62, %v5594_v19  ;;  %v1843_v31 = vmul.f32 0.044715, %v1715_v1  ;;  %v1589_v26 = vmul.f32 %v5636_v29, %v5636_v29  ;;  %v5645_v57 = vpop.eup %4299  ;;  %v2095_v51 = vmul.f32 0.7978846, %v1967_v42 }
 0x275   : > { %7229 = vst [vmem:[#allocation66_spill] sm:$0xff] %v5640_v8  ;;  %v1718_v12 = vmul.f32 %v1590_v21, %v5625_v0  ;;  %v1591_v34 = vmul.f32 %v5640_v8, %v5640_v8  ;;  %v5651_v38 = vadd.f32 %v1248_v20, %v5398_v17  ;;  %v2462_v9 = vmul.f32 0.5, %v2334_v18 }
 0x276   : > { %4315 = vtanh.f32 %v2094_v45  ;;  %v2096_v3 = vmul.f32 0.7978846, %v1968_v59  ;;  %v1969_v62 = vadd.f32 %v1841_v46, %v5608_v7  ;;  %v1844_v19 = vmul.f32 0.044715, %v1716_v35  ;;  %v1252_v59 = vpop.f32.mrf.mxu1 }
 0x277   : > { %v5654_v1 = vpop.eup %4301  ;;  %4317 = vtanh.f32 %v2093_v40  ;;  %v1717_v42 = vmul.f32 %v1589_v26, %v5636_v29  ;;  %v1592_v21 = vmul.f32 %v5651_v38, %v5651_v38  ;;  %v2098_v6 = vmul.f32 0.7978846, %v1970_v13 }
 0x278   : > { %v5659_v11 = vpop.eup %4303  ;;  %v1971_v20 = vadd.f32 %v1843_v31, %v5612_v36  ;;  %v1719_v18 = vmul.f32 %v1591_v34, %v5640_v8  ;;  %v5664_v45 = vadd.f32 %v1441_v24, %v5400_v32  ;;  %v5670_v40 = vmul.f32 %v5602_v25, %v5429_v61  ;;  %v1445_v34 = vpop.f32.mrf.mxu0 }
 0x279   : > { %v5666_v46 = vpop.eup %4305  ;;  %4319 = vtanh.f32 %v2095_v51  ;;  %v1846_v35 = vmul.f32 0.044715, %v1718_v12  ;;  %v1720_v26 = vmul.f32 %v1592_v21, %v5651_v38  ;;  %v5676_v13 = vmul.f32 %v2462_v9, %v5432_v48  ;;  %v1254_v9 = vpop.f32.mrf.mxu1 }
 0x27a   : > { %7230 = vst [vmem:[#allocation67_spill] sm:$0xff] %v5666_v46  ;;  %v5673_v7 = vpop.eup %4307  ;;  %4321 = vtanh.f32 %v2096_v3  ;;  %v2097_v31 = vmul.f32 0.7978846, %v1969_v62  ;;  %v1594_v24 = vmul.f32 %v5664_v45, %v5664_v45  ;;  %v1972_v25 = vadd.f32 %v1844_v19, %v5620_v14 }
 0x27b   : > { %7231 = vst [vmem:[#allocation68_spill] sm:$0xff] %v5673_v7  ;;  %v5680_v36 = vpop.eup %4309  ;;  %v1845_v61 = vmul.f32 0.044715, %v1717_v42  ;;  %v1848_v51 = vmul.f32 0.044715, %v1720_v26  ;;  %v5684_v12 = vadd.f32 %v1250_v53, %v5402_v33  ;;  %4323 = vtanh.f32 %v2098_v6 }
 0x27c   : > { %v2099_v21 = vmul.f32 0.7978846, %v1971_v20  ;;  %v1847_v7 = vmul.f32 0.044715, %v1719_v18  ;;  %v1722_v48 = vmul.f32 %v1594_v24, %v5664_v45  ;;  %v5687_v3 = vpop.eup %4311  ;;  %v1974_v62 = vadd.f32 %v1846_v35, %v5625_v0  ;;  %v1447_v20 = vpop.f32.mrf.mxu0 }
 0x27d   : > { %7232 = vst [vmem:[#allocation69_spill] sm:$0xff] %v5684_v12  ;;  %7233 = vst [vmem:[#allocation70_spill] sm:$0xff] %v5687_v3  ;;  %v1976_v46 = vadd.f32 %v1848_v51, %v5651_v38  ;;  %v5692_v27 = vadd.f32 %v1443_v37, %v5404_v23  ;;  %v5695_v19 = vadd.f32 %v1252_v59, %v5398_v17  ;;  %4325 = vtanh.f32 %v2097_v31 }
 0x27e   : > { %v1850_v53 = vmul.f32 0.044715, %v1722_v48  ;;  %v1593_v6 = vmul.f32 %v5684_v12, %v5684_v12  ;;  %v5700_v42 = vadd.f32 %v1445_v34, %v5400_v32  ;;  %v2100_v18 = vmul.f32 0.7978846, %v1972_v25  ;;  %v1258_v34 = vpop.f32.mrf.mxu1 }
 0x27f   : > { %7234 = vst [vmem:[#allocation71_spill] sm:$0xff] %v5692_v27  ;;  %v1973_v35 = vadd.f32 %v1845_v61, %v5636_v29  ;;  %v2104_v26 = vmul.f32 0.7978846, %v1976_v46  ;;  %v1596_v37 = vmul.f32 %v5695_v19, %v5695_v19  ;;  %v1975_v24 = vadd.f32 %v1847_v7, %v5640_v8 }
 0x280   : > { %v1978_v59 = vadd.f32 %v1850_v53, %v5664_v45  ;;  %v1598_v31 = vmul.f32 %v5700_v42, %v5700_v42  ;;  %v5710_v51 = vadd.f32 %v1254_v9, %v5402_v33  ;;  %v5712_v48 = vpop.eup %4313  ;;  %4327 = vtanh.f32 %v2099_v21 }
 0x281   : > { %7235 = vst [vmem:[#allocation72_spill] sm:$0xff] %v5712_v48  ;;  %v1595_v46 = vmul.f32 %v5692_v27, %v5692_v27  ;;  %v1724_v25 = vmul.f32 %v1596_v37, %v5695_v19  ;;  %v5718_v61 = vadd.f32 %v1447_v20, %v5404_v23  ;;  %v2102_v7 = vmul.f32 0.7978846, %v1974_v62  ;;  %v1451_v37 = vpop.f32.mrf.mxu0 }
 0x282   : > { %v2106_v53 = vmul.f32 0.7978846, %v1978_v59  ;;  %v1721_v0 = vmul.f32 %v1593_v6, %v5684_v12  ;;  %v1726_v14 = vmul.f32 %v1598_v31, %v5700_v42  ;;  %4329 = vtanh.f32 %v2104_v26 }
 0x283   : > { %7236 = vst [vmem:[#allocation73_spill] sm:$0xff] %v5718_v61  ;;  %v5722_v9 = vpop.eup %4315  ;;  %v1852_v8 = vmul.f32 0.044715, %v1724_v25  ;;  %v1597_v21 = vmul.f32 %v5710_v51, %v5710_v51  ;;  %v5727_v29 = vadd.f32 %v1258_v34, %v5398_v17  ;;  %4331 = vtanh.f32 %v2100_v18 }
 0x284   : > { %7237 = vst [vmem:[#allocation74_spill] sm:$0xff] %v5722_v9  ;;  %v5729_v48 = vpop.eup %4317  ;;  %v2101_v62 = vmul.f32 0.7978846, %v1973_v35  ;;  %v2103_v20 = vmul.f32 0.7978846, %v1975_v24  ;;  %v1723_v6 = vmul.f32 %v1595_v46, %v5692_v27  ;;  %v1599_v26 = vmul.f32 %v5718_v61, %v5718_v61 }
 0x285   : > { %7238 = vst [vmem:[#allocation75_spill] sm:$0xff] %v5729_v48  ;;  %v1854_v59 = vmul.f32 0.044715, %v1726_v14  ;;  %v1980_v31 = vadd.f32 %v1852_v8, %v5695_v19  ;;  %v1600_v25 = vmul.f32 %v5727_v29, %v5727_v29  ;;  %4333 = vtanh.f32 %v2106_v53 }
 0x286   : > { %v5737_v9 = vpop.eup %4319  ;;  %v1849_v34 = vmul.f32 0.044715, %v1721_v0  ;;  %v5741_v18 = vadd.f32 %v1451_v37, %v5400_v32  ;;  %4335 = vtanh.f32 %v2102_v7  ;;  %v1725_v8 = vmul.f32 %v1597_v21, %v5710_v51 }
 0x287   : > { %7239 = vst [vmem:[#allocation76_spill] sm:$0xff] %v5737_v9  ;;  %v1982_v3 = vadd.f32 %v1854_v59, %v5700_v42  ;;  %v5743_v14 = vpop.eup %4321  ;;  %v2108_v35 = vmul.f32 0.7978846, %v1980_v31  ;;  %v1728_v24 = vmul.f32 %v1600_v25, %v5727_v29  ;;  %v2712_v46 = vpack.c.bf16 %v5670_v40, %v5529_v4  ;;  %v1260_v31 = vpop.f32.mrf.mxu1 }
 0x288   : > { %7240 = vst [vmem:[#allocation77_spill] sm:$0xff] %v5743_v14  ;;  %4337 = vtanh.f32 %v2101_v62  ;;  %v1602_v0 = vmul.f32 %v5741_v18, %v5741_v18  ;;  %v5751_v53 = vpop.eup %4323  ;;  %v1851_v37 = vmul.f32 0.044715, %v1723_v6  ;;  %v1727_v59 = vmul.f32 %v1599_v26, %v5718_v61  ;;  %v1453_v40 = vpop.f32.mrf.mxu0 }
 0x289   : > { %v2110_v9 = vmul.f32 0.7978846, %v1982_v3  ;;  %7241 = vst [vmem:[#allocation78_spill] sm:$0xff] %v5751_v53  ;;  %4339 = vtanh.f32 %v2103_v20  ;;  %v2329_v7 = vadd.f32 1.0, %v5552_v52  ;;  %v1977_v21 = vadd.f32 %v1849_v34, %v5684_v12  ;;  %v1262_v12 = vpop.f32.mrf.mxu1 }
 0x28a   : > { %4341 = vtanh.f32 %v2108_v35  ;;  %v1730_v25 = vmul.f32 %v1602_v0, %v5741_v18  ;;  %v2333_v4 = vadd.f32 1.0, %v5575_v41  ;;  %v5758_v3 = vpop.eup %4325  ;;  %v1853_v62 = vmul.f32 0.044715, %v1725_v8 }
 0x28b   : > { %v1856_v14 = vmul.f32 0.044715, %v1728_v24  ;;  %v2457_v53 = vmul.f32 0.5, %v2329_v7  ;;  %v2331_v20 = vadd.f32 1.0, %v5559_v39  ;;  %v2714_v6 = vpack.c.bf16 %v5676_v13, %v5540_v55  ;;  %v1455_v55 = vpop.f32.mrf.mxu0 }
 0x28c   : > { %4343 = vtanh.f32 %v2110_v9  ;;  %v2461_v52 = vmul.f32 0.5, %v2333_v4  ;;  %v2335_v26 = vadd.f32 1.0, %v5582_v43  ;;  %v1979_v34 = vadd.f32 %v1851_v37, %v5692_v27 }
 0x28d   : > { %v1855_v35 = vmul.f32 0.044715, %v1727_v59  ;;  %v1858_v0 = vmul.f32 0.044715, %v1730_v25  ;;  %v2459_v41 = vmul.f32 0.5, %v2331_v20  ;;  %v5765_v48 = vpop.eup %4327  ;;  %v2585_v8 = vmul.f32 %v2457_v53, %v5417_v49 }
 0x28e   : > { %v2589_v24 = vmul.f32 %v2461_v52, %v5440_v63  ;;  %v2463_v39 = vmul.f32 0.5, %v2335_v26  ;;  %v5770_v7 = vadd.f32 %v1260_v31, %v5402_v33  ;;  %v2105_v13 = vmul.f32 0.7978846, %v1977_v21 }
 0x28f   : > { %v1981_v43 = vadd.f32 %v1853_v62, %v5710_v51  ;;  %v1984_v9 = vadd.f32 %v1856_v14, %v5727_v29  ;;  %v5775_v37 = vadd.f32 %v1453_v40, %v5404_v23  ;;  %v4330_v59 = vpop.eup %4329  ;;  %v2587_v4 = vmul.f32 %v2459_v41, %v5420_v50  ;;  %v1264_v62 = vpop.f32.mrf.mxu1 }
 0x290   : > { %7242 = vst [vmem:[#allocation79_spill] sm:$0xff] %v5770_v7  ;;  %v2713_v25 = vpack.c.bf16 %v2589_v24, %v2585_v8  ;;  %v2591_v49 = vmul.f32 %v2463_v39, %v5443_v47  ;;  %v1601_v63 = vmul.f32 %v5770_v7, %v5770_v7  ;;  %v5781_v53 = vpop.eup %4331  ;;  %v2107_v31 = vmul.f32 0.7978846, %v1979_v34  ;;  %v1457_v24 = vpop.f32.mrf.mxu0 }
 0x291   : > { %7243 = vst [vmem:[#allocation80_spill] sm:$0xff] %v5775_v37  ;;  %v1603_v21 = vmul.f32 %v5775_v37, %v5775_v37  ;;  %v5786_v14 = vadd.f32 %v1262_v12, %v5398_v17  ;;  %v5789_v40 = vadd.f32 %v1455_v55, %v5400_v32  ;;  %v1983_v50 = vadd.f32 %v1855_v35, %v5718_v61 }
 0x292   : > { %v1986_v47 = vadd.f32 %v1858_v0, %v5741_v18  ;;  %3068 = vmatprep.mubr.bf16.mxu1 %v2713_v25  ;;  %v2715_v20 = vpack.c.bf16 %v2591_v49, %v2587_v4  ;;  %v1729_v52 = vmul.f32 %v1601_v63, %v5770_v7  ;;  %v4334_v26 = vpop.eup %4333  ;;  %v2360_v34 = vadd.f32 1.0, %v4330_v59  ;;  %v1268_v49 = vpop.f32.mrf.mxu1 }
 0x293   : > { %v1731_v41 = vmul.f32 %v1603_v21, %v5775_v37  ;;  %3069 = vmatmul.mubr.bf16.vlgmr.msra.gmra.mxu1 %v2712_v46  ;;  %v1604_v12 = vmul.f32 %v5786_v14, %v5786_v14  ;;  %v1606_v8 = vmul.f32 %v5789_v40, %v5789_v40  ;;  %v5799_v39 = vpop.eup %4335  ;;  %4345 = vtanh.f32 %v2105_v13 }
 0x294   : > { %v2109_v35 = vmul.f32 0.7978846, %v1981_v43  ;;  %v2112_v0 = vmul.f32 0.7978846, %v1984_v9  ;;  %3229 = vmatprep.mubr.bf16.mxu0 %v2715_v20  ;;  %v1857_v25 = vmul.f32 0.044715, %v1729_v52  ;;  %v5806_v4 = vadd.f32 %v1264_v62, %v5402_v33 }
 0x295   : > { %v5801_v55 = vpop.eup %4337  ;;  %3230 = vmatmul.mubr.bf16.vlgmr.msra.gmra.mxu0 %v2714_v6  ;;  %v1732_v59 = vmul.f32 %v1604_v12, %v5786_v14  ;;  %v1734_v46 = vmul.f32 %v1606_v8, %v5789_v40  ;;  %v2362_v21 = vadd.f32 1.0, %v4334_v26  ;;  %v2111_v61 = vmul.f32 0.7978846, %v1983_v50 }
 0x296   : > { %7244 = vst [vmem:[#allocation81_spill] sm:$0xff] %v5806_v4  ;;  %v5808_v63 = vpop.eup %4339  ;;  %v2114_v13 = vmul.f32 0.7978846, %v1986_v47  ;;  %v5811_v43 = vadd.f32 %v1457_v24, %v5404_v23  ;;  %v2488_v20 = vmul.f32 0.5, %v2360_v34  ;;  %4347 = vtanh.f32 %v2107_v31  ;;  %v1461_v34 = vpop.f32.mrf.mxu0 }
 0x297   : > { %v4342_v9 = vpop.eup %4341  ;;  %v1859_v6 = vmul.f32 0.044715, %v1731_v41  ;;  %v1860_v52 = vmul.f32 0.044715, %v1732_v59  ;;  %4349 = vtanh.f32 %v2109_v35  ;;  %v1862_v12 = vmul.f32 0.044715, %v1734_v46 }
 0x298   : > { %7245 = vst [vmem:[#allocation82_spill] sm:$0xff] %v5811_v43  ;;  %v5814_v8 = vadd.f32 %v1268_v49, %v5398_v17  ;;  %4351 = vtanh.f32 %v2112_v0  ;;  %v1985_v27 = vadd.f32 %v1857_v25, %v5770_v7  ;;  %v1605_v47 = vmul.f32 %v5806_v4, %v5806_v4 }
 0x299   : > { %v4344_v62 = vpop.eup %4343  ;;  %v1988_v50 = vadd.f32 %v1860_v52, %v5786_v14  ;;  %v2490_v26 = vmul.f32 0.5, %v2362_v21  ;;  %v2364_v24 = vadd.f32 1.0, %v4342_v9  ;;  %4353 = vtanh.f32 %v2111_v61 }
 0x29a   : > { %v1607_v31 = vmul.f32 %v5811_v43, %v5811_v43  ;;  %v5823_v41 = vmul.f32 %v2488_v20, %v5651_v38  ;;  %4355 = vtanh.f32 %v2114_v13  ;;  %v1987_v35 = vadd.f32 %v1859_v6, %v5775_v37 }
 0x29b   : > { %v2366_v0 = vadd.f32 1.0, %v4344_v62  ;;  %v2116_v25 = vmul.f32 0.7978846, %v1988_v50  ;;  %v1990_v59 = vadd.f32 %v1862_v12, %v5789_v40  ;;  %v1608_v46 = vmul.f32 %v5814_v8, %v5814_v8 }
 0x29c   : > { %v2113_v49 = vmul.f32 0.7978846, %v1985_v27  ;;  %v1733_v61 = vmul.f32 %v1605_v47, %v5806_v4  ;;  %v5831_v21 = vadd.f32 %v1461_v34, %v5400_v32  ;;  %v2337_v9 = vadd.f32 1.0, %v5596_v44  ;;  %v1270_v34 = vpop.f32.mrf.mxu1 }
 0x29d   : > { %v5835_v38 = vmul.f32 %v2490_v26, %v5664_v45  ;;  %v2492_v13 = vmul.f32 0.5, %v2364_v24  ;;  %v1735_v20 = vmul.f32 %v1607_v31, %v5811_v43  ;;  %v1736_v6 = vmul.f32 %v1608_v46, %v5814_v8  ;;  %v1463_v46 = vpop.f32.mrf.mxu0 }
 0x29e   : > { %v2115_v52 = vmul.f32 0.7978846, %v1987_v35  ;;  %v1610_v12 = vmul.f32 %v5831_v21, %v5831_v21  ;;  %v2341_v27 = vadd.f32 1.0, %v5654_v1  ;;  %v2465_v62 = vmul.f32 0.5, %v2337_v9 }
 0x29f   : > { %4357 = vtanh.f32 %v2116_v25  ;;  %v2118_v50 = vmul.f32 0.7978846, %v1990_v59  ;;  %v1864_v47 = vmul.f32 0.044715, %v1736_v6  ;;  %v2339_v44 = vadd.f32 1.0, %v5600_v28 }
 0x2a0   : > { %v5843_v45 = vpop.eup %4345  ;;  %v2494_v26 = vmul.f32 0.5, %v2366_v0  ;;  %4359 = vtanh.f32 %v2113_v49  ;;  %v1861_v24 = vmul.f32 0.044715, %v1733_v61  ;;  %v2469_v31 = vmul.f32 0.5, %v2341_v27 }
 0x2a1   : > { %v1863_v35 = vmul.f32 0.044715, %v1735_v20  ;;  %v1992_v37 = vadd.f32 %v1864_v47, %v5814_v8  ;;  %v1738_v7 = vmul.f32 %v1610_v12, %v5831_v21  ;;  %v2343_v1 = vadd.f32 1.0, %v5659_v11  ;;  %v1272_v47 = vpop.f32.mrf.mxu1 }
 0x2a2   : > { %v2593_v25 = vmul.f32 %v2465_v62, %v5470_v58  ;;  %v2597_v59 = vmul.f32 %v2469_v31, %v5495_v54  ;;  %v2467_v28 = vmul.f32 0.5, %v2339_v44  ;;  %v5851_v9 = vadd.f32 %v1270_v34, %v5402_v33  ;;  %v1465_v44 = vpop.f32.mrf.mxu0 }
 0x2a3   : > { %v5853_v0 = vpop.eup %4347  ;;  %4361 = vtanh.f32 %v2118_v50  ;;  %v2120_v49 = vmul.f32 0.7978846, %v1992_v37  ;;  %v2471_v61 = vmul.f32 0.5, %v2343_v1  ;;  %v5856_v20 = vadd.f32 %v1463_v46, %v5404_v23 }
 0x2a4   : > { %7246 = vst [vmem:[#allocation83_spill] sm:$0xff] %v5851_v9  ;;  %v5858_v6 = vpop.eup %4349  ;;  %v5861_v11 = vmul.f32 %v2492_v13, %v5695_v19  ;;  %4363 = vtanh.f32 %v2115_v52  ;;  %v1989_v54 = vadd.f32 %v1861_v24, %v5806_v4  ;;  %v2717_v58 = vpack.c.bf16 %v2597_v59, %v2593_v25 }
 0x2a5   : > { %7247 = vst [vmem:[#allocation84_spill] sm:$0xff] %v5856_v20  ;;  %v4352_v12 = vpop.eup %4351  ;;  %v1866_v27 = vmul.f32 0.044715, %v1738_v7  ;;  %v2595_v62 = vmul.f32 %v2467_v28, %v5474_v30  ;;  %v2599_v50 = vmul.f32 %v2471_v61, %v5501_v16  ;;  %v2336_v37 = vadd.f32 1.0, %v5586_v10  ;;  %v1467_v61 = vpop.f32.mrf.mxu0 }
 0x2a6   : > { %v5867_v34 = vpop.eup %4353  ;;  %4365 = vtanh.f32 %v2120_v49  ;;  %3076 = vmatprep.mubr.bf16.mxu1 %v2717_v58  ;;  %v1609_v19 = vmul.f32 %v5851_v9, %v5851_v9  ;;  %v2340_v13 = vadd.f32 1.0, %v5614_v22  ;;  %v2338_v52 = vadd.f32 1.0, %v5591_v15  ;;  %v1274_v49 = vpop.f32.mrf.mxu1 }
 0x2a7   : > { %v4356_v7 = vpop.eup %4355  ;;  %v2719_v24 = vpack.c.bf16 %v2599_v50, %v2595_v62  ;;  %v1611_v30 = vmul.f32 %v5856_v20, %v5856_v20  ;;  %v2464_v16 = vmul.f32 0.5, %v2336_v37  ;;  %v2342_v10 = vadd.f32 1.0, %v5645_v57 }
 0x2a8   : > { %v2368_v31 = vadd.f32 1.0, %v4352_v12  ;;  %v1991_v46 = vadd.f32 %v1863_v35, %v5811_v43  ;;  %v2468_v1 = vmul.f32 0.5, %v2340_v13  ;;  %v2466_v25 = vmul.f32 0.5, %v2338_v52 }
 0x2a9   : > { %v5878_v59 = vmul.f32 %v2494_v26, %v5700_v42  ;;  %v2117_v28 = vmul.f32 0.7978846, %v1989_v54  ;;  %3237 = vmatprep.mubr.bf16.mxu0 %v2719_v24  ;;  %v2470_v22 = vmul.f32 0.5, %v2342_v10  ;;  %v5881_v15 = vadd.f32 %v1272_v47, %v5398_v17  ;;  %v1471_v24 = vpop.f32.mrf.mxu0 }
 0x2aa   : > { %v1994_v58 = vadd.f32 %v1866_v27, %v5831_v21  ;;  %v1737_v57 = vmul.f32 %v1609_v19, %v5851_v9  ;;  %v2592_v12 = vmul.f32 %v2464_v16, %v5456_v56  ;;  %v2596_v35 = vmul.f32 %v2468_v1, %v5477_v5 }
 0x2ab   : > { %v1739_v62 = vmul.f32 %v1611_v30, %v5856_v20  ;;  %v2594_v42 = vmul.f32 %v2466_v25, %v5464_v2  ;;  %v2598_v26 = vmul.f32 %v2470_v22, %v5489_v60  ;;  %v1612_v54 = vmul.f32 %v5881_v15, %v5881_v15  ;;  %v1278_v2 = vpop.f32.mrf.mxu1 }
 0x2ac   : > { %v4358_v50 = vpop.eup %4357  ;;  %v2496_v37 = vmul.f32 0.5, %v2368_v31  ;;  %v2119_v47 = vmul.f32 0.7978846, %v1991_v46  ;;  %v2716_v13 = vpack.c.bf16 %v2596_v35, %v2592_v12  ;;  %v5893_v27 = vadd.f32 %v1465_v44, %v5400_v32  ;;  %v7250_v35 = vld [vmem:[#allocation75_spill] sm:$0xff] }
 0x2ad   : > { %v5895_v19 = vpop.eup %4359  ;;  %v2370_v56 = vadd.f32 1.0, %v4356_v7  ;;  %4367 = vtanh.f32 %v2117_v28  ;;  %v2718_v5 = vpack.c.bf16 %v2598_v26, %v2594_v42  ;;  %v1740_v52 = vmul.f32 %v1612_v54, %v5881_v15 }
 0x2ae   : > { %v2122_v60 = vmul.f32 0.7978846, %v1994_v58  ;;  %v1865_v30 = vmul.f32 0.044715, %v1737_v57  ;;  %3077 = vmatmul.mubr.bf16.gmra.mxu1 %v2716_v13  ;;  %v1614_v16 = vmul.f32 %v5893_v27, %v5893_v27  ;;  %v5901_v10 = vadd.f32 %v1274_v49, %v5402_v33 }
 0x2af   : > { %v2372_v44 = vadd.f32 1.0, %v4358_v50  ;;  %v1867_v31 = vmul.f32 0.044715, %v1739_v62  ;;  %3238 = vmatmul.mubr.bf16.gmra.mxu0 %v2718_v5  ;;  %v1868_v46 = vmul.f32 0.044715, %v1740_v52  ;;  %v5904_v7 = vadd.f32 %v1467_v61, %v5404_v23 }
 0x2b0   : > { %7248 = vst [vmem:[#allocation85_spill] sm:$0xff] %v5901_v10  ;;  %v4362_v1 = vpop.eup %4361  ;;  %v1742_v25 = vmul.f32 %v1614_v16, %v5893_v27  ;;  %v1613_v28 = vmul.f32 %v5901_v10, %v5901_v10  ;;  %v5910_v22 = vadd.f32 %v1278_v2, %v5398_v17  ;;  %v5913_v58 = vadd.f32 %v1471_v24, %v5400_v32 }
 0x2b1   : > { %7249 = vst [vmem:[#allocation86_spill] sm:$0xff] %v5904_v7  ;;  %v5915_v49 = vpop.eup %4363  ;;  %v1996_v57 = vadd.f32 %v1868_v46, %v5881_v15  ;;  %v1615_v61 = vmul.f32 %v5904_v7, %v5904_v7  ;;  %v2345_v12 = vadd.f32 1.0, %v5680_v36  ;;  %v2349_v62 = vadd.f32 1.0, %v7250_v35 }
 0x2b2   : > { %v2498_v42 = vmul.f32 0.5, %v2370_v56  ;;  %v1993_v26 = vadd.f32 %v1865_v30, %v5851_v9  ;;  %v1870_v54 = vmul.f32 0.044715, %v1742_v25  ;;  %v1741_v50 = vmul.f32 %v1613_v28, %v5901_v10  ;;  %v7266_v9 = vld [vmem:[#allocation51_spill] sm:$0xff] }
 0x2b3   : > { %v4366_v13 = vpop.eup %4365  ;;  %v2374_v5 = vadd.f32 1.0, %v4362_v1  ;;  %4369 = vtanh.f32 %v2122_v60  ;;  %v2124_v52 = vmul.f32 0.7978846, %v1996_v57  ;;  %v1616_v2 = vmul.f32 %v5910_v22, %v5910_v22 }
 0x2b4   : > { %v2500_v24 = vmul.f32 0.5, %v2372_v44  ;;  %v1995_v16 = vadd.f32 %v1867_v31, %v5856_v20  ;;  %v1998_v36 = vadd.f32 %v1870_v54, %v5893_v27  ;;  %v1743_v46 = vmul.f32 %v1615_v61, %v5904_v7  ;;  %v7261_v20 = vld [vmem:[#allocation67_spill] sm:$0xff] }
 0x2b5   : > { %v5930_v56 = vmul.f32 %v2496_v37, %v5727_v29  ;;  %v1618_v30 = vmul.f32 %v5913_v58, %v5913_v58  ;;  %v2473_v25 = vmul.f32 0.5, %v2345_v12  ;;  %v2477_v1 = vmul.f32 0.5, %v2349_v62  ;;  %v1280_v62 = vpop.f32.mrf.mxu1 }
 0x2b6   : > { %4371 = vtanh.f32 %v2119_v47  ;;  %v2376_v60 = vadd.f32 1.0, %v4366_v13  ;;  %v2121_v28 = vmul.f32 0.7978846, %v1993_v26  ;;  %v1869_v57 = vmul.f32 0.044715, %v1741_v50  ;;  %v7254_v26 = vld [vmem:[#allocation53_spill] sm:$0xff] }
 0x2b7   : > { %7251 = vst [vmem:[#allocation75_spill] sm:$0xff] %v5930_v56  ;;  %v5935_v44 = vmul.f32 %v2498_v42, %v5741_v18  ;;  %4373 = vtanh.f32 %v2124_v52  ;;  %v2126_v31 = vmul.f32 0.7978846, %v1998_v36  ;;  %v1744_v35 = vmul.f32 %v1616_v2, %v5910_v22  ;;  %v7255_v50 = vld [vmem:[#allocation57_spill] sm:$0xff]  ;;  %v7256_v42 = vld [vmem:[#allocation70_spill] sm:$0xff]  ;;  %v1473_v52 = vpop.f32.mrf.mxu0 }
 0x2b8   : > { %v5939_v61 = vmul.f32 %v2500_v24, %v5786_v14  ;;  %v5941_v29 = vmul.f32 0.5, %v2374_v5  ;;  %v5943_v37 = vmul.f32 0.7978846, %v1995_v16  ;;  %v1871_v12 = vmul.f32 0.044715, %v1743_v46  ;;  %v7257_v5 = vld [vmem:[#allocation76_spill] sm:$0xff] }
 0x2b9   : > { %7252 = vst [vmem:[#allocation87_spill] sm:$0xff] %v5935_v44  ;;  %v1746_v47 = vmul.f32 %v1618_v30, %v5913_v58  ;;  %v2601_v54 = vmul.f32 %v2473_v25, %v7254_v26  ;;  %v2605_v18 = vmul.f32 %v2477_v1, %v7255_v50  ;;  %v2347_v13 = vadd.f32 1.0, %v7256_v42 }
 0x2ba   : > { %7253 = vst [vmem:[#allocation88_spill] sm:$0xff] %v5939_v61  ;;  %v5949_v36 = vpop.eup %4367  ;;  %v5951_v2 = vmul.f32 0.5, %v2376_v60  ;;  %4375 = vtanh.f32 %v2121_v28  ;;  %v1997_v14 = vadd.f32 %v1869_v57, %v5901_v10  ;;  %v2351_v24 = vadd.f32 1.0, %v7257_v5  ;;  %v1282_v60 = vpop.f32.mrf.mxu1  ;;  %v7260_v28 = vld [vmem:[#allocation54_spill] sm:$0xff]  ;;  %v7267_v61 = vld [vmem:[#allocation55_spill] sm:$0xff] }
 0x2bb   : > { %4377 = vtanh.f32 %v2126_v31  ;;  %v1872_v16 = vmul.f32 0.044715, %v1744_v35  ;;  %v2721_v46 = vpack.c.bf16 %v2605_v18, %v2601_v54  ;;  %v2475_v30 = vmul.f32 0.5, %v2347_v13  ;;  %v7262_v31 = vld [vmem:[#allocation72_spill] sm:$0xff]  ;;  %v7263_v54 = vld [vmem:[#allocation58_spill] sm:$0xff] }
 0x2bc   : > { %v1999_v25 = vadd.f32 %v1871_v12, %v5904_v7  ;;  %v2479_v26 = vmul.f32 0.5, %v2351_v24  ;;  %v5957_v1 = vadd.f32 %v1280_v62, %v5402_v33  ;;  %v5960_v50 = vadd.f32 %v1473_v52, %v5404_v23  ;;  %v7264_v13 = vld [vmem:[#allocation68_spill] sm:$0xff] }
 0x2bd   : > { %v1874_v42 = vmul.f32 0.044715, %v1746_v47  ;;  %3084 = vmatprep.mubr.bf16.mxu1 %v2721_v46  ;;  %v2603_v57 = vmul.f32 %v2475_v30, %v7260_v28  ;;  %v2344_v5 = vadd.f32 1.0, %v7261_v20  ;;  %v2348_v35 = vadd.f32 1.0, %v7262_v31  ;;  %v7265_v47 = vld [vmem:[#allocation74_spill] sm:$0xff]  ;;  %v1475_v20 = vpop.f32.mrf.mxu0 }
 0x2be   : > { %7258 = vst [vmem:[#allocation53_spill] sm:$0xff] %v5957_v1  ;;  %7259 = vst [vmem:[#allocation57_spill] sm:$0xff] %v5960_v50  ;;  %v2607_v18 = vmul.f32 %v2479_v26, %v7263_v54  ;;  %v1617_v12 = vmul.f32 %v5957_v1, %v5957_v1  ;;  %v1619_v62 = vmul.f32 %v5960_v50, %v5960_v50  ;;  %v2346_v52 = vadd.f32 1.0, %v7264_v13 }
 0x2bf   : > { %v2472_v24 = vmul.f32 0.5, %v2344_v5  ;;  %v2476_v7 = vmul.f32 0.5, %v2348_v35  ;;  %v2350_v46 = vadd.f32 1.0, %v7265_v47  ;;  %v5973_v30 = vadd.f32 %v1282_v60, %v5398_v17  ;;  %v1284_v35 = vpop.f32.mrf.mxu1 }
 0x2c0   : > { %v4370_v28 = vpop.eup %4369  ;;  %v2723_v31 = vpack.c.bf16 %v2607_v18, %v2603_v57  ;;  %v1745_v26 = vmul.f32 %v1617_v12, %v5957_v1  ;;  %v1747_v54 = vmul.f32 %v1619_v62, %v5960_v50  ;;  %v2474_v10 = vmul.f32 0.5, %v2346_v52  ;;  %v7268_v62 = vld [vmem:[#allocation52_spill] sm:$0xff] }
 0x2c1   : > { %v2600_v44 = vmul.f32 %v2472_v24, %v7266_v9  ;;  %v2604_v56 = vmul.f32 %v2476_v7, %v7267_v61  ;;  %v2478_v13 = vmul.f32 0.5, %v2350_v46  ;;  %v1620_v5 = vmul.f32 %v5973_v30, %v5973_v30  ;;  %v7269_v52 = vld [vmem:[#allocation56_spill] sm:$0xff] }
 0x2c2   : > { %v2000_v60 = vadd.f32 %v1872_v16, %v5910_v22  ;;  %3245 = vmatprep.mubr.bf16.mxu0 %v2723_v31  ;;  %v1873_v47 = vmul.f32 0.044715, %v1745_v26  ;;  %v1875_v43 = vmul.f32 0.044715, %v1747_v54  ;;  %v5983_v57 = vadd.f32 %v1475_v20, %v5400_v32 }
 0x2c3   : > { %v5985_v18 = vpop.eup %4371  ;;  %v2720_v12 = vpack.c.bf16 %v2604_v56, %v2600_v44  ;;  %v2602_v9 = vmul.f32 %v2474_v10, %v7268_v62  ;;  %v2606_v7 = vmul.f32 %v2478_v13, %v7269_v52  ;;  %v1748_v61 = vmul.f32 %v1620_v5, %v5973_v30  ;;  %v1477_v10 = vpop.f32.mrf.mxu0 }
 0x2c4   : > { %v4374_v24 = vpop.eup %4373  ;;  %v2378_v46 = vadd.f32 1.0, %v4370_v28  ;;  %v2125_v4 = vmul.f32 0.7978846, %v1997_v14  ;;  %v2002_v16 = vadd.f32 %v1874_v42, %v5913_v58  ;;  %v1622_v31 = vmul.f32 %v5983_v57, %v5983_v57  ;;  %v1288_v44 = vpop.f32.mrf.mxu1 }
 0x2c5   : > { %v2001_v20 = vadd.f32 %v1873_v47, %v5957_v1  ;;  %3085 = vmatmul.mubr.bf16.gmra.mxu1 %v2720_v12  ;;  %v2722_v26 = vpack.c.bf16 %v2606_v7, %v2602_v9  ;;  %v1876_v54 = vmul.f32 0.044715, %v1748_v61  ;;  %v5995_v56 = vadd.f32 %v1284_v35, %v5402_v33  ;;  %v1481_v52 = vpop.f32.mrf.mxu0 }
 0x2c6   : > { %v5999_v13 = vmul.f32 %v5941_v29, %v5789_v40  ;;  %4379 = vtanh.f32 %v5943_v37  ;;  %v2127_v14 = vmul.f32 0.7978846, %v1999_v25  ;;  %v1750_v42 = vmul.f32 %v1622_v31, %v5983_v57 }
 0x2c7   : > { %7270 = vst [vmem:[#allocation70_spill] sm:$0xff] %v5995_v56  ;;  %v6003_v28 = vpop.eup %4375  ;;  %v2380_v5 = vadd.f32 1.0, %v4374_v24  ;;  %v2128_v47 = vmul.f32 0.7978846, %v2000_v60  ;;  %v2003_v12 = vadd.f32 %v1875_v43, %v5960_v50  ;;  %3246 = vmatmul.mubr.bf16.gmra.mxu0 %v2722_v26  ;;  %v2004_v35 = vadd.f32 %v1876_v54, %v5973_v30 }
 0x2c8   : > { %v4378_v62 = vpop.eup %4377  ;;  %v6009_v9 = vmul.f32 %v5951_v2, %v5814_v8  ;;  %v2506_v40 = vmul.f32 0.5, %v2378_v46  ;;  %v2130_v29 = vmul.f32 0.7978846, %v2002_v16  ;;  %v6012_v37 = vadd.f32 %v1288_v44, %v5398_v17 }
 0x2c9   : > { %4381 = vtanh.f32 %v2125_v4  ;;  %v2129_v25 = vmul.f32 0.7978846, %v2001_v20  ;;  %v1621_v60 = vmul.f32 %v5995_v56, %v5995_v56  ;;  %v6017_v43 = vadd.f32 %v1477_v10, %v5404_v23 }
 0x2ca   : > { %4383 = vtanh.f32 %v2127_v14  ;;  %v2132_v7 = vmul.f32 0.7978846, %v2004_v35  ;;  %v1878_v61 = vmul.f32 0.044715, %v1750_v42  ;;  %v1624_v8 = vmul.f32 %v6012_v37, %v6012_v37  ;;  %v1290_v14 = vpop.f32.mrf.mxu1 }
 0x2cb   : > { %7271 = vst [vmem:[#allocation76_spill] sm:$0xff] %v6017_v43  ;;  %v2508_v2 = vmul.f32 0.5, %v2380_v5  ;;  %v2382_v24 = vadd.f32 1.0, %v4378_v62  ;;  %4385 = vtanh.f32 %v2128_v47  ;;  %v2131_v46 = vmul.f32 0.7978846, %v2003_v12 }
 0x2cc   : > { %v6022_v4 = vmul.f32 %v2506_v40, %v5831_v21  ;;  %4387 = vtanh.f32 %v2130_v29  ;;  %v1752_v16 = vmul.f32 %v1624_v8, %v6012_v37  ;;  %v6026_v31 = vadd.f32 %v1481_v52, %v5400_v32  ;;  %v1483_v40 = vpop.f32.mrf.mxu0 }
 0x2cd   : > { %4389 = vtanh.f32 %v2129_v25  ;;  %v1749_v20 = vmul.f32 %v1621_v60, %v5995_v56  ;;  %v1623_v26 = vmul.f32 %v6017_v43, %v6017_v43  ;;  %v2353_v54 = vadd.f32 1.0, %v5758_v3 }
 0x2ce   : > { %4391 = vtanh.f32 %v2132_v7  ;;  %v2006_v10 = vadd.f32 %v1878_v61, %v5983_v57  ;;  %v1880_v44 = vmul.f32 0.044715, %v1752_v16  ;;  %v1626_v21 = vmul.f32 %v6026_v31, %v6026_v31 }
 0x2cf   : > { %v6036_v42 = vmul.f32 %v2508_v2, %v5881_v15  ;;  %v2510_v5 = vmul.f32 0.5, %v2382_v24  ;;  %4393 = vtanh.f32 %v2131_v46  ;;  %v2357_v47 = vadd.f32 1.0, %v5801_v55  ;;  %v7273_v55 = vld [vmem:[#allocation61_spill] sm:$0xff] }
 0x2d0   : > { %v2008_v12 = vadd.f32 %v1880_v44, %v6012_v37  ;;  %v1754_v35 = vmul.f32 %v1626_v21, %v6026_v31  ;;  %v2481_v3 = vmul.f32 0.5, %v2353_v54  ;;  %v2355_v62 = vadd.f32 1.0, %v5765_v48  ;;  %v7274_v24 = vld [vmem:[#allocation65_spill] sm:$0xff]  ;;  %v1292_v21 = vpop.f32.mrf.mxu1 }
 0x2d1   : > { %v1751_v29 = vmul.f32 %v1623_v26, %v6017_v43  ;;  %v2485_v25 = vmul.f32 0.5, %v2357_v47  ;;  %v2359_v60 = vadd.f32 1.0, %v5808_v63  ;;  %v6045_v15 = vadd.f32 %v1290_v14, %v5402_v33  ;;  %v1485_v14 = vpop.f32.mrf.mxu0 }
 0x2d2   : > { %v2134_v52 = vmul.f32 0.7978846, %v2006_v10  ;;  %v1877_v7 = vmul.f32 0.044715, %v1749_v20  ;;  %v1882_v61 = vmul.f32 0.044715, %v1754_v35  ;;  %v2609_v8 = vmul.f32 %v2481_v3, %v7273_v55 }
 0x2d3   : > { %7272 = vst [vmem:[#allocation54_spill] sm:$0xff] %v6045_v15  ;;  %v6048_v2 = vpop.eup %4379  ;;  %v2613_v46 = vmul.f32 %v2485_v25, %v7274_v24  ;;  %v2483_v16 = vmul.f32 0.5, %v2355_v62  ;;  %v2487_v48 = vmul.f32 0.5, %v2359_v60  ;;  %v1625_v26 = vmul.f32 %v6045_v15, %v6045_v15  ;;  %v7276_v10 = vld [vmem:[#allocation77_spill] sm:$0xff]  ;;  %v7277_v35 = vld [vmem:[#allocation62_spill] sm:$0xff] }
 0x2d4   : > { %v2136_v54 = vmul.f32 0.7978846, %v2008_v12  ;;  %v2010_v63 = vadd.f32 %v1882_v61, %v6026_v31  ;;  %v6055_v44 = vadd.f32 %v1483_v40, %v5404_v23  ;;  %v2352_v20 = vadd.f32 1.0, %v7276_v10  ;;  %v7278_v55 = vld [vmem:[#allocation66_spill] sm:$0xff] }
 0x2d5   : > { %v2725_v47 = vpack.c.bf16 %v2613_v46, %v2609_v8  ;;  %v2611_v3 = vmul.f32 %v2483_v16, %v7277_v35  ;;  %v2615_v25 = vmul.f32 %v2487_v48, %v7278_v55  ;;  %v1753_v62 = vmul.f32 %v1625_v26, %v6045_v15  ;;  %v7280_v46 = vld [vmem:[#allocation78_spill] sm:$0xff] }
 0x2d6   : > { %7275 = vst [vmem:[#allocation67_spill] sm:$0xff] %v6055_v44  ;;  %v6061_v60 = vpop.eup %4381  ;;  %v6064_v12 = vmul.f32 %v2510_v5, %v5893_v27  ;;  %4395 = vtanh.f32 %v2134_v52  ;;  %v2356_v40 = vadd.f32 1.0, %v5781_v53  ;;  %v2480_v61 = vmul.f32 0.5, %v2352_v20  ;;  %v1294_v5 = vpop.f32.mrf.mxu1 }
 0x2d7   : > { %v6067_v24 = vpop.eup %4383  ;;  %v2138_v10 = vmul.f32 0.7978846, %v2010_v63  ;;  %3092 = vmatprep.mubr.bf16.mxu1 %v2725_v47  ;;  %v2727_v8 = vpack.c.bf16 %v2615_v25, %v2611_v3  ;;  %v2354_v16 = vadd.f32 1.0, %v7280_v46  ;;  %v2358_v48 = vadd.f32 1.0, %v5799_v39  ;;  %v1487_v52 = vpop.f32.mrf.mxu0  ;;  %v7282_v25 = vld [vmem:[#allocation59_spill] sm:$0xff] }
 0x2d8   : > { %7279 = vst [vmem:[#allocation72_spill] sm:$0xff] %v6064_v12  ;;  %v4386_v35 = vpop.eup %4385  ;;  %v2005_v26 = vadd.f32 %v1877_v7, %v5995_v56  ;;  %v1879_v55 = vmul.f32 0.044715, %v1751_v29  ;;  %4397 = vtanh.f32 %v2136_v54  ;;  %v2484_v27 = vmul.f32 0.5, %v2356_v40  ;;  %v7283_v46 = vld [vmem:[#allocation63_spill] sm:$0xff]  ;;  %v7285_v56 = vld [vmem:[#allocation64_spill] sm:$0xff] }
 0x2d9   : > { %v4388_v50 = vpop.eup %4387  ;;  %3253 = vmatprep.mubr.bf16.mxu0 %v2727_v8  ;;  %v1881_v53 = vmul.f32 0.044715, %v1753_v62  ;;  %v1627_v63 = vmul.f32 %v6055_v44, %v6055_v44  ;;  %v2482_v20 = vmul.f32 0.5, %v2354_v16  ;;  %v2486_v47 = vmul.f32 0.5, %v2358_v48  ;;  %v7284_v62 = vld [vmem:[#allocation60_spill] sm:$0xff] }
 0x2da   : > { %v6074_v3 = vpop.eup %4389  ;;  %v2608_v39 = vmul.f32 %v2480_v61, %v7282_v25  ;;  %v2612_v1 = vmul.f32 %v2484_v27, %v7283_v46  ;;  %v6079_v29 = vadd.f32 %v1292_v21, %v5398_v17  ;;  %v6082_v7 = vadd.f32 %v1485_v14, %v5400_v32  ;;  %v1298_v27 = vpop.f32.mrf.mxu1 }
 0x2db   : > { %7281 = vst [vmem:[#allocation58_spill] sm:$0xff] %v6074_v3  ;;  %v4392_v54 = vpop.eup %4391  ;;  %v2384_v40 = vadd.f32 1.0, %v4386_v35  ;;  %4399 = vtanh.f32 %v2138_v10  ;;  %v2610_v8 = vmul.f32 %v2482_v20, %v7284_v62  ;;  %v2614_v16 = vmul.f32 %v2486_v47, %v7285_v56  ;;  %v1491_v46 = vpop.f32.mrf.mxu0 }
 0x2dc   : > { %v6086_v48 = vpop.eup %4393  ;;  %v2386_v3 = vadd.f32 1.0, %v4388_v50  ;;  %v2007_v61 = vadd.f32 %v1879_v55, %v6017_v43  ;;  %v2724_v25 = vpack.c.bf16 %v2612_v1, %v2608_v39  ;;  %v1628_v21 = vmul.f32 %v6079_v29, %v6079_v29 }
 0x2dd   : > { %7286 = vst [vmem:[#allocation68_spill] sm:$0xff] %v6086_v48  ;;  %v2133_v14 = vmul.f32 0.7978846, %v2005_v26  ;;  %v1755_v12 = vmul.f32 %v1627_v63, %v6055_v44  ;;  %v2726_v35 = vpack.c.bf16 %v2614_v16, %v2610_v8  ;;  %v1630_v10 = vmul.f32 %v6082_v7, %v6082_v7 }
 0x2de   : > { %v2388_v20 = vadd.f32 1.0, %v4392_v54  ;;  %v2009_v56 = vadd.f32 %v1881_v53, %v6045_v15  ;;  %3093 = vmatmul.mubr.bf16.gmra.mxu1 %v2724_v25  ;;  %v1756_v50 = vmul.f32 %v1628_v21, %v6079_v29  ;;  %v6097_v1 = vadd.f32 %v1294_v5, %v5402_v33  ;;  %v1300_v25 = vpop.f32.mrf.mxu1 }
 0x2df   : > { %3254 = vmatmul.mubr.bf16.gmra.mxu0 %v2726_v35  ;;  %v1758_v55 = vmul.f32 %v1630_v10, %v6082_v7  ;;  %v6101_v26 = vadd.f32 %v1487_v52, %v5404_v23  ;;  %v6104_v63 = vadd.f32 %v1298_v27, %v5398_v17  ;;  %v6107_v47 = vadd.f32 %v1491_v46, %v5400_v32 }
 0x2e0   : > { %7287 = vst [vmem:[#allocation74_spill] sm:$0xff] %v6097_v1  ;;  %v2512_v39 = vmul.f32 0.5, %v2384_v40  ;;  %v2514_v53 = vmul.f32 0.5, %v2386_v3  ;;  %v1884_v54 = vmul.f32 0.044715, %v1756_v50  ;;  %v1629_v62 = vmul.f32 %v6097_v1, %v6097_v1 }
 0x2e1   : > { %7288 = vst [vmem:[#allocation51_spill] sm:$0xff] %v6101_v26  ;;  %v2135_v5 = vmul.f32 0.7978846, %v2007_v61  ;;  %v1886_v8 = vmul.f32 0.044715, %v1758_v55  ;;  %v1632_v16 = vmul.f32 %v6104_v63, %v6104_v63  ;;  %v1634_v52 = vmul.f32 %v6107_v47, %v6107_v47 }
 0x2e2   : > { %4401 = vtanh.f32 %v2133_v14  ;;  %v2137_v21 = vmul.f32 0.7978846, %v2009_v56  ;;  %v1883_v27 = vmul.f32 0.044715, %v1755_v12  ;;  %v2012_v46 = vadd.f32 %v1884_v54, %v6079_v29  ;;  %v1493_v56 = vpop.f32.mrf.mxu0 }
 0x2e3   : > { %v4396_v40 = vpop.eup %4395  ;;  %v2516_v3 = vmul.f32 0.5, %v2388_v20  ;;  %v2014_v35 = vadd.f32 %v1886_v8, %v6082_v7  ;;  %v1631_v61 = vmul.f32 %v6101_v26, %v6101_v26  ;;  %v1760_v10 = vmul.f32 %v1632_v16, %v6104_v63  ;;  %v1302_v8 = vpop.f32.mrf.mxu1 }
 0x2e4   : > { %v2140_v50 = vmul.f32 0.7978846, %v2012_v46  ;;  %v1757_v55 = vmul.f32 %v1629_v62, %v6097_v1  ;;  %v2361_v15 = vadd.f32 1.0, %v5843_v45  ;;  %v2365_v14 = vadd.f32 1.0, %v5858_v6 }
 0x2e5   : > { %v4398_v12 = vpop.eup %4397  ;;  %4403 = vtanh.f32 %v2135_v5  ;;  %v2142_v54 = vmul.f32 0.7978846, %v2014_v35  ;;  %v1888_v43 = vmul.f32 0.044715, %v1760_v10  ;;  %v1762_v20 = vmul.f32 %v1634_v52, %v6107_v47 }
 0x2e6   : > { %v6125_v48 = vmul.f32 %v2512_v39, %v5910_v22  ;;  %v6128_v16 = vmul.f32 %v2514_v53, %v5913_v58  ;;  %v2390_v46 = vadd.f32 1.0, %v4396_v40  ;;  %4405 = vtanh.f32 %v2137_v21  ;;  %v1495_v39 = vpop.f32.mrf.mxu0  ;;  %v1304_v21 = vpop.f32.mrf.mxu1 }
 0x2e7   : > { %v6131_v45 = vmul.f32 %v2516_v3, %v5973_v30  ;;  %v2011_v6 = vadd.f32 %v1883_v27, %v6055_v44  ;;  %4407 = vtanh.f32 %v2140_v50  ;;  %v1759_v62 = vmul.f32 %v1631_v61, %v6101_v26  ;;  %v7290_v3 = vld [vmem:[#allocation69_spill] sm:$0xff] }
 0x2e8   : > { %7289 = vst [vmem:[#allocation55_spill] sm:$0xff] %v6128_v16  ;;  %v4400_v5 = vpop.eup %4399  ;;  %v1885_v35 = vmul.f32 0.044715, %v1757_v55  ;;  %v2489_v52 = vmul.f32 0.5, %v2361_v15  ;;  %v2493_v10 = vmul.f32 0.5, %v2365_v14  ;;  %v6136_v22 = vadd.f32 %v1300_v25, %v5402_v33 }
 0x2e9   : > { %4409 = vtanh.f32 %v2142_v54  ;;  %v2016_v58 = vadd.f32 %v1888_v43, %v6104_v63  ;;  %v1890_v53 = vmul.f32 0.044715, %v1762_v20  ;;  %v2363_v30 = vadd.f32 1.0, %v5853_v0  ;;  %v1497_v20 = vpop.f32.mrf.mxu0 }
 0x2ea   : > { %v6140_v40 = vmul.f32 0.5, %v2390_v46  ;;  %v2392_v27 = vadd.f32 1.0, %v4398_v12  ;;  %v2617_v61 = vmul.f32 %v2489_v52, %v7290_v3  ;;  %v2621_v50 = vmul.f32 %v2493_v10, %v5710_v51 }
 0x2eb   : > { %v2394_v15 = vadd.f32 1.0, %v4400_v5  ;;  %v1887_v55 = vmul.f32 0.044715, %v1759_v62  ;;  %v2367_v25 = vadd.f32 1.0, %v5867_v34  ;;  %v2491_v14 = vmul.f32 0.5, %v2363_v30  ;;  %v1308_v62 = vpop.f32.mrf.mxu1  ;;  %v7292_v34 = vld [vmem:[#allocation71_spill] sm:$0xff] }
 0x2ec   : > { %v2013_v54 = vadd.f32 %v1885_v35, %v6097_v1  ;;  %v2729_v44 = vpack.c.bf16 %v2621_v50, %v2617_v61  ;;  %v1633_v43 = vmul.f32 %v6136_v22, %v6136_v22  ;;  %v6149_v0 = vadd.f32 %v1493_v56, %v5404_v23 }
 0x2ed   : > { %v2144_v12 = vmul.f32 0.7978846, %v2016_v58  ;;  %v2018_v46 = vadd.f32 %v1890_v53, %v6107_v47  ;;  %v2495_v52 = vmul.f32 0.5, %v2367_v25  ;;  %v2728_v51 = vpack.c.bf16 %v5861_v11, %v5823_v41  ;;  %v7293_v58 = vld [vmem:[#allocation73_spill] sm:$0xff] }
 0x2ee   : > { %7291 = vst [vmem:[#allocation52_spill] sm:$0xff] %v6149_v0  ;;  %3100 = vmatprep.mubr.bf16.mxu1 %v2729_v44  ;;  %v2619_v5 = vmul.f32 %v2491_v14, %v7292_v34  ;;  %v1761_v35 = vmul.f32 %v1633_v43, %v6136_v22  ;;  %v1635_v10 = vmul.f32 %v6149_v0, %v6149_v0 }
 0x2ef   : > { %v6159_v56 = vadd.f32 %v1302_v8, %v5398_v17  ;;  %v6161_v30 = vpop.eup %4401  ;;  %v2623_v53 = vmul.f32 %v2495_v52, %v7293_v58  ;;  %3101 = vmatmul.mubr.bf16.gmra.mxu1 %v2728_v51  ;;  %v6165_v3 = vadd.f32 %v1495_v39, %v5400_v32  ;;  %v6168_v41 = vadd.f32 %v1304_v21, %v5402_v33 }
 0x2f0   : > { %v6171_v11 = vadd.f32 %v1497_v20, %v5404_v23  ;;  %v2015_v44 = vadd.f32 %v1887_v55, %v6101_v26  ;;  %v1889_v61 = vmul.f32 0.044715, %v1761_v35  ;;  %v6177_v50 = vadd.f32 %v1308_v62, %v5398_v17  ;;  %v1501_v35 = vpop.f32.mrf.mxu0 }
 0x2f1   : > { %v1636_v8 = vmul.f32 %v6159_v56, %v6159_v56  ;;  %4411 = vtanh.f32 %v2144_v12  ;;  %v2731_v25 = vpack.c.bf16 %v2623_v53, %v2619_v5  ;;  %v1763_v39 = vmul.f32 %v1635_v10, %v6149_v0 }
 0x2f2   : > { %7294 = vst [vmem:[#allocation56_spill] sm:$0xff] %v6171_v11  ;;  %v1638_v21 = vmul.f32 %v6165_v3, %v6165_v3  ;;  %v6182_v14 = vpop.eup %4403  ;;  %v2730_v43 = vpack.c.bf16 %v5878_v59, %v5835_v38  ;;  %v1637_v20 = vmul.f32 %v6168_v41, %v6168_v41  ;;  %v1640_v52 = vmul.f32 %v6177_v50, %v6177_v50 }
 0x2f3   : > { %v1764_v55 = vmul.f32 %v1636_v8, %v6159_v56  ;;  %v6191_v12 = vpop.eup %4405  ;;  %v2139_v51 = vmul.f32 0.7978846, %v2011_v6  ;;  %v2146_v62 = vmul.f32 0.7978846, %v2018_v46  ;;  %3261 = vmatprep.mubr.bf16.mxu0 %v2731_v25  ;;  %v1639_v5 = vmul.f32 %v6171_v11, %v6171_v11 }
 0x2f4   : > { %7295 = vst [vmem:[#allocation61_spill] sm:$0xff] %v6191_v12  ;;  %v1766_v34 = vmul.f32 %v1638_v21, %v6165_v3  ;;  %v4408_v38 = vpop.eup %4407  ;;  %v2520_v59 = vmul.f32 0.5, %v2392_v27  ;;  %v2522_v10 = vmul.f32 0.5, %v2394_v15  ;;  %v2017_v58 = vadd.f32 %v1889_v61, %v6136_v22  ;;  %3262 = vmatmul.mubr.bf16.gmra.mxu0 %v2730_v43 }
 0x2f5   : > { %v1892_v53 = vmul.f32 0.044715, %v1764_v55  ;;  %v2141_v8 = vmul.f32 0.7978846, %v2013_v54  ;;  %v1891_v26 = vmul.f32 0.044715, %v1763_v39  ;;  %v1768_v6 = vmul.f32 %v1640_v52, %v6177_v50  ;;  %v1310_v54 = vpop.f32.mrf.mxu1 }
 0x2f6   : > { %v1894_v1 = vmul.f32 0.044715, %v1766_v34  ;;  %v4410_v46 = vpop.eup %4409  ;;  %v2143_v25 = vmul.f32 0.7978846, %v2015_v44  ;;  %v1765_v12 = vmul.f32 %v1637_v20, %v6168_v41  ;;  %v6201_v16 = vadd.f32 %v1501_v35, %v5400_v32 }
 0x2f7   : > { %v2020_v21 = vadd.f32 %v1892_v53, %v6159_v56  ;;  %v2396_v27 = vadd.f32 1.0, %v4408_v38  ;;  %4413 = vtanh.f32 %v2146_v62  ;;  %v1767_v61 = vmul.f32 %v1639_v5, %v6171_v11  ;;  %v1312_v38 = vpop.f32.mrf.mxu1 }
 0x2f8   : > { %v2022_v15 = vadd.f32 %v1894_v1, %v6165_v3  ;;  %4415 = vtanh.f32 %v2139_v51  ;;  %v2145_v39 = vmul.f32 0.7978846, %v2017_v58  ;;  %v1896_v55 = vmul.f32 0.044715, %v1768_v6 }
 0x2f9   : > { %v2148_v43 = vmul.f32 0.7978846, %v2020_v21  ;;  %v6207_v44 = vmul.f32 %v6140_v40, %v5983_v57  ;;  %v2398_v52 = vadd.f32 1.0, %v4410_v46  ;;  %4417 = vtanh.f32 %v2141_v8  ;;  %v1503_v40 = vpop.f32.mrf.mxu0 }
 0x2fa   : > { %v2019_v20 = vadd.f32 %v1891_v26, %v6149_v0  ;;  %v2150_v34 = vmul.f32 0.7978846, %v2022_v15  ;;  %v1893_v62 = vmul.f32 0.044715, %v1765_v12  ;;  %v1642_v1 = vmul.f32 %v6201_v16, %v6201_v16 }
 0x2fb   : > { %4419 = vtanh.f32 %v2148_v43  ;;  %v2524_v5 = vmul.f32 0.5, %v2396_v27  ;;  %v1895_v51 = vmul.f32 0.044715, %v1767_v61  ;;  %v2369_v35 = vadd.f32 1.0, %v5895_v19  ;;  %v1314_v27 = vpop.f32.mrf.mxu1  ;;  %v1505_v43 = vpop.f32.mrf.mxu0 }
 0x2fc   : > { %4421 = vtanh.f32 %v2143_v25  ;;  %v6214_v58 = vmul.f32 %v2520_v59, %v6012_v37  ;;  %v6217_v57 = vmul.f32 %v2522_v10, %v6026_v31  ;;  %v2024_v26 = vadd.f32 %v1896_v55, %v6177_v50 }
 0x2fd   : > { %4423 = vtanh.f32 %v2145_v39  ;;  %v6220_v12 = vmul.f32 0.7978846, %v2019_v20  ;;  %v1770_v53 = vmul.f32 %v1642_v1, %v6201_v16  ;;  %v2373_v8 = vadd.f32 1.0, %v5949_v36  ;;  %v7300_v1 = vld [vmem:[#allocation80_spill] sm:$0xff] }
 0x2fe   : > { %v2497_v6 = vmul.f32 0.5, %v2369_v35  ;;  %v4412_v46 = vpop.eup %4411  ;;  %v6224_v19 = vmul.f32 0.5, %v2398_v52  ;;  %4425 = vtanh.f32 %v2150_v34  ;;  %v2021_v37 = vadd.f32 %v1893_v62, %v6168_v41  ;;  %v7301_v35 = vld [vmem:[#allocation82_spill] sm:$0xff] }
 0x2ff   : > { %v2371_v31 = vadd.f32 1.0, %v5915_v49  ;;  %v6229_v59 = vmul.f32 %v2524_v5, %v6079_v29  ;;  %v2023_v10 = vadd.f32 %v1895_v51, %v6171_v11  ;;  %v2501_v25 = vmul.f32 0.5, %v2373_v8  ;;  %v7298_v49 = vld [vmem:[#allocation79_spill] sm:$0xff]  ;;  %v7299_v29 = vld [vmem:[#allocation81_spill] sm:$0xff]  ;;  %v1318_v8 = vpop.f32.mrf.mxu1 }
 0x300   : > { %v2375_v21 = vadd.f32 1.0, %v5985_v18  ;;  %v2152_v15 = vmul.f32 0.7978846, %v2024_v26  ;;  %v6234_v61 = vadd.f32 %v1310_v54, %v5402_v33  ;;  %v6237_v39 = vadd.f32 %v1503_v40, %v5404_v23 }
 0x301   : > { %v2499_v36 = vmul.f32 0.5, %v2371_v31  ;;  %v1898_v55 = vmul.f32 0.044715, %v1770_v53  ;;  %v2625_v52 = vmul.f32 %v2497_v6, %v7298_v49  ;;  %v2629_v20 = vmul.f32 %v2501_v25, %v7299_v29  ;;  %v7302_v25 = vld [vmem:[#allocation75_spill] sm:$0xff]  ;;  %v1507_v49 = vpop.f32.mrf.mxu0 }
 0x302   : > { %7296 = vst [vmem:[#allocation65_spill] sm:$0xff] %v6234_v61  ;;  %7297 = vst [vmem:[#allocation77_spill] sm:$0xff] %v6237_v39  ;;  %v2503_v34 = vmul.f32 0.5, %v2375_v21  ;;  %v2400_v62 = vadd.f32 1.0, %v4412_v46  ;;  %v1641_v18 = vmul.f32 %v6234_v61, %v6234_v61  ;;  %v1643_v54 = vmul.f32 %v6237_v39, %v6237_v39  ;;  %v7303_v21 = vld [vmem:[#allocation88_spill] sm:$0xff] }
 0x303   : > { %v2627_v5 = vmul.f32 %v2499_v36, %v7300_v1  ;;  %v2733_v51 = vpack.c.bf16 %v2629_v20, %v2625_v52  ;;  %v6248_v40 = vadd.f32 %v1312_v38, %v5398_v17  ;;  %v6251_v53 = vadd.f32 %v1505_v43, %v5400_v32  ;;  %v7304_v1 = vld [vmem:[#allocation87_spill] sm:$0xff] }
 0x304   : > { %v2631_v26 = vmul.f32 %v2503_v34, %v7301_v35  ;;  %v4414_v6 = vpop.eup %4413  ;;  %4427 = vtanh.f32 %v2152_v15  ;;  %v1769_v46 = vmul.f32 %v1641_v18, %v6234_v61  ;;  %v1771_v31 = vmul.f32 %v1643_v54, %v6237_v39 }
 0x305   : > { %v2732_v36 = vpack.c.bf16 %v7303_v21, %v7302_v25  ;;  %v6257_v52 = vpop.eup %4415  ;;  %v2026_v29 = vadd.f32 %v1898_v55, %v6201_v16  ;;  %3108 = vmatprep.mubr.bf16.mxu1 %v2733_v51  ;;  %v1644_v43 = vmul.f32 %v6248_v40, %v6248_v40  ;;  %v1646_v15 = vmul.f32 %v6251_v53, %v6251_v53 }
 0x306   : > { %v2735_v38 = vpack.c.bf16 %v2631_v26, %v2627_v5  ;;  %v6264_v20 = vpop.eup %4417  ;;  %v2149_v34 = vmul.f32 0.7978846, %v2021_v37  ;;  %v2734_v18 = vpack.c.bf16 %v5999_v13, %v7304_v1  ;;  %v6269_v54 = vadd.f32 %v1314_v27, %v5402_v33  ;;  %v1511_v27 = vpop.f32.mrf.mxu0 }
 0x307   : > { %3109 = vmatmul.mubr.bf16.gmra.mxu1 %v2732_v36  ;;  %v6272_v55 = vadd.f32 %v1318_v8, %v5398_v17  ;;  %v2402_v51 = vadd.f32 1.0, %v4414_v6  ;;  %v2151_v35 = vmul.f32 0.7978846, %v2023_v10  ;;  %v1772_v26 = vmul.f32 %v1644_v43, %v6248_v40 }
 0x308   : > { %7305 = vst [vmem:[#allocation62_spill] sm:$0xff] %v6269_v54  ;;  %v4420_v5 = vpop.eup %4419  ;;  %3269 = vmatprep.mubr.bf16.mxu0 %v2735_v38  ;;  %v1774_v25 = vmul.f32 %v1646_v15, %v6251_v53  ;;  %v2528_v37 = vmul.f32 0.5, %v2400_v62  ;;  %v1897_v36 = vmul.f32 0.044715, %v1769_v46  ;;  %v1899_v11 = vmul.f32 0.044715, %v1771_v31 }
 0x309   : > { %v6276_v21 = vpop.eup %4421  ;;  %3270 = vmatmul.mubr.bf16.gmra.mxu0 %v2734_v18  ;;  %v6279_v13 = vadd.f32 %v1507_v49, %v5404_v23  ;;  %4429 = vtanh.f32 %v6220_v12  ;;  %v2154_v10 = vmul.f32 0.7978846, %v2026_v29  ;;  %v1900_v6 = vmul.f32 0.044715, %v1772_v26 }
 0x30a   : > { %v6281_v8 = vpop.eup %4423  ;;  %v1902_v38 = vmul.f32 0.044715, %v1774_v25  ;;  %v2404_v43 = vadd.f32 1.0, %v4420_v5  ;;  %4431 = vtanh.f32 %v2149_v34  ;;  %v1645_v15 = vmul.f32 %v6269_v54, %v6269_v54  ;;  %v1320_v5 = vpop.f32.mrf.mxu1 }
 0x30b   : > { %7306 = vst [vmem:[#allocation66_spill] sm:$0xff] %v6279_v13  ;;  %v1648_v62 = vmul.f32 %v6272_v55, %v6272_v55  ;;  %v4426_v46 = vpop.eup %4425  ;;  %v2530_v31 = vmul.f32 0.5, %v2402_v51  ;;  %v2028_v49 = vadd.f32 %v1900_v6, %v6248_v40  ;;  %v6291_v18 = vadd.f32 %v1511_v27, %v5400_v32 }
 0x30c   : > { %v2030_v1 = vadd.f32 %v1902_v38, %v6251_v53  ;;  %4433 = vtanh.f32 %v2151_v35  ;;  %v2025_v12 = vadd.f32 %v1897_v36, %v6234_v61  ;;  %v2027_v29 = vadd.f32 %v1899_v11, %v6237_v39 }
 0x30d   : > { %v1647_v34 = vmul.f32 %v6279_v13, %v6279_v13  ;;  %v6299_v26 = vmul.f32 %v6224_v19, %v6082_v7  ;;  %v6302_v51 = vmul.f32 %v2528_v37, %v6104_v63  ;;  %4435 = vtanh.f32 %v2154_v10 }
 0x30e   : > { %v2156_v25 = vmul.f32 0.7978846, %v2028_v49  ;;  %v2532_v27 = vmul.f32 0.5, %v2404_v43  ;;  %v2406_v6 = vadd.f32 1.0, %v4426_v46  ;;  %v1773_v35 = vmul.f32 %v1645_v15, %v6269_v54  ;;  %v1513_v43 = vpop.f32.mrf.mxu0  ;;  %v1322_v46 = vpop.f32.mrf.mxu1 }
 0x30f   : > { %v1776_v36 = vmul.f32 %v1648_v62, %v6272_v55  ;;  %v2158_v11 = vmul.f32 0.7978846, %v2030_v1  ;;  %v1650_v38 = vmul.f32 %v6291_v18, %v6291_v18  ;;  %v2377_v39 = vadd.f32 1.0, %v6003_v28 }
 0x310   : > { %v2381_v7 = vadd.f32 1.0, %v6061_v60  ;;  %v6311_v19 = vmul.f32 %v2530_v31, %v6107_v47  ;;  %v2153_v63 = vmul.f32 0.7978846, %v2025_v12  ;;  %v2155_v37 = vmul.f32 0.7978846, %v2027_v29  ;;  %v7308_v29 = vld [vmem:[#allocation83_spill] sm:$0xff] }
 0x311   : > { %v1775_v10 = vmul.f32 %v1647_v34, %v6279_v13  ;;  %v4428_v15 = vpop.eup %4427  ;;  %4437 = vtanh.f32 %v2156_v25  ;;  %v1904_v62 = vmul.f32 0.044715, %v1776_v36  ;;  %v2505_v49 = vmul.f32 0.5, %v2377_v39  ;;  %v7309_v25 = vld [vmem:[#allocation85_spill] sm:$0xff] }
 0x312   : > { %7307 = vst [vmem:[#allocation78_spill] sm:$0xff] %v6311_v19  ;;  %v2509_v1 = vmul.f32 0.5, %v2381_v7  ;;  %v2534_v61 = vmul.f32 0.5, %v2406_v6  ;;  %v1778_v0 = vmul.f32 %v1650_v38, %v6291_v18  ;;  %v2379_v28 = vadd.f32 1.0, %v6048_v2  ;;  %v1515_v6 = vpop.f32.mrf.mxu0  ;;  %v1324_v19 = vpop.f32.mrf.mxu1 }
 0x313   : > { %v2383_v60 = vadd.f32 1.0, %v6067_v24  ;;  %v6318_v47 = vmul.f32 %v2532_v27, %v6159_v56  ;;  %4439 = vtanh.f32 %v2158_v11  ;;  %v1901_v31 = vmul.f32 0.044715, %v1773_v35  ;;  %v7312_v11 = vld [vmem:[#allocation84_spill] sm:$0xff] }
 0x314   : > { %v2032_v12 = vadd.f32 %v1904_v62, %v6272_v55  ;;  %v2633_v34 = vmul.f32 %v2505_v49, %v7308_v29  ;;  %v2637_v36 = vmul.f32 %v2509_v1, %v7309_v25  ;;  %v2507_v39 = vmul.f32 0.5, %v2379_v28  ;;  %v7313_v49 = vld [vmem:[#allocation86_spill] sm:$0xff]  ;;  %v1328_v25 = vpop.f32.mrf.mxu1 }
 0x315   : > { %v2511_v7 = vmul.f32 0.5, %v2383_v60  ;;  %v2408_v38 = vadd.f32 1.0, %v4428_v15  ;;  %4441 = vtanh.f32 %v2153_v63  ;;  %v6324_v2 = vadd.f32 %v1320_v5, %v5402_v33 }
 0x316   : > { %v6327_v24 = vadd.f32 %v1513_v43, %v5404_v23  ;;  %v6329_v56 = vpop.eup %4429  ;;  %v1906_v27 = vmul.f32 0.044715, %v1778_v0  ;;  %v2737_v35 = vpack.c.bf16 %v2637_v36, %v2633_v34  ;;  %v2635_v62 = vmul.f32 %v2507_v39, %v7312_v11  ;;  %v1517_v34 = vpop.f32.mrf.mxu0  ;;  %v7314_v39 = vld [vmem:[#allocation72_spill] sm:$0xff] }
 0x317   : > { %7310 = vst [vmem:[#allocation59_spill] sm:$0xff] %v6324_v2  ;;  %v2639_v1 = vmul.f32 %v2511_v7, %v7313_v49  ;;  %v6333_v28 = vpop.eup %4431  ;;  %4443 = vtanh.f32 %v2155_v37  ;;  %v1903_v60 = vmul.f32 0.044715, %v1775_v10  ;;  %v1649_v63 = vmul.f32 %v6324_v2, %v6324_v2 }
 0x318   : > { %7311 = vst [vmem:[#allocation63_spill] sm:$0xff] %v6327_v24  ;;  %v1651_v5 = vmul.f32 %v6327_v24, %v6327_v24  ;;  %v2160_v43 = vmul.f32 0.7978846, %v2032_v12  ;;  %3116 = vmatprep.mubr.bf16.mxu1 %v2737_v35  ;;  %v2736_v0 = vpack.c.bf16 %v6036_v42, %v6009_v9  ;;  %v6342_v29 = vadd.f32 %v1322_v46, %v5398_v17 }
 0x319   : > { %v2739_v15 = vpack.c.bf16 %v2639_v1, %v2635_v62  ;;  %v6344_v36 = vpop.eup %4433  ;;  %v2029_v37 = vadd.f32 %v1901_v31, %v6269_v54  ;;  %v1777_v10 = vmul.f32 %v1649_v63, %v6324_v2  ;;  %v2738_v7 = vpack.c.bf16 %v7314_v39, %v6022_v4  ;;  %v1521_v1 = vpop.f32.mrf.mxu0 }
 0x31a   : > { %v6351_v12 = vadd.f32 %v1515_v6, %v5400_v32  ;;  %v4436_v35 = vpop.eup %4435  ;;  %v2536_v11 = vmul.f32 0.5, %v2408_v38  ;;  %v2034_v9 = vadd.f32 %v1906_v27, %v6291_v18  ;;  %v1779_v42 = vmul.f32 %v1651_v5, %v6327_v24  ;;  %3117 = vmatmul.mubr.bf16.gmra.mxu1 %v2736_v0 }
 0x31b   : > { %3277 = vmatprep.mubr.bf16.mxu0 %v2739_v15  ;;  %v1652_v46 = vmul.f32 %v6342_v29, %v6342_v29  ;;  %v6360_v4 = vadd.f32 %v1324_v19, %v5402_v33  ;;  %v6363_v6 = vadd.f32 %v1517_v34, %v5404_v23  ;;  %v6366_v38 = vadd.f32 %v1328_v25, %v5398_v17 }
 0x31c   : > { %3278 = vmatmul.mubr.bf16.gmra.mxu0 %v2738_v7  ;;  %v1654_v31 = vmul.f32 %v6351_v12, %v6351_v12  ;;  %v6369_v27 = vmul.f32 %v2534_v61, %v6165_v3  ;;  %v2031_v62 = vadd.f32 %v1903_v60, %v6279_v13  ;;  %4445 = vtanh.f32 %v2160_v43  ;;  %v1330_v13 = vpop.f32.mrf.mxu1 }
 0x31d   : > { %7315 = vst [vmem:[#allocation60_spill] sm:$0xff] %v6360_v4  ;;  %7316 = vst [vmem:[#allocation64_spill] sm:$0xff] %v6363_v6  ;;  %v1780_v49 = vmul.f32 %v1652_v46, %v6342_v29  ;;  %v2410_v63 = vadd.f32 1.0, %v4436_v35  ;;  %v2157_v5 = vmul.f32 0.7978846, %v2029_v37  ;;  %v6375_v34 = vmul.f32 %v2536_v11, %v6177_v50  ;;  %v7319_v11 = vld [vmem:[#allocation58_spill] sm:$0xff] }
 0x31e   : > { %7317 = vst [vmem:[#allocation69_spill] sm:$0xff] %v6369_v27  ;;  %v1905_v15 = vmul.f32 0.044715, %v1777_v10  ;;  %v1782_v19 = vmul.f32 %v1654_v31, %v6351_v12  ;;  %v4438_v0 = vpop.eup %4437  ;;  %v2162_v25 = vmul.f32 0.7978846, %v2034_v9  ;;  %v1653_v3 = vmul.f32 %v6360_v4, %v6360_v4 }
 0x31f   : > { %7318 = vst [vmem:[#allocation71_spill] sm:$0xff] %v6375_v34  ;;  %v1907_v39 = vmul.f32 0.044715, %v1779_v42  ;;  %v1908_v7 = vmul.f32 0.044715, %v1780_v49  ;;  %v1655_v61 = vmul.f32 %v6363_v6, %v6363_v6  ;;  %v1656_v60 = vmul.f32 %v6366_v38, %v6366_v38 }
 0x320   : > { %v6384_v43 = vadd.f32 %v1521_v1, %v5400_v32  ;;  %v4440_v37 = vpop.eup %4439  ;;  %v2159_v10 = vmul.f32 0.7978846, %v2031_v62  ;;  %v1910_v35 = vmul.f32 0.044715, %v1782_v19  ;;  %v2385_v9 = vadd.f32 1.0, %v7319_v11 }
 0x321   : > { %v2036_v50 = vadd.f32 %v1908_v7, %v6342_v29  ;;  %v2538_v42 = vmul.f32 0.5, %v2410_v63  ;;  %v2412_v46 = vadd.f32 1.0, %v4438_v0  ;;  %v2033_v31 = vadd.f32 %v1905_v15, %v6324_v2 }
 0x322   : > { %v1784_v49 = vmul.f32 %v1656_v60, %v6366_v38  ;;  %v6390_v34 = vpop.eup %4441  ;;  %4447 = vtanh.f32 %v2162_v25  ;;  %v2035_v1 = vadd.f32 %v1907_v39, %v6327_v24  ;;  %v2038_v62 = vadd.f32 %v1910_v35, %v6351_v12  ;;  %v1523_v35 = vpop.f32.mrf.mxu0 }
 0x323   : > { %v2164_v54 = vmul.f32 0.7978846, %v2036_v50  ;;  %v2414_v27 = vadd.f32 1.0, %v4440_v37  ;;  %v1781_v19 = vmul.f32 %v1653_v3, %v6360_v4  ;;  %v1783_v7 = vmul.f32 %v1655_v61, %v6363_v6  ;;  %v1332_v37 = vpop.f32.mrf.mxu1 }
 0x324   : > { %v1658_v63 = vmul.f32 %v6384_v43, %v6384_v43  ;;  %v6398_v15 = vpop.eup %4443  ;;  %v2166_v0 = vmul.f32 0.7978846, %v2038_v62  ;;  %v2389_v60 = vadd.f32 1.0, %v6161_v30  ;;  %v2513_v25 = vmul.f32 0.5, %v2385_v9  ;;  %v7321_v9 = vld [vmem:[#allocation53_spill] sm:$0xff] }
 0x325   : > { %7320 = vst [vmem:[#allocation73_spill] sm:$0xff] %v6398_v15  ;;  %4449 = vtanh.f32 %v2164_v54  ;;  %v2540_v11 = vmul.f32 0.5, %v2412_v46  ;;  %v2161_v39 = vmul.f32 0.7978846, %v2033_v31  ;;  %v1912_v50 = vmul.f32 0.044715, %v1784_v49 }
 0x326   : > { %4451 = vtanh.f32 %v2157_v5  ;;  %v6401_v3 = vmul.f32 0.7978846, %v2035_v1  ;;  %v1786_v61 = vmul.f32 %v1658_v63, %v6384_v43  ;;  %v2517_v24 = vmul.f32 0.5, %v2389_v60  ;;  %v7322_v46 = vld [vmem:[#allocation70_spill] sm:$0xff]  ;;  %v7323_v49 = vld [vmem:[#allocation68_spill] sm:$0xff] }
 0x327   : > { %4453 = vtanh.f32 %v2159_v10  ;;  %v6405_v2 = vmul.f32 %v2538_v42, %v6201_v16  ;;  %v6407_v54 = vmul.f32 0.5, %v2414_v27  ;;  %v1909_v62 = vmul.f32 0.044715, %v1781_v19  ;;  %v1525_v27 = vpop.f32.mrf.mxu0  ;;  %v1334_v42 = vpop.f32.mrf.mxu1 }
 0x328   : > { %v1911_v30 = vmul.f32 0.044715, %v1783_v7  ;;  %4455 = vtanh.f32 %v2166_v0  ;;  %v2641_v5 = vmul.f32 %v2513_v25, %v7321_v9  ;;  %v2645_v31 = vmul.f32 %v2517_v24, %v7322_v46 }
 0x329   : > { %v2387_v15 = vadd.f32 1.0, %v7323_v49  ;;  %v4446_v10 = vpop.eup %4445  ;;  %v6413_v1 = vmul.f32 %v2540_v11, %v6248_v40  ;;  %4457 = vtanh.f32 %v2161_v39  ;;  %v2040_v63 = vadd.f32 %v1912_v50, %v6366_v38  ;;  %v7326_v39 = vld [vmem:[#allocation57_spill] sm:$0xff] }
 0x32a   : > { %v2391_v16 = vadd.f32 1.0, %v6182_v14  ;;  %v1914_v19 = vmul.f32 0.044715, %v1786_v61  ;;  %v2741_v7 = vpack.c.bf16 %v2645_v31, %v2641_v5  ;;  %v6418_v60 = vadd.f32 %v1330_v13, %v5402_v33  ;;  %v7327_v13 = vld [vmem:[#allocation76_spill] sm:$0xff] }
 0x32b   : > { %v2515_v0 = vmul.f32 0.5, %v2387_v15  ;;  %v2037_v24 = vadd.f32 %v1909_v62, %v6360_v4  ;;  %v6422_v9 = vadd.f32 %v1523_v35, %v5404_v23  ;;  %v2740_v40 = vpack.c.bf16 %v6131_v45, %v6125_v48  ;;  %v1527_v45 = vpop.f32.mrf.mxu0 }
 0x32c   : > { %7324 = vst [vmem:[#allocation79_spill] sm:$0xff] %v6418_v60  ;;  %v2519_v25 = vmul.f32 0.5, %v2391_v16  ;;  %v2416_v11 = vadd.f32 1.0, %v4446_v10  ;;  %v2039_v14 = vadd.f32 %v1911_v30, %v6363_v6  ;;  %3124 = vmatprep.mubr.bf16.mxu1 %v2741_v7  ;;  %v1657_v15 = vmul.f32 %v6418_v60, %v6418_v60  ;;  %v1338_v30 = vpop.f32.mrf.mxu1 }
 0x32d   : > { %7325 = vst [vmem:[#allocation81_spill] sm:$0xff] %v6422_v9  ;;  %v2643_v50 = vmul.f32 %v2515_v0, %v7326_v39  ;;  %v1659_v62 = vmul.f32 %v6422_v9, %v6422_v9  ;;  %3125 = vmatmul.mubr.bf16.gmra.mxu1 %v2740_v40  ;;  %v6434_v35 = vadd.f32 %v1332_v37, %v5398_v17  ;;  %v2168_v5 = vmul.f32 0.7978846, %v2040_v63 }
 0x32e   : > { %v2647_v61 = vmul.f32 %v2519_v25, %v7327_v13  ;;  %v6437_v48 = vadd.f32 %v1525_v27, %v5400_v32  ;;  %v2042_v46 = vadd.f32 %v1914_v19, %v6384_v43  ;;  %v1785_v31 = vmul.f32 %v1657_v15, %v6418_v60  ;;  %v7329_v25 = vld [vmem:[#allocation55_spill] sm:$0xff] }
 0x32f   : > { %v6442_v49 = vadd.f32 %v1334_v42, %v5402_v33  ;;  %v4448_v10 = vpop.eup %4447  ;;  %v1787_v7 = vmul.f32 %v1659_v62, %v6422_v9  ;;  %v1660_v37 = vmul.f32 %v6434_v35, %v6434_v35  ;;  %v2165_v0 = vmul.f32 0.7978846, %v2037_v24 }
 0x330   : > { %v2743_v16 = vpack.c.bf16 %v2647_v61, %v2643_v50  ;;  %v1662_v27 = vmul.f32 %v6437_v48, %v6437_v48  ;;  %v2742_v63 = vpack.c.bf16 %v6207_v44, %v7329_v25  ;;  %v6452_v19 = vadd.f32 %v1527_v45, %v5404_v23  ;;  %v1531_v45 = vpop.f32.mrf.mxu0 }
 0x331   : > { %7328 = vst [vmem:[#allocation80_spill] sm:$0xff] %v6442_v49  ;;  %v6455_v42 = vadd.f32 %v1338_v30, %v5398_v17  ;;  %v2167_v39 = vmul.f32 0.7978846, %v2039_v14  ;;  %v1913_v50 = vmul.f32 0.044715, %v1785_v31  ;;  %v1788_v15 = vmul.f32 %v1660_v37, %v6434_v35 }
 0x332   : > { %7330 = vst [vmem:[#allocation82_spill] sm:$0xff] %v6452_v19  ;;  %v4450_v40 = vpop.eup %4449  ;;  %3285 = vmatprep.mubr.bf16.mxu0 %v2743_v16  ;;  %v1790_v13 = vmul.f32 %v1662_v27, %v6437_v48  ;;  %v2544_v24 = vmul.f32 0.5, %v2416_v11  ;;  %v2418_v62 = vadd.f32 1.0, %v4448_v10  ;;  %4459 = vtanh.f32 %v2168_v5 }
 0x333   : > { %v6459_v61 = vpop.eup %4451  ;;  %v2170_v44 = vmul.f32 0.7978846, %v2042_v46  ;;  %3286 = vmatmul.mubr.bf16.gmra.mxu0 %v2742_v63  ;;  %v1915_v30 = vmul.f32 0.044715, %v1787_v7  ;;  %v1916_v6 = vmul.f32 0.044715, %v1788_v15  ;;  %v1661_v14 = vmul.f32 %v6442_v49, %v6442_v49 }
 0x334   : > { %v6461_v25 = vpop.eup %4453  ;;  %v1918_v4 = vmul.f32 0.044715, %v1790_v13  ;;  %4461 = vtanh.f32 %v6401_v3  ;;  %v2420_v31 = vadd.f32 1.0, %v4450_v40  ;;  %v1663_v16 = vmul.f32 %v6452_v19, %v6452_v19  ;;  %v1340_v40 = vpop.f32.mrf.mxu1 }
 0x335   : > { %v1664_v11 = vmul.f32 %v6455_v42, %v6455_v42  ;;  %v4456_v5 = vpop.eup %4455  ;;  %4463 = vtanh.f32 %v2165_v0  ;;  %v2041_v46 = vadd.f32 %v1913_v50, %v6418_v60  ;;  %v2044_v10 = vadd.f32 %v1916_v6, %v6434_v35 }
 0x336   : > { %v6473_v7 = vadd.f32 %v1531_v45, %v5400_v32  ;;  %v6475_v37 = vpop.eup %4457  ;;  %v6479_v3 = vmul.f32 %v6407_v54, %v6251_v53  ;;  %v2546_v27 = vmul.f32 0.5, %v2418_v62  ;;  %4465 = vtanh.f32 %v2170_v44  ;;  %v7332_v44 = vld [vmem:[#allocation61_spill] sm:$0xff] }
 0x337   : > { %v2046_v63 = vadd.f32 %v1918_v4, %v6437_v48  ;;  %v6483_v0 = vmul.f32 %v2544_v24, %v6272_v55  ;;  %4467 = vtanh.f32 %v2167_v39  ;;  %v2043_v6 = vadd.f32 %v1915_v30, %v6422_v9  ;;  %v1533_v55 = vpop.f32.mrf.mxu0 }
 0x338   : > { %v1789_v50 = vmul.f32 %v1661_v14, %v6442_v49  ;;  %v2548_v15 = vmul.f32 0.5, %v2420_v31  ;;  %v2422_v13 = vadd.f32 1.0, %v4456_v5  ;;  %v1791_v45 = vmul.f32 %v1663_v16, %v6452_v19  ;;  %v1342_v31 = vpop.f32.mrf.mxu1 }
 0x339   : > { %7331 = vst [vmem:[#allocation75_spill] sm:$0xff] %v6483_v0  ;;  %v1792_v53 = vmul.f32 %v1664_v11, %v6455_v42  ;;  %v2169_v54 = vmul.f32 0.7978846, %v2041_v46  ;;  %v2172_v62 = vmul.f32 0.7978846, %v2044_v10  ;;  %v1666_v4 = vmul.f32 %v6473_v7, %v6473_v7 }
 0x33a   : > { %v2393_v60 = vadd.f32 1.0, %v7332_v44  ;;  %v6493_v39 = vmul.f32 %v2546_v27, %v6291_v18  ;;  %v2174_v24 = vmul.f32 0.7978846, %v2046_v63  ;;  %v2397_v14 = vadd.f32 1.0, %v6264_v20  ;;  %v1535_v63 = vpop.f32.mrf.mxu0 }
 0x33b   : > { %v1920_v30 = vmul.f32 0.044715, %v1792_v53  ;;  %v6496_v5 = vmul.f32 0.7978846, %v2043_v6  ;;  %v1917_v16 = vmul.f32 0.044715, %v1789_v50  ;;  %v1794_v11 = vmul.f32 %v1666_v4, %v6473_v7 }
 0x33c   : > { %v2521_v46 = vmul.f32 0.5, %v2393_v60  ;;  %v6500_v10 = vmul.f32 %v2548_v15, %v6342_v29  ;;  %v6502_v9 = vmul.f32 0.5, %v2422_v13  ;;  %v1919_v44 = vmul.f32 0.044715, %v1791_v45  ;;  %v7333_v6 = vld [vmem:[#allocation54_spill] sm:$0xff]  ;;  %v1344_v15 = vpop.f32.mrf.mxu1 }
 0x33d   : > { %v2525_v0 = vmul.f32 0.5, %v2397_v14  ;;  %4469 = vtanh.f32 %v2172_v62  ;;  %v2048_v18 = vadd.f32 %v1920_v30, %v6455_v42  ;;  %v2395_v27 = vadd.f32 1.0, %v6257_v52  ;;  %v7334_v53 = vld [vmem:[#allocation74_spill] sm:$0xff] }
 0x33e   : > { %v2399_v20 = vadd.f32 1.0, %v6276_v21  ;;  %4471 = vtanh.f32 %v2174_v24  ;;  %v2649_v50 = vmul.f32 %v2521_v46, %v7333_v6  ;;  %v6510_v29 = vadd.f32 %v1340_v40, %v5402_v33  ;;  %v7337_v40 = vld [vmem:[#allocation67_spill] sm:$0xff] }
 0x33f   : > { %v2653_v60 = vmul.f32 %v2525_v0, %v7334_v53  ;;  %v4460_v13 = vpop.eup %4459  ;;  %v1922_v45 = vmul.f32 0.044715, %v1794_v11  ;;  %v2523_v4 = vmul.f32 0.5, %v2395_v27  ;;  %v6513_v30 = vadd.f32 %v1533_v55, %v5404_v23  ;;  %v7338_v6 = vld [vmem:[#allocation51_spill] sm:$0xff]  ;;  %v1537_v27 = vpop.f32.mrf.mxu0 }
 0x340   : > { %7335 = vst [vmem:[#allocation88_spill] sm:$0xff] %v6510_v29  ;;  %v2527_v62 = vmul.f32 0.5, %v2399_v20  ;;  %4473 = vtanh.f32 %v2169_v54  ;;  %v2045_v52 = vadd.f32 %v1917_v16, %v6442_v49  ;;  %v1665_v24 = vmul.f32 %v6510_v29, %v6510_v29 }
 0x341   : > { %7336 = vst [vmem:[#allocation87_spill] sm:$0xff] %v6513_v30  ;;  %v2745_v21 = vpack.c.bf16 %v2653_v60, %v2649_v50  ;;  %v6518_v14 = vpop.eup %4461  ;;  %v2176_v0 = vmul.f32 0.7978846, %v2048_v18  ;;  %v2651_v46 = vmul.f32 %v2523_v4, %v7337_v40  ;;  %v1667_v11 = vmul.f32 %v6513_v30, %v6513_v30  ;;  %v1348_v18 = vpop.f32.mrf.mxu1 }
 0x342   : > { %v2655_v53 = vmul.f32 %v2527_v62, %v7338_v6  ;;  %v6524_v55 = vpop.eup %4463  ;;  %v2424_v54 = vadd.f32 1.0, %v4460_v13  ;;  %v2047_v16 = vadd.f32 %v1919_v44, %v6452_v19  ;;  %v2744_v20 = vpack.c.bf16 %v6229_v59, %v6214_v58 }
 0x343   : > { %3132 = vmatprep.mubr.bf16.mxu1 %v2745_v21  ;;  %v6530_v50 = vadd.f32 %v1342_v31, %v5398_v17  ;;  %v4466_v60 = vpop.eup %4465  ;;  %v2050_v4 = vadd.f32 %v1922_v45, %v6473_v7  ;;  %v1793_v40 = vmul.f32 %v1665_v24, %v6510_v29  ;;  %v6535_v6 = vadd.f32 %v1535_v63, %v5400_v32 }
 0x344   : > { %v2747_v62 = vpack.c.bf16 %v2655_v53, %v2651_v46  ;;  %v6537_v13 = vpop.eup %4467  ;;  %3133 = vmatmul.mubr.bf16.gmra.mxu1 %v2744_v20  ;;  %v2746_v44 = vpack.c.bf16 %v6299_v26, %v6217_v57  ;;  %v6544_v59 = vadd.f32 %v1344_v15, %v5402_v33  ;;  %v6547_v31 = vadd.f32 %v1537_v27, %v5404_v23  ;;  %v1541_v46 = vpop.f32.mrf.mxu0 }
 0x345   : > { %7339 = vst [vmem:[#allocation83_spill] sm:$0xff] %v6535_v6  ;;  %v1668_v58 = vmul.f32 %v6530_v50, %v6530_v50  ;;  %4475 = vtanh.f32 %v2176_v0  ;;  %v1795_v63 = vmul.f32 %v1667_v11, %v6513_v30  ;;  %v1670_v45 = vmul.f32 %v6535_v6, %v6535_v6 }
 0x346   : > { %7340 = vst [vmem:[#allocation85_spill] sm:$0xff] %v6544_v59  ;;  %7341 = vst [vmem:[#allocation84_spill] sm:$0xff] %v6547_v31  ;;  %3293 = vmatprep.mubr.bf16.mxu0 %v2747_v62  ;;  %v6553_v21 = vadd.f32 %v1348_v18, %v5398_v17  ;;  %v2552_v57 = vmul.f32 0.5, %v2424_v54  ;;  %v2426_v26 = vadd.f32 1.0, %v4466_v60  ;;  %v1669_v15 = vmul.f32 %v6544_v59, %v6544_v59 }
 0x347   : > { %3294 = vmatmul.mubr.bf16.gmra.mxu0 %v2746_v44  ;;  %v1796_v24 = vmul.f32 %v1668_v58, %v6530_v50  ;;  %v2178_v53 = vmul.f32 0.7978846, %v2050_v4  ;;  %v1921_v0 = vmul.f32 0.044715, %v1793_v40  ;;  %v1798_v27 = vmul.f32 %v1670_v45, %v6535_v6 }
 0x348   : > { %7342 = vst [vmem:[#allocation86_spill] sm:$0xff] %v6553_v21  ;;  %v1671_v11 = vmul.f32 %v6547_v31, %v6547_v31  ;;  %4477 = vtanh.f32 %v6496_v5  ;;  %v2173_v20 = vmul.f32 0.7978846, %v2045_v52  ;;  %v1672_v54 = vmul.f32 %v6553_v21, %v6553_v21 }
 0x349   : > { %v1924_v18 = vmul.f32 0.044715, %v1796_v24  ;;  %v6566_v60 = vmul.f32 %v6502_v9, %v6351_v12  ;;  %v1923_v62 = vmul.f32 0.044715, %v1795_v63  ;;  %v1926_v44 = vmul.f32 0.044715, %v1798_v27  ;;  %v1350_v24 = vpop.f32.mrf.mxu1 }
 0x34a   : > { %v6569_v4 = vadd.f32 %v1541_v46, %v5400_v32  ;;  %v4470_v40 = vpop.eup %4469  ;;  %v6572_v58 = vmul.f32 %v2552_v57, %v6366_v38  ;;  %v2175_v45 = vmul.f32 0.7978846, %v2047_v16  ;;  %v1797_v52 = vmul.f32 %v1669_v15, %v6544_v59 }
 0x34b   : > { %v2052_v5 = vadd.f32 %v1924_v18, %v6530_v50  ;;  %v4472_v19 = vpop.eup %4471  ;;  %v2554_v49 = vmul.f32 0.5, %v2426_v26  ;;  %4479 = vtanh.f32 %v2178_v53  ;;  %v2049_v12 = vadd.f32 %v1921_v0, %v6510_v29  ;;  %v1543_v53 = vpop.f32.mrf.mxu0 }
 0x34c   : > { %7343 = vst [vmem:[#allocation72_spill] sm:$0xff] %v6569_v4  ;;  %v1799_v9 = vmul.f32 %v1671_v11, %v6547_v31  ;;  %4481 = vtanh.f32 %v2173_v20  ;;  %v2054_v46 = vadd.f32 %v1926_v44, %v6535_v6  ;;  %v1800_v38 = vmul.f32 %v1672_v54, %v6553_v21  ;;  %v1352_v18 = vpop.f32.mrf.mxu1 }
 0x34d   : > { %v2180_v63 = vmul.f32 0.7978846, %v2052_v5  ;;  %v6580_v57 = vpop.eup %4473  ;;  %v2428_v16 = vadd.f32 1.0, %v4470_v40  ;;  %v2051_v27 = vadd.f32 %v1923_v62, %v6513_v30  ;;  %v1674_v15 = vmul.f32 %v6569_v4, %v6569_v4 }
 0x34e   : > { %v2401_v26 = vadd.f32 1.0, %v6281_v8  ;;  %v2430_v0 = vadd.f32 1.0, %v4472_v19  ;;  %4483 = vtanh.f32 %v2175_v45  ;;  %v1925_v11 = vmul.f32 0.044715, %v1797_v52 }
 0x34f   : > { %v1928_v20 = vmul.f32 0.044715, %v1800_v38  ;;  %v6587_v44 = vmul.f32 %v2554_v49, %v6384_v43  ;;  %v6589_v54 = vmul.f32 0.7978846, %v2049_v12  ;;  %v1927_v5 = vmul.f32 0.044715, %v1799_v9  ;;  %v1545_v38 = vpop.f32.mrf.mxu0 }
 0x350   : > { %v2405_v40 = vadd.f32 1.0, %v6333_v28  ;;  %4485 = vtanh.f32 %v2180_v63  ;;  %v2182_v62 = vmul.f32 0.7978846, %v2054_v46  ;;  %v2529_v30 = vmul.f32 0.5, %v2401_v26  ;;  %v1354_v63 = vpop.f32.mrf.mxu1 }
 0x351   : > { %7344 = vst [vmem:[#allocation58_spill] sm:$0xff] %v6587_v44  ;;  %v2056_v6 = vadd.f32 %v1928_v20, %v6553_v21  ;;  %v6593_v8 = vmul.f32 0.5, %v2428_v16  ;;  %v6595_v19 = vmul.f32 0.7978846, %v2051_v27  ;;  %v1802_v45 = vmul.f32 %v1674_v15, %v6569_v4  ;;  %v1547_v44 = vpop.f32.mrf.mxu0 }
 0x352   : > { %v2533_v52 = vmul.f32 0.5, %v2405_v40  ;;  %v4476_v43 = vpop.eup %4475  ;;  %v6598_v49 = vmul.f32 0.5, %v2430_v0  ;;  %v2053_v12 = vadd.f32 %v1925_v11, %v6544_v59  ;;  %v2403_v28 = vadd.f32 1.0, %v6329_v56 }
 0x353   : > { %v2184_v9 = vmul.f32 0.7978846, %v2056_v6  ;;  %v2055_v46 = vadd.f32 %v1927_v5, %v6547_v31  ;;  %v2657_v16 = vmul.f32 %v2529_v30, %v6136_v22  ;;  %v2407_v26 = vadd.f32 1.0, %v6344_v36  ;;  %v1358_v30 = vpop.f32.mrf.mxu1 }
 0x354   : > { %v2661_v27 = vmul.f32 %v2533_v52, %v6168_v41  ;;  %4487 = vtanh.f32 %v2182_v62  ;;  %v2531_v15 = vmul.f32 0.5, %v2403_v28  ;;  %v6607_v20 = vadd.f32 %v1350_v24, %v5402_v33  ;;  %v7346_v24 = vld [vmem:[#allocation52_spill] sm:$0xff] }
 0x355   : > { %v6610_v0 = vadd.f32 %v1543_v53, %v5404_v23  ;;  %v6612_v6 = vpop.eup %4477  ;;  %v2432_v56 = vadd.f32 1.0, %v4476_v43  ;;  %v1930_v11 = vmul.f32 0.044715, %v1802_v45  ;;  %v2535_v5 = vmul.f32 0.5, %v2407_v26  ;;  %v7347_v62 = vld [vmem:[#allocation56_spill] sm:$0xff]  ;;  %v7348_v45 = vld [vmem:[#allocation78_spill] sm:$0xff] }
 0x356   : > { %v2749_v40 = vpack.c.bf16 %v2661_v27, %v2657_v16  ;;  %4489 = vtanh.f32 %v2184_v9  ;;  %v1673_v22 = vmul.f32 %v6607_v20, %v6607_v20  ;;  %v2748_v36 = vpack.c.bf16 %v6318_v47, %v6302_v51  ;;  %v7349_v43 = vld [vmem:[#allocation69_spill] sm:$0xff] }
 0x357   : > { %7345 = vst [vmem:[#allocation53_spill] sm:$0xff] %v6610_v0  ;;  %v1675_v41 = vmul.f32 %v6610_v0, %v6610_v0  ;;  %v2659_v53 = vmul.f32 %v2531_v15, %v7346_v24  ;;  %v2663_v52 = vmul.f32 %v2535_v5, %v7347_v62  ;;  %v2750_v28 = vpack.c.bf16 %v7349_v43, %v7348_v45  ;;  %v6656_v45 = vpop.f32.mrf.mxu1 }
 0x358   : > { %3140 = vmatprep.mubr.bf16.mxu1 %v2749_v40  ;;  %v6625_v9 = vadd.f32 %v1352_v18, %v5398_v17  ;;  %v4480_v16 = vpop.eup %4479  ;;  %v1801_v27 = vmul.f32 %v1673_v22, %v6607_v20  ;;  %v6630_v51 = vadd.f32 %v1545_v38, %v5400_v32  ;;  %v6633_v47 = vadd.f32 %v1354_v63, %v5402_v33 }
 0x359   : > { %v1803_v26 = vmul.f32 %v1675_v41, %v6610_v0  ;;  %3141 = vmatmul.mubr.bf16.gmra.mxu1 %v2748_v36  ;;  %v6635_v15 = vpop.eup %4481  ;;  %v2751_v40 = vpack.c.bf16 %v2663_v52, %v2659_v53  ;;  %v6640_v18 = vadd.f32 %v1547_v44, %v5404_v23  ;;  %v6643_v22 = vadd.f32 %v1358_v30, %v5398_v17  ;;  %v1551_v41 = vpop.f32.mrf.mxu0 }
 0x35a   : > { %v1676_v5 = vmul.f32 %v6625_v9, %v6625_v9  ;;  %v1929_v36 = vmul.f32 0.044715, %v1801_v27  ;;  %v1678_v38 = vmul.f32 %v6630_v51, %v6630_v51  ;;  %v1677_v63 = vmul.f32 %v6633_v47, %v6633_v47 }
 0x35b   : > { %7350 = vst [vmem:[#allocation70_spill] sm:$0xff] %v6643_v22  ;;  %v1931_v24 = vmul.f32 0.044715, %v1803_v26  ;;  %v6649_v62 = vpop.eup %4483  ;;  %v2434_v53 = vadd.f32 1.0, %v4480_v16  ;;  %3301 = vmatprep.mubr.bf16.mxu0 %v2751_v40  ;;  %v1679_v44 = vmul.f32 %v6640_v18, %v6640_v18  ;;  %v1680_v30 = vmul.f32 %v6643_v22, %v6643_v22  ;;  %v1553_v59 = vpop.f32.mrf.mxu0 }
 0x35c   : > { %v1804_v52 = vmul.f32 %v1676_v5, %v6625_v9  ;;  %4491 = vtanh.f32 %v6589_v54  ;;  %v2181_v43 = vmul.f32 0.7978846, %v2053_v12  ;;  %v2058_v27 = vadd.f32 %v1930_v11, %v6569_v4  ;;  %3302 = vmatmul.mubr.bf16.gmra.mxu0 %v2750_v28 }
 0x35d   : > { %v1806_v26 = vmul.f32 %v1678_v38, %v6630_v51  ;;  %v4486_v16 = vpop.eup %4485  ;;  %v2057_v40 = vadd.f32 %v1929_v36, %v6607_v20  ;;  %v1805_v21 = vmul.f32 %v1677_v63, %v6633_v47  ;;  %v1807_v31 = vmul.f32 %v1679_v44, %v6640_v18 }
 0x35e   : > { %v1932_v5 = vmul.f32 0.044715, %v1804_v52  ;;  %v6666_v29 = vmul.f32 %v6593_v8, %v6434_v35  ;;  %v2560_v54 = vmul.f32 0.5, %v2432_v56  ;;  %v2183_v12 = vmul.f32 0.7978846, %v2055_v46  ;;  %v1362_v52 = vpop.f32.mrf.mxu1 }
 0x35f   : > { %v2059_v11 = vadd.f32 %v1931_v24, %v6610_v0  ;;  %v2562_v28 = vmul.f32 0.5, %v2434_v53  ;;  %v1934_v4 = vmul.f32 0.044715, %v1806_v26  ;;  %v1808_v36 = vmul.f32 %v1680_v30, %v6643_v22  ;;  %v1555_v53 = vpop.f32.mrf.mxu0 }
 0x360   : > { %v2060_v38 = vadd.f32 %v1932_v5, %v6625_v9  ;;  %v6673_v63 = vmul.f32 %v6598_v49, %v6437_v48  ;;  %4493 = vtanh.f32 %v6595_v19  ;;  %v2436_v44 = vadd.f32 1.0, %v4486_v16 }
 0x361   : > { %v2186_v35 = vmul.f32 0.7978846, %v2058_v27  ;;  %v4488_v8 = vpop.eup %4487  ;;  %4495 = vtanh.f32 %v2181_v43  ;;  %v2185_v46 = vmul.f32 0.7978846, %v2057_v40  ;;  %v1933_v56 = vmul.f32 0.044715, %v1805_v21  ;;  %v1364_v43 = vpop.f32.mrf.mxu1 }
 0x362   : > { %v1935_v24 = vmul.f32 0.044715, %v1807_v31  ;;  %v6677_v5 = vmul.f32 %v2560_v54, %v6455_v42  ;;  %4497 = vtanh.f32 %v2183_v12  ;;  %v2187_v30 = vmul.f32 0.7978846, %v2059_v11  ;;  %v1557_v40 = vpop.f32.mrf.mxu0 }
 0x363   : > { %v2062_v26 = vadd.f32 %v1934_v4, %v6630_v51  ;;  %v4490_v0 = vpop.eup %4489  ;;  %v6681_v48 = vmul.f32 %v2562_v28, %v6473_v7  ;;  %v2188_v19 = vmul.f32 0.7978846, %v2060_v38  ;;  %v1936_v49 = vmul.f32 0.044715, %v1808_v36  ;;  %v6694_v54 = vpop.f32.mrf.mxu1 }
 0x364   : > { %v2409_v27 = vadd.f32 1.0, %v6390_v34  ;;  %v6684_v16 = vadd.f32 1.0, %v4488_v8  ;;  %4499 = vtanh.f32 %v2186_v35  ;;  %v6687_v31 = vadd.f32 %v1551_v41, %v5400_v32  ;;  %v6700_v36 = vpop.f32.mrf.mxu0  ;;  %v7353_v35 = vld [vmem:[#allocation65_spill] sm:$0xff] }
 0x365   : > { %v2413_v42 = vadd.f32 1.0, %v6459_v61  ;;  %v6690_v21 = vmul.f32 0.5, %v2436_v44  ;;  %4501 = vtanh.f32 %v2185_v46  ;;  %v2061_v4 = vadd.f32 %v1933_v56, %v6633_v47  ;;  %v7352_v61 = vld [vmem:[#allocation73_spill] sm:$0xff]  ;;  %v7354_v46 = vld [vmem:[#allocation62_spill] sm:$0xff] }
 0x366   : > { %7351 = vst [vmem:[#allocation68_spill] sm:$0xff] %v6687_v31  ;;  %v2063_v7 = vadd.f32 %v1935_v24, %v6640_v18  ;;  %4503 = vtanh.f32 %v2187_v30  ;;  %v2190_v34 = vmul.f32 0.7978846, %v2062_v26  ;;  %v2537_v12 = vmul.f32 0.5, %v2409_v27  ;;  %v6713_v27 = vpop.f32.mrf.mxu1 }
 0x367   : > { %v2541_v11 = vmul.f32 0.5, %v2413_v42  ;;  %v6696_v28 = vadd.f32 1.0, %v4490_v0  ;;  %4505 = vtanh.f32 %v2188_v19  ;;  %v2064_v41 = vadd.f32 %v1936_v49, %v6643_v22 }
 0x368   : > { %v2411_v38 = vadd.f32 1.0, %v7352_v61  ;;  %v1682_v44 = vmul.f32 %v6687_v31, %v6687_v31  ;;  %v2665_v8 = vmul.f32 %v2537_v12, %v7353_v35  ;;  %v2415_v24 = vadd.f32 1.0, %v6461_v25  ;;  %v7356_v35 = vld [vmem:[#allocation77_spill] sm:$0xff] }
 0x369   : > { %v2669_v56 = vmul.f32 %v2541_v11, %v7354_v46  ;;  %v6707_v30 = vpop.eup %4491  ;;  %v2189_v0 = vmul.f32 0.7978846, %v2061_v4  ;;  %v2191_v26 = vmul.f32 0.7978846, %v2063_v7  ;;  %v6711_v49 = vadd.f32 %v6656_v45, %v5402_v33  ;;  %v7357_v7 = vld [vmem:[#allocation71_spill] sm:$0xff]  ;;  %v6723_v46 = vpop.f32.mrf.mxu0  ;;  %v7358_v45 = vld [vmem:[#allocation66_spill] sm:$0xff] }
 0x36a   : > { %v2539_v19 = vmul.f32 0.5, %v2411_v38  ;;  %4507 = vtanh.f32 %v2190_v34  ;;  %v2543_v61 = vmul.f32 0.5, %v2415_v24  ;;  %v6716_v12 = vadd.f32 %v1553_v59, %v5404_v23 }
 0x36b   : > { %7355 = vst [vmem:[#allocation57_spill] sm:$0xff] %v6711_v49  ;;  %v2753_v42 = vpack.c.bf16 %v2669_v56, %v2665_v8  ;;  %v2192_v11 = vmul.f32 0.7978846, %v2064_v41  ;;  %v1681_v4 = vmul.f32 %v6711_v49, %v6711_v49  ;;  %v2752_v38 = vpack.c.bf16 %v6413_v1, %v7357_v7 }
 0x36c   : > { %v2667_v25 = vmul.f32 %v2539_v19, %v7356_v35  ;;  %v2671_v22 = vmul.f32 %v2543_v61, %v7358_v45  ;;  %v1683_v34 = vmul.f32 %v6716_v12, %v6716_v12  ;;  %v6729_v59 = vadd.f32 %v1362_v52, %v5398_v17 }
 0x36d   : > { %3148 = vmatprep.mubr.bf16.mxu1 %v2753_v42  ;;  %v6732_v41 = vadd.f32 %v1555_v53, %v5400_v32  ;;  %v6734_v8 = vpop.eup %4493  ;;  %v1810_v56 = vmul.f32 %v1682_v44, %v6687_v31  ;;  %v1809_v1 = vmul.f32 %v1681_v4, %v6711_v49  ;;  %v6739_v24 = vadd.f32 %v1364_v43, %v5402_v33  ;;  %v6744_v42 = vpop.f32.mrf.mxu1 }
 0x36e   : > { %3149 = vmatmul.mubr.bf16.gmra.mxu1 %v2752_v38  ;;  %v6742_v19 = vadd.f32 %v1557_v40, %v5404_v23  ;;  %v6746_v17 = vpop.eup %4495  ;;  %v2755_v52 = vpack.c.bf16 %v2671_v22, %v2667_v25  ;;  %v1811_v32 = vmul.f32 %v1683_v34, %v6716_v12  ;;  %v1684_v53 = vmul.f32 %v6729_v59, %v6729_v59  ;;  %v6761_v40 = vpop.f32.mrf.mxu0 }
 0x36f   : > { %7359 = vst [vmem:[#allocation76_spill] sm:$0xff] %v6732_v41  ;;  %v1686_v44 = vmul.f32 %v6732_v41, %v6732_v41  ;;  %v6753_v61 = vpop.eup %4497  ;;  %v1937_v33 = vmul.f32 0.044715, %v1809_v1  ;;  %v2754_v23 = vpack.c.bf16 %v6479_v3, %v6405_v2  ;;  %v1685_v43 = vmul.f32 %v6739_v24, %v6739_v24  ;;  %7360 = vst [vmem:[#allocation55_spill] sm:$0xff] %v6761_v40  ;;  %v6769_v34 = vpop.f32.mrf.mxu1 }
 0x370   : > { %v1687_v22 = vmul.f32 %v6742_v19, %v6742_v19  ;;  %4509 = vtanh.f32 %v2189_v0  ;;  %3309 = vmatprep.mubr.bf16.mxu0 %v2755_v52  ;;  %v1939_v35 = vmul.f32 0.044715, %v1811_v32  ;;  %v1812_v25 = vmul.f32 %v1684_v53, %v6729_v59  ;;  %7361 = vst [vmem:[#allocation61_spill] sm:$0xff] %v6769_v34  ;;  %v6777_v40 = vpop.f32.mrf.mxu0 }
 0x371   : > { %v1814_v4 = vmul.f32 %v1686_v44, %v6732_v41  ;;  %v4500_v7 = vpop.eup %4499  ;;  %v2065_v38 = vadd.f32 %v1937_v33, %v6711_v49  ;;  %3310 = vmatmul.mubr.bf16.gmra.mxu0 %v2754_v23  ;;  %v1813_v2 = vmul.f32 %v1685_v43, %v6739_v24  ;;  %v2417_v45 = vadd.f32 1.0, %v6475_v37 }
 0x372   : > { %v1815_v3 = vmul.f32 %v1687_v22, %v6742_v19  ;;  %v6771_v1 = vpop.eup %4501  ;;  %v1938_v0 = vmul.f32 0.044715, %v1810_v56  ;;  %v2067_v52 = vadd.f32 %v1939_v35, %v6716_v12  ;;  %v1940_v32 = vmul.f32 0.044715, %v1812_v25 }
 0x373   : > { %v1942_v53 = vmul.f32 0.044715, %v1814_v4  ;;  %v6774_v44 = vpop.eup %4503  ;;  %4511 = vtanh.f32 %v2191_v26  ;;  %v2193_v33 = vmul.f32 0.7978846, %v2065_v38  ;;  %v1941_v23 = vmul.f32 0.044715, %v1813_v2  ;;  %v6785_v4 = vpop.f32.mrf.mxu1 }
 0x374   : > { %v2421_v43 = vadd.f32 1.0, %v6524_v55  ;;  %v4506_v22 = vpop.eup %4505  ;;  %v2195_v37 = vmul.f32 0.7978846, %v2067_v52  ;;  %v2068_v49 = vadd.f32 %v1940_v32, %v6729_v59  ;;  %v1943_v56 = vmul.f32 0.044715, %v1815_v3 }
 0x375   : > { %v2070_v34 = vadd.f32 %v1942_v53, %v6732_v41  ;;  %v6782_v35 = vmul.f32 0.5, %v6684_v16  ;;  %4513 = vtanh.f32 %v2192_v11  ;;  %v2069_v25 = vadd.f32 %v1941_v23, %v6739_v24  ;;  %v6793_v11 = vpop.f32.mrf.mxu0  ;;  %v7362_v23 = vld [vmem:[#allocation59_spill] sm:$0xff] }
 0x376   : > { %v2545_v26 = vmul.f32 0.5, %v2417_v45  ;;  %v6789_v55 = vmul.f32 %v6690_v21, %v6530_v50  ;;  %v2066_v38 = vadd.f32 %v1938_v0, %v6687_v31  ;;  %4515 = vtanh.f32 %v2193_v33  ;;  %v7363_v33 = vld [vmem:[#allocation60_spill] sm:$0xff] }
 0x377   : > { %v2196_v2 = vmul.f32 0.7978846, %v2068_v49  ;;  %v4508_v52 = vpop.eup %4507  ;;  %4517 = vtanh.f32 %v2195_v37  ;;  %v2197_v3 = vmul.f32 0.7978846, %v2069_v25  ;;  %v2071_v16 = vadd.f32 %v1943_v56, %v6742_v19  ;;  %v6802_v25 = vpop.f32.mrf.mxu1 }
 0x378   : > { %v2549_v32 = vmul.f32 0.5, %v2421_v43  ;;  %v6796_v45 = vmul.f32 0.5, %v6696_v28  ;;  %v2198_v53 = vmul.f32 0.7978846, %v2070_v34  ;;  %v2419_v50 = vadd.f32 1.0, %v6518_v14  ;;  %v7364_v14 = vld [vmem:[#allocation75_spill] sm:$0xff] }
 0x379   : > { %4519 = vtanh.f32 %v2196_v2  ;;  %v2199_v21 = vmul.f32 0.7978846, %v2071_v16  ;;  %v2673_v0 = vmul.f32 %v2545_v26, %v7362_v23  ;;  %v2423_v37 = vadd.f32 1.0, %v6537_v13  ;;  %v6806_v2 = vpop.f32.mrf.mxu0  ;;  %v6816_v23 = vpop.f32.mrf.mxu1 }
 0x37a   : > { %v2677_v49 = vmul.f32 %v2549_v32, %v7363_v33  ;;  %v2444_v56 = vadd.f32 1.0, %v4506_v22  ;;  %v2194_v43 = vmul.f32 0.7978846, %v2066_v38  ;;  %4521 = vtanh.f32 %v2197_v3  ;;  %v7365_v22 = vld [vmem:[#allocation63_spill] sm:$0xff]  ;;  %v7366_v3 = vld [vmem:[#allocation64_spill] sm:$0xff] }
 0x37b   : > { %v2547_v31 = vmul.f32 0.5, %v2419_v50  ;;  %v6804_v41 = vadd.f32 1.0, %v4500_v7  ;;  %4523 = vtanh.f32 %v2199_v21  ;;  %v2551_v34 = vmul.f32 0.5, %v2423_v37 }
 0x37c   : > { %v2757_v28 = vpack.c.bf16 %v2677_v49, %v2673_v0  ;;  %4525 = vtanh.f32 %v2198_v53  ;;  %v2756_v26 = vpack.c.bf16 %v6500_v10, %v7364_v14  ;;  %v2425_v16 = vadd.f32 1.0, %v6580_v57 }
 0x37d   : > { %v2429_v13 = vadd.f32 1.0, %v6635_v15  ;;  %v4510_v32 = vpop.eup %4509  ;;  %v2675_v38 = vmul.f32 %v2547_v31, %v7365_v22  ;;  %v2679_v7 = vmul.f32 %v2551_v34, %v7366_v3  ;;  %v2427_v50 = vadd.f32 1.0, %v6612_v6  ;;  %v6820_v31 = vpop.f32.mrf.mxu0  ;;  %v7368_v34 = vld [vmem:[#allocation80_spill] sm:$0xff] }
 0x37e   : > { %3156 = vmatprep.mubr.bf16.mxu1 %v2757_v28  ;;  %v2431_v21 = vadd.f32 1.0, %v6649_v62  ;;  %v2572_v53 = vmul.f32 0.5, %v2444_v56  ;;  %4527 = vtanh.f32 %v2194_v43  ;;  %v2553_v10 = vmul.f32 0.5, %v2425_v16  ;;  %v7367_v28 = vld [vmem:[#allocation79_spill] sm:$0xff]  ;;  %v7369_v43 = vld [vmem:[#allocation81_spill] sm:$0xff]  ;;  %v7370_v16 = vld [vmem:[#allocation82_spill] sm:$0xff]  ;;  %v6830_v22 = vpop.f32.mrf.mxu1 }
 0x37f   : > { %3157 = vmatmul.mubr.bf16.gmra.mxu1 %v2756_v26  ;;  %v2557_v0 = vmul.f32 0.5, %v2429_v13  ;;  %v2759_v57 = vpack.c.bf16 %v2679_v7, %v2675_v38  ;;  %v2758_v15 = vpack.c.bf16 %v6566_v60, %v6493_v39  ;;  %v2555_v33 = vmul.f32 0.5, %v2427_v50 }
 0x380   : > { %v2559_v49 = vmul.f32 0.5, %v2431_v21  ;;  %v4512_v37 = vpop.eup %4511  ;;  %v2681_v6 = vmul.f32 %v2553_v10, %v7367_v28  ;;  %v2433_v14 = vadd.f32 1.0, %v6707_v30  ;;  %v2437_v56 = vadd.f32 1.0, %v6746_v17  ;;  %v7372_v28 = vld [vmem:[#allocation85_spill] sm:$0xff] }
 0x381   : > { %v2685_v62 = vmul.f32 %v2557_v0, %v7368_v34  ;;  %3317 = vmatprep.mubr.bf16.mxu0 %v2759_v57  ;;  %v2683_v26 = vmul.f32 %v2555_v33, %v7369_v43  ;;  %v2435_v39 = vadd.f32 1.0, %v6734_v8  ;;  %v2439_v60 = vadd.f32 1.0, %v6753_v61  ;;  %v6834_v33 = vpop.f32.mrf.mxu0  ;;  %v7371_v61 = vld [vmem:[#allocation88_spill] sm:$0xff] }
 0x382   : > { %v2687_v13 = vmul.f32 %v2559_v49, %v7370_v16  ;;  %v4514_v38 = vpop.eup %4513  ;;  %v2446_v3 = vadd.f32 1.0, %v4508_v52  ;;  %3318 = vmatmul.mubr.bf16.gmra.mxu0 %v2758_v15  ;;  %v2561_v50 = vmul.f32 0.5, %v2433_v14  ;;  %v2565_v21 = vmul.f32 0.5, %v2437_v56  ;;  %v7374_v56 = vld [vmem:[#allocation84_spill] sm:$0xff] }
 0x383   : > { %v2761_v7 = vpack.c.bf16 %v2685_v62, %v2681_v6  ;;  %v4516_v30 = vpop.eup %4515  ;;  %v2760_v17 = vpack.c.bf16 %v6666_v29, %v6572_v58  ;;  %v2563_v0 = vmul.f32 0.5, %v2435_v39  ;;  %v2567_v57 = vmul.f32 0.5, %v2439_v60  ;;  %v7373_v62 = vld [vmem:[#allocation87_spill] sm:$0xff] }
 0x384   : > { %v2763_v10 = vpack.c.bf16 %v2687_v13, %v2683_v26  ;;  %v4518_v8 = vpop.eup %4517  ;;  %v2689_v49 = vmul.f32 %v2561_v50, %v7371_v61  ;;  %v2693_v34 = vmul.f32 %v2565_v21, %v7372_v28  ;;  %v2441_v52 = vadd.f32 1.0, %v6771_v1  ;;  %v7375_v50 = vld [vmem:[#allocation83_spill] sm:$0xff] }
 0x385   : > { %3164 = vmatprep.mubr.bf16.mxu1 %v2761_v7  ;;  %v2445_v15 = vadd.f32 1.0, %v4510_v32  ;;  %v2691_v14 = vmul.f32 %v2563_v0, %v7373_v62  ;;  %v2695_v43 = vmul.f32 %v2567_v57, %v7374_v56  ;;  %v2443_v29 = vadd.f32 1.0, %v6774_v44  ;;  %v6842_v26 = vpop.f32.mrf.mxu1  ;;  %v7376_v32 = vld [vmem:[#allocation86_spill] sm:$0xff] }
 0x386   : > { %v4520_v6 = vpop.eup %4519  ;;  %3325 = vmatprep.mubr.bf16.mxu0 %v2763_v10  ;;  %v2447_v58 = vadd.f32 1.0, %v4512_v37  ;;  %v2574_v16 = vmul.f32 0.5, %v2446_v3  ;;  %v2765_v13 = vpack.c.bf16 %v2693_v34, %v2689_v49  ;;  %v2569_v39 = vmul.f32 0.5, %v2441_v52 }
 0x387   : > { %3165 = vmatmul.mubr.bf16.gmra.mxu1 %v2760_v17  ;;  %v2573_v60 = vmul.f32 0.5, %v2445_v15  ;;  %v4522_v7 = vpop.eup %4521  ;;  %v2694_v1 = vmul.f32 %v6782_v35, %v7375_v50  ;;  %v6848_v21 = vmul.f32 %v6796_v45, %v7376_v32  ;;  %v2767_v10 = vpack.c.bf16 %v2695_v43, %v2691_v14  ;;  %v6850_v57 = vpop.f32.mrf.mxu0  ;;  %v7377_v17 = vld [vmem:[#allocation58_spill] sm:$0xff] }
 0x388   : > { %v2575_v0 = vmul.f32 0.5, %v2447_v58  ;;  %v4524_v44 = vpop.eup %4523  ;;  %v6853_v37 = vmul.f32 0.5, %v6804_v41  ;;  %v6856_v3 = vmul.f32 %v2572_v53, %v6625_v9  ;;  %v2762_v61 = vpack.c.bf16 %v6673_v63, %v7377_v17  ;;  %3172 = vmatprep.mubr.bf16.mxu1 %v2765_v13  ;;  %v3828_v49 = vpop.f32.mrf.mxu1  ;;  %v6870_v43 = vld [vmem:[#allocation5 + $0x2] ss:$0 sm:$0xff]  ;;  %v7381_v17 = vld [vmem:[#allocation55_spill] sm:$0xff] }
 0x389   : > { %v2701_v35 = vmul.f32 %v2573_v60, %v6633_v47  ;;  %v4526_v45 = vpop.eup %4525  ;;  %v6861_v28 = vadd.f32 1.0, %v4514_v38  ;;  %v2452_v34 = vadd.f32 1.0, %v4520_v6  ;;  %v2697_v52 = vmul.f32 %v2569_v39, %v6607_v20  ;;  %v3940_v62 = vpop.f32.mrf.mxu0 }
 0x38a   : > { %v2571_v15 = vmul.f32 0.5, %v2443_v29  ;;  %v6865_v41 = vmul.f32 %v2574_v16, %v6630_v51  ;;  %3326 = vmatmul.mubr.bf16.gmra.mxu0 %v2762_v61  ;;  %v2764_v9 = vpack.c.bf16 %v6789_v55, %v6677_v5  ;;  %v2449_v53 = vadd.f32 1.0, %v4516_v30  ;;  %v3830_v5 = vpop.f32.mrf.mxu1  ;;  %v7378_v16 = vld [vmem:[#allocation53_spill] sm:$0xff] }
 0x38b   : > { %v2453_v63 = vadd.f32 1.0, %v4522_v7  ;;  %v4528_v14 = vpop.eup %4527  ;;  %3333 = vmatprep.mubr.bf16.mxu0 %v2767_v10  ;;  %v2769_v47 = vpack.c.bf16 %v2701_v35, %v2697_v52  ;;  %v2703_v38 = vmul.f32 %v2575_v0, %v6640_v18  ;;  %v2451_v56 = vadd.f32 1.0, %v4518_v8  ;;  %v3942_v50 = vpop.f32.mrf.mxu0  ;;  %v7380_v10 = vld [vmem:[#allocation57_spill] sm:$0xff] }
 0x38c   : > { %v2455_v6 = vadd.f32 1.0, %v4524_v44  ;;  %v2766_v20 = vpack.c.bf16 %v2694_v1, %v6681_v48  ;;  %v2577_v51 = vmul.f32 0.5, %v2449_v53  ;;  %v3817_v58 = vadd.f32 %v6713_v27, %v6694_v54  ;;  %v7379_v48 = vld [vmem:[#allocation61_spill] sm:$0xff] }
 0x38d   : > { %v2581_v29 = vmul.f32 0.5, %v2453_v63  ;;  %v2580_v55 = vmul.f32 0.5, %v2452_v34  ;;  %v2454_v30 = vadd.f32 1.0, %v4526_v45  ;;  %v2699_v13 = vmul.f32 %v2571_v15, %v7378_v16 }
 0x38e   : > { %v2583_v39 = vmul.f32 0.5, %v2455_v6  ;;  %v3071_v8 = vadd.f32 %v3817_v58, %v6870_v43  ;;  %v3929_v60 = vadd.f32 %v6723_v46, %v6700_v36  ;;  %v3820_v7 = vadd.f32 %v7379_v48, %v6744_v42  ;;  %v3831_v46 = vpop.f32.mrf.mxu1 }
 0x38f   : > { %3173 = vmatmul.mubr.bf16.gmra.mxu1 %v2764_v9  ;;  %v2709_v18 = vmul.f32 %v2581_v29, %v6739_v24  ;;  %v2771_v54 = vpack.c.bf16 %v2703_v38, %v2699_v13  ;;  %v2768_v27 = vpack.c.bf16 %v6856_v3, %v6848_v21  ;;  %v2579_v1 = vmul.f32 0.5, %v2451_v56  ;;  %v7382_v3 = vld [vmem:[#allocation19_spill] sm:$0xff]  ;;  %v7389_v13 = vld [vmem:[#allocation70_spill] sm:$0xff] }
 0x390   : > { %3180 = vmatprep.mubr.bf16.mxu1 %v2769_v47  ;;  %v3823_v32 = vadd.f32 %v6802_v25, %v6785_v4  ;;  %v2705_v24 = vmul.f32 %v2577_v51, %v7380_v10  ;;  %v3232_v0 = vadd.f32 %v3929_v60, %v3071_v8  ;;  %v3074_v44 = vadd.f32 %v3820_v7, %v6870_v43  ;;  %v7390_v8 = vld [vmem:[#allocation76_spill] sm:$0xff] }
 0x391   : > { %v3932_v36 = vadd.f32 %v6777_v40, %v7381_v17  ;;  %v2711_v42 = vmul.f32 %v2583_v39, %v6742_v19  ;;  %v3935_v21 = vadd.f32 %v6806_v2, %v6793_v11  ;;  %v3826_v4 = vadd.f32 %v6830_v22, %v6816_v23  ;;  %v3943_v40 = vpop.f32.mrf.mxu0  ;;  %v7383_v2 = vld [vmem:[#allocation20_spill] sm:$0xff] }
 0x392   : > { %v3079_v61 = vadd.f32 %v3823_v32, %v6870_v43  ;;  %3334 = vmatmul.mubr.bf16.gmra.mxu0 %v2766_v20  ;;  %v2773_v25 = vpack.c.bf16 %v2709_v18, %v2705_v24  ;;  %v3358_v35 = vadd.f32 %v3232_v0, %v7382_v3  ;;  %v3829_v34 = vadd.f32 %v3828_v49, %v6842_v26  ;;  %v7384_v49 = vld [vmem:[#allocation21_spill] sm:$0xff]  ;;  %v7391_v7 = vld [vmem:[#allocation68_spill] sm:$0xff] }
 0x393   : > { %v3235_v45 = vadd.f32 %v3932_v36, %v3074_v44  ;;  %3341 = vmatprep.mubr.bf16.mxu0 %v2771_v54  ;;  %v3082_v19 = vadd.f32 %v3826_v4, %v6870_v43  ;;  %v3938_v15 = vadd.f32 %v6834_v33, %v6820_v31  ;;  %v3832_v9 = vadd.f32 %v3831_v46, %v3830_v5  ;;  %v7392_v46 = vld [vmem:[#allocation25_spill] sm:$0xff] }
 0x394   : > { %v3240_v52 = vadd.f32 %v3935_v21, %v3079_v61  ;;  %v2707_v11 = vmul.f32 %v2579_v1, %v6716_v12  ;;  %3390 = vst [vmem:[%s6904_s28] sm:$0xff] %v3358_v35  ;;  %v3087_v22 = vadd.f32 %v3829_v34, %v6870_v43  ;;  %v3941_v26 = vadd.f32 %v3940_v62, %v6850_v57  ;;  %v7385_v12 = vld [vmem:[#allocation72_spill] sm:$0xff]  ;;  %v7386_v62 = vld [vmem:[#allocation22_spill] sm:$0xff] }
 0x395   : > { %v3359_v23 = vadd.f32 %v3235_v45, %v7383_v2  ;;  %v3243_v63 = vadd.f32 %v3938_v15, %v3082_v19  ;;  %v3090_v31 = vadd.f32 %v3832_v9, %v6870_v43  ;;  %v3944_v33 = vadd.f32 %v3943_v40, %v3942_v50 }
 0x396   : > { %v3360_v53 = vadd.f32 %v3240_v52, %v7384_v49  ;;  %v2698_v47 = vmul.f32 %v6853_v37, %v7385_v12  ;;  %v2576_v38 = vmul.f32 0.5, %v6861_v28  ;;  %v2450_v56 = vadd.f32 1.0, %v4528_v14  ;;  %v7387_v37 = vld [vmem:[#allocation23_spill] sm:$0xff]  ;;  %v7388_v28 = vld [vmem:[#allocation24_spill] sm:$0xff] }
 0x397   : > { %3181 = vmatmul.mubr.bf16.gmra.mxu1 %v2768_v27  ;;  %3391 = vst [vmem:[%s6904_s28 + $0x8] sm:$0xff] %v3359_v23  ;;  %v3248_v6 = vadd.f32 %v3941_v26, %v3087_v22  ;;  %v2775_v57 = vpack.c.bf16 %v2711_v42, %v2707_v11  ;;  %v3361_v20 = vadd.f32 %v3243_v63, %v7386_v62  ;;  %v2582_v58 = vmul.f32 0.5, %v2454_v30  ;;  %v7395_v12 = vld [vmem:[#allocation28_spill] sm:$0xff] }
 0x398   : > { %3188 = vmatprep.mubr.bf16.mxu1 %v2773_v25  ;;  %3392 = vst [vmem:[%s6904_s28 + $0x10] sm:$0xff] %v3360_v53  ;;  %v3251_v51 = vadd.f32 %v3944_v33, %v3090_v31  ;;  %v2708_v29 = vmul.f32 %v2580_v55, %v6729_v59  ;;  %v2770_v5 = vpack.c.bf16 %v6865_v41, %v2698_v47  ;;  %v2578_v18 = vmul.f32 0.5, %v2450_v56  ;;  %v7393_v25 = vld [vmem:[#allocation26_spill] sm:$0xff]  ;;  %v7394_v53 = vld [vmem:[#allocation27_spill] sm:$0xff] }
 0x399   : > { %v3362_v16 = vadd.f32 %v3248_v6, %v7387_v37  ;;  %3393 = vst [vmem:[%s6904_s28 + $0x18] sm:$0xff] %v3361_v20  ;;  %v2704_v39 = vmul.f32 %v2576_v38, %v7389_v13  ;;  %v2710_v60 = vmul.f32 %v2582_v58, %v7390_v8 }
 0x39a   : > { %v3363_v14 = vadd.f32 %v3251_v51, %v7388_v28  ;;  %3342 = vmatmul.mubr.bf16.gmra.mxu0 %v2770_v5  ;;  %v2706_v59 = vmul.f32 %v2578_v18, %v7391_v7 }
 0x39b   : > { %3394 = vst [vmem:[%s6904_s28 + $0x20] sm:$0xff] %v3362_v16  ;;  %3349 = vmatprep.mubr.bf16.mxu0 %v2775_v57  ;;  %v2772_v48 = vpack.c.bf16 %v2708_v29, %v2704_v39 }
 0x39c   : > { %3395 = vst [vmem:[%s6904_s28 + $0x28] sm:$0xff] %v3363_v14  ;;  %v2774_v30 = vpack.c.bf16 %v2710_v60, %v2706_v59  ;;  %v7396_v14 = vld [vmem:[#allocation29_spill] sm:$0xff]  ;;  %v7397_v60 = vld [vmem:[#allocation30_spill] sm:$0xff] }
 0x39e   : > { %v3833_v55 = vpop.f32.mrf.mxu1 }
 0x39f   : > { %3189 = vmatmul.mubr.bf16.gmra.mxu1 %v2772_v48  ;;  %v3945_v41 = vpop.f32.mrf.mxu0 }
 0x3a0   : > { %v3834_v50 = vpop.f32.mrf.mxu1 }
 0x3a1   : > { %v3835_v54 = vadd.f32 %v3834_v50, %v3833_v55  ;;  %v3946_v27 = vpop.f32.mrf.mxu0 }
 0x3a2   : > { %3350 = vmatmul.mubr.bf16.gmra.mxu0 %v2774_v30  ;;  %v3836_v1 = vpop.f32.mrf.mxu1  ;;  %v3947_v10 = vadd.f32 %v3946_v27, %v3945_v41 }
 0x3a3   : > { %v3095_v32 = vadd.f32 %v3835_v54, %v6870_v43  ;;  %v3948_v24 = vpop.f32.mrf.mxu0 }
 0x3a4   : > { %v3837_v0 = vpop.f32.mrf.mxu1 }
 0x3a5   : > { %v3256_v44 = vadd.f32 %v3947_v10, %v3095_v32  ;;  %v3838_v17 = vadd.f32 %v3837_v0, %v3836_v1  ;;  %v3949_v36 = vpop.f32.mrf.mxu0 }
 0x3a6   : > { %v3950_v21 = vadd.f32 %v3949_v36, %v3948_v24 }
 0x3a7   : > { %v3364_v42 = vadd.f32 %v3256_v44, %v7392_v46  ;;  %v3098_v61 = vadd.f32 %v3838_v17, %v6870_v43  ;;  %v7398_v44 = vld [vmem:[#allocation31_spill] sm:$0xff] }
 0x3a9   : > { %3396 = vst [vmem:[%s6904_s28 + $0x30] sm:$0xff] %v3364_v42  ;;  %v3259_v4 = vadd.f32 %v3950_v21, %v3098_v61  ;;  %v7399_v61 = vld [vmem:[#allocation32_spill] sm:$0xff] }
 0x3ab   : > { %v3365_v3 = vadd.f32 %v3259_v4, %v7393_v25 }
 0x3ad   : > { %3397 = vst [vmem:[%s6904_s28 + $0x38] sm:$0xff] %v3365_v3 }
 0x3af   : > { %v3839_v35 = vpop.f32.mrf.mxu1 }
 0x3b1   : > { %v3840_v45 = vpop.f32.mrf.mxu1 }
 0x3b2   : > { %v3841_v34 = vadd.f32 %v3840_v45, %v3839_v35 }
 0x3b3   : > { %v3842_v40 = vpop.f32.mrf.mxu1 }
 0x3b4   : > { %v3951_v52 = vpop.f32.mrf.mxu0  ;;  %v3103_v19 = vadd.f32 %v3841_v34, %v6870_v43 }
 0x3b5   : > { %v3843_v15 = vpop.f32.mrf.mxu1 }
 0x3b6   : > { %v3952_v9 = vpop.f32.mrf.mxu0  ;;  %v3844_v11 = vadd.f32 %v3843_v15, %v3842_v40 }
 0x3b7   : > { %v3953_v2 = vadd.f32 %v3952_v9, %v3951_v52 }
 0x3b8   : > { %v3954_v23 = vpop.f32.mrf.mxu0  ;;  %v3106_v26 = vadd.f32 %v3844_v11, %v6870_v43 }
 0x3b9   : > { %v3264_v22 = vadd.f32 %v3953_v2, %v3103_v19 }
 0x3ba   : > { %v3955_v49 = vpop.f32.mrf.mxu0 }
 0x3bb   : > { %v3366_v63 = vadd.f32 %v3264_v22, %v7394_v53  ;;  %v3956_v31 = vadd.f32 %v3955_v49, %v3954_v23  ;;  %v7400_v22 = vld [vmem:[#allocation33_spill] sm:$0xff] }
 0x3bd   : > { %3398 = vst [vmem:[%s6904_s28 + $0x40] sm:$0xff] %v3366_v63  ;;  %v3267_v33 = vadd.f32 %v3956_v31, %v3106_v26  ;;  %v7401_v63 = vld [vmem:[#allocation34_spill] sm:$0xff] }
 0x3bf   : > { %v3367_v47 = vadd.f32 %v3267_v33, %v7395_v12 }
 0x3c1   : > { %3399 = vst [vmem:[%s6904_s28 + $0x48] sm:$0xff] %v3367_v47 }
 0x3c7   : > { %v3845_v38 = vpop.f32.mrf.mxu1 }
 0x3c9   : > { %v3957_v56 = vpop.f32.mrf.mxu0  ;;  %v3846_v6 = vpop.f32.mrf.mxu1 }
 0x3ca   : > { %v3847_v57 = vadd.f32 %v3846_v6, %v3845_v38 }
 0x3cb   : > { %v3958_v62 = vpop.f32.mrf.mxu0  ;;  %v3848_v20 = vpop.f32.mrf.mxu1 }
 0x3cc   : > { %v3111_v51 = vadd.f32 %v3847_v57, %v6870_v43  ;;  %v3959_v29 = vadd.f32 %v3958_v62, %v3957_v56 }
 0x3cd   : > { %v3960_v58 = vpop.f32.mrf.mxu0  ;;  %v3849_v5 = vpop.f32.mrf.mxu1 }
 0x3ce   : > { %v3272_v37 = vadd.f32 %v3959_v29, %v3111_v51  ;;  %v3850_v16 = vadd.f32 %v3849_v5, %v3848_v20 }
 0x3cf   : > { %v3961_v28 = vpop.f32.mrf.mxu0 }
 0x3d0   : > { %v3368_v13 = vadd.f32 %v3272_v37, %v7396_v14  ;;  %v3114_v39 = vadd.f32 %v3850_v16, %v6870_v43  ;;  %v3962_v18 = vadd.f32 %v3961_v28, %v3960_v58  ;;  %v7402_v37 = vld [vmem:[#allocation35_spill] sm:$0xff] }
 0x3d2   : > { %3400 = vst [vmem:[%s6904_s28 + $0x50] sm:$0xff] %v3368_v13  ;;  %v3275_v8 = vadd.f32 %v3962_v18, %v3114_v39  ;;  %v7403_v39 = vld [vmem:[#allocation36_spill] sm:$0xff] }
 0x3d4   : > { %v3369_v48 = vadd.f32 %v3275_v8, %v7397_v60 }
 0x3d6   : > { %3401 = vst [vmem:[%s6904_s28 + $0x58] sm:$0xff] %v3369_v48 }
 0x3da   : > { %v3851_v7 = vpop.f32.mrf.mxu1 }
 0x3dc   : > { %v3963_v59 = vpop.f32.mrf.mxu0  ;;  %v3852_v55 = vpop.f32.mrf.mxu1 }
 0x3dd   : > { %v3853_v41 = vadd.f32 %v3852_v55, %v3851_v7 }
 0x3de   : > { %v3964_v30 = vpop.f32.mrf.mxu0  ;;  %v3854_v50 = vpop.f32.mrf.mxu1 }
 0x3df   : > { %v3119_v54 = vadd.f32 %v3853_v41, %v6870_v43  ;;  %v3965_v27 = vadd.f32 %v3964_v30, %v3963_v59 }
 0x3e0   : > { %v3966_v1 = vpop.f32.mrf.mxu0  ;;  %v3855_v32 = vpop.f32.mrf.mxu1 }
 0x3e1   : > { %v3280_v10 = vadd.f32 %v3965_v27, %v3119_v54  ;;  %v3856_v24 = vadd.f32 %v3855_v32, %v3854_v50 }
 0x3e2   : > { %v3967_v0 = vpop.f32.mrf.mxu0 }
 0x3e3   : > { %v3370_v17 = vadd.f32 %v3280_v10, %v7398_v44  ;;  %v3122_v36 = vadd.f32 %v3856_v24, %v6870_v43  ;;  %v3968_v46 = vadd.f32 %v3967_v0, %v3966_v1  ;;  %v7404_v24 = vld [vmem:[#allocation37_spill] sm:$0xff] }
 0x3e5   : > { %3402 = vst [vmem:[%s6904_s28 + $0x60] sm:$0xff] %v3370_v17  ;;  %v3283_v42 = vadd.f32 %v3968_v46, %v3122_v36  ;;  %v7405_v36 = vld [vmem:[#allocation38_spill] sm:$0xff] }
 0x3e7   : > { %v3371_v21 = vadd.f32 %v3283_v42, %v7399_v61 }
 0x3e9   : > { %3403 = vst [vmem:[%s6904_s28 + $0x68] sm:$0xff] %v3371_v21 }
 0x3ed   : > { %v3857_v4 = vpop.f32.mrf.mxu1 }
 0x3ef   : > { %v3858_v25 = vpop.f32.mrf.mxu1 }
 0x3f0   : > { %v3859_v3 = vadd.f32 %v3858_v25, %v3857_v4 }
 0x3f1   : > { %v3860_v35 = vpop.f32.mrf.mxu1 }
 0x3f2   : > { %v3127_v34 = vadd.f32 %v3859_v3, %v6870_v43 }
 0x3f3   : > { %v3969_v45 = vpop.f32.mrf.mxu0  ;;  %v3861_v40 = vpop.f32.mrf.mxu1 }
 0x3f4   : > { %v3862_v19 = vadd.f32 %v3861_v40, %v3860_v35 }
 0x3f5   : > { %v3970_v52 = vpop.f32.mrf.mxu0 }
 0x3f6   : > { %v3971_v15 = vadd.f32 %v3970_v52, %v3969_v45  ;;  %v3130_v2 = vadd.f32 %v3862_v19, %v6870_v43 }
 0x3f7   : > { %v3972_v9 = vpop.f32.mrf.mxu0 }
 0x3f8   : > { %v3288_v11 = vadd.f32 %v3971_v15, %v3127_v34 }
 0x3f9   : > { %v3973_v23 = vpop.f32.mrf.mxu0 }
 0x3fa   : > { %v3372_v26 = vadd.f32 %v3288_v11, %v7400_v22  ;;  %v3974_v49 = vadd.f32 %v3973_v23, %v3972_v9  ;;  %v7406_v11 = vld [vmem:[#allocation39_spill] sm:$0xff] }
 0x3fc   : > { %3404 = vst [vmem:[%s6904_s28 + $0x70] sm:$0xff] %v3372_v26  ;;  %v3291_v53 = vadd.f32 %v3974_v49, %v3130_v2  ;;  %v7407_v26 = vld [vmem:[#allocation40_spill] sm:$0xff] }
 0x3fe   : > { %v3373_v31 = vadd.f32 %v3291_v53, %v7401_v63 }
 0x400   : > { %3405 = vst [vmem:[%s6904_s28 + $0x78] sm:$0xff] %v3373_v31 }
 0x404   : > { %v3863_v33 = vpop.f32.mrf.mxu1 }
 0x406   : > { %v3864_v47 = vpop.f32.mrf.mxu1 }
 0x407   : > { %v3975_v12 = vpop.f32.mrf.mxu0  ;;  %v3865_v38 = vadd.f32 %v3864_v47, %v3863_v33 }
 0x408   : > { %v3866_v6 = vpop.f32.mrf.mxu1 }
 0x409   : > { %v3976_v56 = vpop.f32.mrf.mxu0  ;;  %v3135_v57 = vadd.f32 %v3865_v38, %v6870_v43 }
 0x40a   : > { %v3977_v62 = vadd.f32 %v3976_v56, %v3975_v12  ;;  %v3867_v51 = vpop.f32.mrf.mxu1 }
 0x40b   : > { %v3978_v20 = vpop.f32.mrf.mxu0  ;;  %v3868_v58 = vadd.f32 %v3867_v51, %v3866_v6 }
 0x40c   : > { %v3296_v29 = vadd.f32 %v3977_v62, %v3135_v57 }
 0x40d   : > { %v3979_v5 = vpop.f32.mrf.mxu0  ;;  %v3138_v28 = vadd.f32 %v3868_v58, %v6870_v43 }
 0x40e   : > { %v3374_v16 = vadd.f32 %v3296_v29, %v7402_v37  ;;  %v3980_v14 = vadd.f32 %v3979_v5, %v3978_v20  ;;  %v7408_v37 = vld [vmem:[#allocation41_spill] sm:$0xff] }
 0x410   : > { %3406 = vst [vmem:[%s6904_s28 + $0x80] sm:$0xff] %v3374_v16  ;;  %v3299_v13 = vadd.f32 %v3980_v14, %v3138_v28 }
 0x412   : > { %v3375_v18 = vadd.f32 %v3299_v13, %v7403_v39 }
 0x414   : > { %3407 = vst [vmem:[%s6904_s28 + $0x88] sm:$0xff] %v3375_v18 }
 0x419   : > { %v3869_v8 = vpop.f32.mrf.mxu1 }
 0x41b   : > { %v3870_v60 = vpop.f32.mrf.mxu1 }
 0x41c   : > { %v3871_v48 = vadd.f32 %v3870_v60, %v3869_v8  ;;  %v3981_v7 = vpop.f32.mrf.mxu0 }
 0x41d   : > { %v3872_v59 = vpop.f32.mrf.mxu1 }
 0x41e   : > { %v3143_v55 = vadd.f32 %v3871_v48, %v6870_v43  ;;  %v3982_v41 = vpop.f32.mrf.mxu0 }
 0x41f   : > { %v3873_v30 = vpop.f32.mrf.mxu1  ;;  %v3983_v50 = vadd.f32 %v3982_v41, %v3981_v7  ;;  %v7409_v7 = vld [vmem:[#allocation42_spill] sm:$0xff] }
 0x420   : > { %v3874_v54 = vadd.f32 %v3873_v30, %v3872_v59  ;;  %v3984_v27 = vpop.f32.mrf.mxu0 }
 0x421   : > { %v3304_v1 = vadd.f32 %v3983_v50, %v3143_v55 }
 0x422   : > { %v3146_v32 = vadd.f32 %v3874_v54, %v6870_v43  ;;  %v3985_v10 = vpop.f32.mrf.mxu0 }
 0x423   : > { %v3376_v0 = vadd.f32 %v3304_v1, %v7404_v24  ;;  %v3986_v44 = vadd.f32 %v3985_v10, %v3984_v27  ;;  %v7410_v10 = vld [vmem:[#allocation43_spill] sm:$0xff] }
 0x425   : > { %3408 = vst [vmem:[%s6904_s28 + $0x90] sm:$0xff] %v3376_v0  ;;  %v3307_v17 = vadd.f32 %v3986_v44, %v3146_v32 }
 0x427   : > { %v3377_v46 = vadd.f32 %v3307_v17, %v7405_v36 }
 0x429   : > { %3409 = vst [vmem:[%s6904_s28 + $0x98] sm:$0xff] %v3377_v46 }
 0x42e   : > { %v3875_v42 = vpop.f32.mrf.mxu1 }
 0x430   : > { %v3876_v61 = vpop.f32.mrf.mxu1 }
 0x431   : > { %v3877_v21 = vadd.f32 %v3876_v61, %v3875_v42  ;;  %v3987_v4 = vpop.f32.mrf.mxu0 }
 0x432   : > { %v3878_v25 = vpop.f32.mrf.mxu1 }
 0x433   : > { %v3151_v3 = vadd.f32 %v3877_v21, %v6870_v43  ;;  %v3988_v35 = vpop.f32.mrf.mxu0 }
 0x434   : > { %v3879_v45 = vpop.f32.mrf.mxu1  ;;  %v3989_v34 = vadd.f32 %v3988_v35, %v3987_v4  ;;  %v7411_v4 = vld [vmem:[#allocation44_spill] sm:$0xff] }
 0x435   : > { %v3880_v40 = vadd.f32 %v3879_v45, %v3878_v25  ;;  %v3990_v52 = vpop.f32.mrf.mxu0 }
 0x436   : > { %v3312_v19 = vadd.f32 %v3989_v34, %v3151_v3 }
 0x437   : > { %v3154_v15 = vadd.f32 %v3880_v40, %v6870_v43  ;;  %v3991_v9 = vpop.f32.mrf.mxu0 }
 0x438   : > { %v3378_v2 = vadd.f32 %v3312_v19, %v7406_v11  ;;  %v3992_v23 = vadd.f32 %v3991_v9, %v3990_v52  ;;  %v7412_v9 = vld [vmem:[#allocation45_spill] sm:$0xff] }
 0x43a   : > { %3410 = vst [vmem:[%s6904_s28 + $0xa0] sm:$0xff] %v3378_v2  ;;  %v3315_v22 = vadd.f32 %v3992_v23, %v3154_v15 }
 0x43c   : > { %v3379_v49 = vadd.f32 %v3315_v22, %v7407_v26 }
 0x43e   : > { %3411 = vst [vmem:[%s6904_s28 + $0xa8] sm:$0xff] %v3379_v49 }
 0x43f   : > { %v3881_v53 = vpop.f32.mrf.mxu1 }
 0x441   : > { %v3882_v63 = vpop.f32.mrf.mxu1 }
 0x442   : > { %v3883_v31 = vadd.f32 %v3882_v63, %v3881_v53  ;;  %v3993_v33 = vpop.f32.mrf.mxu0 }
 0x443   : > { %v3884_v12 = vpop.f32.mrf.mxu1 }
 0x444   : > { %v3159_v47 = vadd.f32 %v3883_v31, %v6870_v43  ;;  %v3994_v38 = vpop.f32.mrf.mxu0 }
 0x445   : > { %v3885_v56 = vpop.f32.mrf.mxu1  ;;  %v3995_v6 = vadd.f32 %v3994_v38, %v3993_v33  ;;  %v7413_v33 = vld [vmem:[#allocation46_spill] sm:$0xff] }
 0x446   : > { %v3886_v57 = vadd.f32 %v3885_v56, %v3884_v12  ;;  %v3996_v62 = vpop.f32.mrf.mxu0 }
 0x447   : > { %v3887_v20 = vpop.f32.mrf.mxu1  ;;  %v3320_v51 = vadd.f32 %v3995_v6, %v3159_v47 }
 0x448   : > { %v3162_v29 = vadd.f32 %v3886_v57, %v6870_v43  ;;  %v3997_v58 = vpop.f32.mrf.mxu0 }
 0x449   : > { %v3888_v5 = vpop.f32.mrf.mxu1  ;;  %v3380_v16 = vadd.f32 %v3320_v51, %v7408_v37  ;;  %v3998_v28 = vadd.f32 %v3997_v58, %v3996_v62 }
 0x44a   : > { %v3889_v14 = vadd.f32 %v3888_v5, %v3887_v20  ;;  %v3999_v13 = vpop.f32.mrf.mxu0 }
 0x44b   : > { %v3890_v39 = vpop.f32.mrf.mxu1  ;;  %3412 = vst [vmem:[%s6904_s28 + $0xb0] sm:$0xff] %v3380_v16  ;;  %v3323_v18 = vadd.f32 %v3998_v28, %v3162_v29  ;;  %v7414_v29 = vld [vmem:[#allocation47_spill] sm:$0xff] }
 0x44c   : > { %v3167_v8 = vadd.f32 %v3889_v14, %v6870_v43  ;;  %v4000_v60 = vpop.f32.mrf.mxu0 }
 0x44d   : > { %v3891_v48 = vpop.f32.mrf.mxu1  ;;  %v3381_v59 = vadd.f32 %v3323_v18, %v7409_v7  ;;  %v4001_v55 = vadd.f32 %v4000_v60, %v3999_v13 }
 0x44e   : > { %v3892_v41 = vadd.f32 %v3891_v48, %v3890_v39  ;;  %v4002_v30 = vpop.f32.mrf.mxu0 }
 0x44f   : > { %v3893_v50 = vpop.f32.mrf.mxu1  ;;  %3413 = vst [vmem:[%s6904_s28 + $0xb8] sm:$0xff] %v3381_v59  ;;  %v3328_v54 = vadd.f32 %v4001_v55, %v3167_v8  ;;  %v7415_v8 = vld [vmem:[#allocation48_spill] sm:$0xff] }
 0x450   : > { %v3170_v27 = vadd.f32 %v3892_v41, %v6870_v43  ;;  %v4003_v1 = vpop.f32.mrf.mxu0 }
 0x451   : > { %v3894_v32 = vpop.f32.mrf.mxu1  ;;  %v3382_v24 = vadd.f32 %v3328_v54, %v7410_v10  ;;  %v4004_v0 = vadd.f32 %v4003_v1, %v4002_v30 }
 0x452   : > { %v3895_v44 = vadd.f32 %v3894_v32, %v3893_v50  ;;  %v4005_v17 = vpop.f32.mrf.mxu0  ;;  %v7416_v50 = vld [vmem:[#allocation49_spill] sm:$0xff]  ;;  %v7417_v32 = vld [vmem:[#allocation50_spill] sm:$0xff] }
 0x453   : > { %v3896_v36 = vpop.f32.mrf.mxu1  ;;  %3414 = vst [vmem:[%s6904_s28 + $0xc0] sm:$0xff] %v3382_v24  ;;  %v3331_v46 = vadd.f32 %v4004_v0, %v3170_v27 }
 0x454   : > { %v3175_v42 = vadd.f32 %v3895_v44, %v6870_v43  ;;  %v4006_v61 = vpop.f32.mrf.mxu0 }
 0x455   : > { %v3897_v21 = vpop.f32.mrf.mxu1  ;;  %v3383_v25 = vadd.f32 %v3331_v46, %v7411_v4  ;;  %v4007_v3 = vadd.f32 %v4006_v61, %v4005_v17 }
 0x456   : > { %v3898_v35 = vadd.f32 %v3897_v21, %v3896_v36  ;;  %v4008_v45 = vpop.f32.mrf.mxu0 }
 0x457   : > { %v3899_v34 = vpop.f32.mrf.mxu1  ;;  %3415 = vst [vmem:[%s6904_s28 + $0xc8] sm:$0xff] %v3383_v25  ;;  %v3336_v40 = vadd.f32 %v4007_v3, %v3175_v42 }
 0x458   : > { %v3178_v52 = vadd.f32 %v3898_v35, %v6870_v43  ;;  %v4009_v19 = vpop.f32.mrf.mxu0 }
 0x459   : > { %v3900_v15 = vpop.f32.mrf.mxu1  ;;  %v3384_v11 = vadd.f32 %v3336_v40, %v7412_v9  ;;  %v4010_v2 = vadd.f32 %v4009_v19, %v4008_v45 }
 0x45a   : > { %v3901_v23 = vadd.f32 %v3900_v15, %v3899_v34  ;;  %v4011_v22 = vpop.f32.mrf.mxu0 }
 0x45b   : > { %v3902_v26 = vpop.f32.mrf.mxu1  ;;  %3416 = vst [vmem:[%s6904_s28 + $0xd0] sm:$0xff] %v3384_v11  ;;  %v3339_v49 = vadd.f32 %v4010_v2, %v3178_v52 }
 0x45c   : > { %v3183_v53 = vadd.f32 %v3901_v23, %v6870_v43  ;;  %v4012_v63 = vpop.f32.mrf.mxu0 }
 0x45d   : > { %v3903_v31 = vpop.f32.mrf.mxu1  ;;  %v3385_v12 = vadd.f32 %v3339_v49, %v7413_v33  ;;  %v4013_v47 = vadd.f32 %v4012_v63, %v4011_v22 }
 0x45e   : > { %v3904_v38 = vadd.f32 %v3903_v31, %v3902_v26  ;;  %v4014_v56 = vpop.f32.mrf.mxu0 }
 0x45f   : > { %v3905_v6 = vpop.f32.mrf.mxu1  ;;  %3417 = vst [vmem:[%s6904_s28 + $0xd8] sm:$0xff] %v3385_v12  ;;  %v3344_v57 = vadd.f32 %v4013_v47, %v3183_v53 }
 0x460   : > { %v3186_v62 = vadd.f32 %v3904_v38, %v6870_v43  ;;  %v4015_v20 = vpop.f32.mrf.mxu0 }
 0x461   : > { %v3906_v51 = vpop.f32.mrf.mxu1  ;;  %v3386_v58 = vadd.f32 %v3344_v57, %v7414_v29  ;;  %v4016_v5 = vadd.f32 %v4015_v20, %v4014_v56 }
 0x462   : > { %v3907_v37 = vadd.f32 %v3906_v51, %v3905_v6  ;;  %v4017_v16 = vpop.f32.mrf.mxu0 }
 0x463   : > { %v3908_v28 = vpop.f32.mrf.mxu1  ;;  %3418 = vst [vmem:[%s6904_s28 + $0xe0] sm:$0xff] %v3386_v58  ;;  %v3347_v14 = vadd.f32 %v4016_v5, %v3186_v62 }
 0x464   : > { %v3191_v13 = vadd.f32 %v3907_v37, %v6870_v43  ;;  %v4018_v39 = vpop.f32.mrf.mxu0 }
 0x465   : > { %v3909_v18 = vpop.f32.mrf.mxu1  ;;  %v3387_v60 = vadd.f32 %v3347_v14, %v7415_v8  ;;  %v4019_v48 = vadd.f32 %v4018_v39, %v4017_v16 }
 0x466   : > { %v3910_v7 = vadd.f32 %v3909_v18, %v3908_v28  ;;  %v4020_v59 = vpop.f32.mrf.mxu0 }
 0x467   : > { %3419 = vst [vmem:[%s6904_s28 + $0xe8] sm:$0xff] %v3387_v60  ;;  %v3352_v55 = vadd.f32 %v4019_v48, %v3191_v13 }
 0x468   : > { %v3194_v41 = vadd.f32 %v3910_v7, %v6870_v43  ;;  %v4021_v30 = vpop.f32.mrf.mxu0 }
 0x469   : > { %v3388_v54 = vadd.f32 %v3352_v55, %v7416_v50  ;;  %v4022_v27 = vadd.f32 %v4021_v30, %v4020_v59 }
 0x46b   : > { %3420 = vst [vmem:[%s6904_s28 + $0xf0] sm:$0xff] %v3388_v54  ;;  %v3355_v1 = vadd.f32 %v4022_v27, %v3194_v41 }
 0x46d   : > { %v3389_v43 = vadd.f32 %v3355_v1, %v7417_v32 }
 0x46f   : > { %3421 = vst [vmem:[%s6904_s28 + $0xf8] sm:$0xff] %v3389_v43 }
 0x470   : > { %4707 = shalt.err (!%p4704_p3)
}
 0x471   : > { %s4708_s21 = scalar_lea.hbm %s7009_s13, 4096  ;;  %s4712_s11 = scalar_lea.hbm %s7063_s7, 8192 }
 0x472   : > { %p4709_p4 = scmp.ne.s32.totalorder %s7009_s13, %s4708_s21  ;;  %p4713_p2 = scmp.lt.s32.totalorder %s7009_s13, %s7063_s7 }
 0x473   : > { %p4714_p7 = scmp.lt.s32.totalorder %s4712_s11, %s4708_s21 }
 0x474   : > { %p4710_p12 = pnand %p4709_p4, %p7418_p10 }
 0x475   : > { %p4715_p8 = por %p4714_p7, %p4713_p2 }
 0x476   : > { %p4711_p6 = pneg %p4710_p12 }
 0x478   : > { %p4716_p11 = pnand %p4715_p8, %p4711_p6 }
 0x47a   : > { %4719 = shalt.err (!%p4716_p11)
}
 0x47b   : > { %s4786_s14 = smov 128   ;;  %s4787_s29 = smov 8  }
 0x47c   : > { %4061 = dma.vmem_to_hbm [thread:$0]  (%p7418_p10), %s7011_s15, 4096, %s7009_s13, %s3423_s22, %s4786_s14, %s4786_s14, %s4787_s29  }
 0x47d PF: > { %s3452_s19 = sand.u32 1, %s4758_s24   ;;  %p7419_p13 = scmp.ne.s32.totalorder %s7170_s18, 0 }
 0x47e   : > { %p7420_p0 = scmp.ge.s32.totalorder %s4770_s27, 2  ;;  %s3453_s30 = scalar_lea.sflag [#allocation4], %s3452_s19 }
 0x480   : > { %p4084_p5 = pnand %p7420_p0, %p7419_p13 }
 0x482   : > { %p4085_p9 = pneg %p4084_p5 }
 0x484   : > { %4753 = dma.done.wait (%p4085_p9), %s3453_s30, 4096  }
 0x485   : > { %4755 = vsyncadd (%p4085_p9), %s3453_s30, 4294963200  ;;  %p23_p1 = scmp.ge.s32.totalorder %s4930_s10, 4   ;;  %s7421_s24 = smov %s4762_s25 }
 0x486   : > { %s7422_s25 = smov %s4766_s26  ;;  %s7423_s26 = smov %s4942_s16 }
 0x487   : > { %s7424_s27 = smov %s4930_s10  ;;  %25 = sbr.rel (!%p23_p1) target bundleno = 10 (0xa), region = 113 }
 0x48c   :  { %3458 = vsyncpa [#allocation3], 1 }
 0x48d   :  { %3460 = vsyncpa [#allocation3 + $0x1], 1 }
 0x48e   :  { %3461 = vsyncpa [#allocation6], 1 }
 0x48f   :  { %3462 = vsyncpa [#allocation9], 1 }
 0x490   :  { %3463 = vsyncpa [#allocation12], 1 }
 0x491   :  { %3464 = vsyncpa [#allocation4], 1 }
 0x492   :  { %3466 = vsyncpa [#allocation4 + $0x1], 1 }

</bundles_post_ra>
